<compile_context>
chip_gen: v6e
topology: v6e:2x2x1
jax: 0.10.0
libtpu: 0.0.40
codegen_flags: <defaults>
</compile_context>

<pallas_src>
import jax
import jax.numpy as jnp
import numpy as np
from jax.experimental import pallas as pl
from jax.experimental.pallas import tpu as pltpu

N_FREQ = 12
IN_DIMS = 6
ENC_DIM = IN_DIMS * N_FREQ * 2   # 144  (= tcnn Frequency encoding n_output_dims)
HIDDEN = 64                      # FullyFusedMLP n_neurons
OUT_DIM = 1


def segment_explorer_kernel(x_ref, r_ref, phase_ref, w1_ref, w2_ref, w3_ref, out_ref):
    # Frequency encoding: angles = x @ R (freq scale folded into R) + phase; feat = sin(angles)
    x = x_ref[...]                                                    # (T, 6)   f32
    ang = jnp.dot(x, r_ref[...], preferred_element_type=jnp.float32)  # (T, 144) MXU
    feat = jnp.sin(ang + phase_ref[...])                              # EUP

    # Bias-free MLP 144 -> 64 -> 64 (ReLU hidden): bf16 MXU matmuls, f32 accumulation.
    h1 = jnp.dot(feat.astype(jnp.bfloat16), w1_ref[...],
                 preferred_element_type=jnp.float32)
    h1 = jnp.maximum(h1, 0.0)
    h2 = jnp.dot(h1.astype(jnp.bfloat16), w2_ref[...],
                 preferred_element_type=jnp.float32)
    h2 = jnp.maximum(h2, 0.0)

    # Final 64 -> 1 layer as VPU multiply + cross-lane reduce (avoids a wasted N=1 MXU pass).
    logit = jnp.sum(h2 * w3_ref[...], axis=-1, keepdims=True)         # (T, 1)
    out_ref[...] = jax.nn.sigmoid(logit)                              # torch.sigmoid


def _round_up(a, b):
    return pl.cdiv(a, b) * b


def _encoding_constants():
    """R: (6,144) one-hot replication matrix with pi*2^f folded in.
    phase: (1,144) = 0 on sin slots, pi/2 on cos slots."""
    freqs = (2.0 ** np.arange(N_FREQ)) * np.pi
    R = np.zeros((IN_DIMS, ENC_DIM), np.float32)
    phase = np.zeros((1, ENC_DIM), np.float32)
    for d in range(IN_DIMS):
        base = d * 2 * N_FREQ
        R[d, base:base + N_FREQ] = freqs                      # sin slots
        R[d, base + N_FREQ:base + 2 * N_FREQ] = freqs         # cos slots
        phase[0, base + N_FREQ:base + 2 * N_FREQ] = np.pi / 2
    return jnp.asarray(R), jnp.asarray(phase)


def segment_explorer_forward(sample_segment, w1, w2, w3, *, tile_p=2048):
    """sample_segment: [..., 6] -> occupancy [P, 1], P = prod(leading dims)."""
    x = sample_segment.reshape(-1, IN_DIMS).astype(jnp.float32)       # (P, 6)
    P = x.shape[0]

    # Row tile: large enough to amortize per-step overhead, small enough for v7x VMEM.
    tile_p = min(tile_p, _round_up(P, 128))
    P_pad = _round_up(P, tile_p)
    if P_pad != P:
        x = jnp.pad(x, ((0, P_pad - P), (0, 0)))                      # padded rows ignored

    R, phase = _encoding_constants()
    w1b = w1.astype(jnp.bfloat16)
    w2b = w2.astype(jnp.bfloat16)
    w3r = w3.reshape(1, HIDDEN).astype(jnp.float32)

    out = pl.pallas_call(
        segment_explorer_kernel,
        out_shape=jax.ShapeDtypeStruct((P_pad, OUT_DIM), jnp.float32),
        grid=(P_pad // tile_p,),
        in_specs=[
            pl.BlockSpec((tile_p, IN_DIMS), lambda i: (i, 0)),        # x: tiled over points
            pl.BlockSpec((IN_DIMS, ENC_DIM), lambda i: (0, 0)),       # R: VMEM-resident
            pl.BlockSpec((1, ENC_DIM), lambda i: (0, 0)),             # phase: resident
            pl.BlockSpec((ENC_DIM, HIDDEN), lambda i: (0, 0)),        # w1: resident
            pl.BlockSpec((HIDDEN, HIDDEN), lambda i: (0, 0)),         # w2: resident
            pl.BlockSpec((1, HIDDEN), lambda i: (0, 0)),              # w3: resident
        ],
        out_specs=pl.BlockSpec((tile_p, OUT_DIM), lambda i: (i, 0)),
        compiler_params=pltpu.CompilerParams(
            dimension_semantics=("parallel",)),
    )(x, R, phase, w1b, w2b, w3r)

    return out[:P]


def make_params(key):
    """Deterministic synthetic weights for the bias-free FullyFusedMLP:
       144 -> 64 (ReLU) -> 64 (ReLU) -> 1 (no output activation)."""
    k1, k2, k3 = jax.random.split(key, 3)
    w1 = jax.random.normal(k1, (ENC_DIM, HIDDEN), jnp.float32) * (2.0 / ENC_DIM) ** 0.5
    w2 = jax.random.normal(k2, (HIDDEN, HIDDEN), jnp.float32) * (2.0 / HIDDEN) ** 0.5
    w3 = jax.random.normal(k3, (HIDDEN, OUT_DIM), jnp.float32) * (2.0 / HIDDEN) ** 0.5
    return w1, w2, w3


if __name__ == "__main__":
    key = jax.random.PRNGKey(0)
    k_seg, k_par = jax.random.split(key)

    # v_data['sample_segment']: small shape [B=2, N=64, 6]  ->  P = 128 segment samples
    sample_segment = jax.random.uniform(k_seg, (2, 64, 6), jnp.float32)
    w1, w2, w3 = make_params(k_par)

    occupancy = segment_explorer_forward(sample_segment, w1, w2, w3)
    occupancy = jax.block_until_ready(occupancy)

    assert occupancy.shape == (128, 1)
    assert bool(jnp.all(jnp.isfinite(occupancy)))
    assert bool(jnp.all((occupancy >= 0.0) & (occupancy <= 1.0)))
    print("KERNEL_OK")
</pallas_src>

<mosaic_0001>
module attributes {stable_mosaic.version = 11 : i64} {
  func.func @segment_explorer_kernel(%arg0: i32, %arg1: memref<128x6xf32, #tpu.memory_space<vmem>>, %arg2: memref<6x144xf32, #tpu.memory_space<vmem>>, %arg3: memref<1x144xf32, #tpu.memory_space<vmem>>, %arg4: memref<144x64xbf16, #tpu.memory_space<vmem>>, %arg5: memref<64x64xbf16, #tpu.memory_space<vmem>>, %arg6: memref<1x64xf32, #tpu.memory_space<vmem>>, %arg7: memref<128x1xf32, #tpu.memory_space<vmem>>) attributes {dimension_semantics = [#tpu.dimension_semantics<parallel>], iteration_bounds = array<i64: 1>, scalar_prefetch = 0 : i64, scratch_operands = 0 : i64, tpu.core_type = #tpu.core_type<tc>, window_params = [{transform_indices = @transform_0, window_bounds = array<i64: 128, 6>}, {pipeline_mode = #tpu.pipeline_mode<synchronous>, transform_indices = @transform_1, window_bounds = array<i64: 6, 144>}, {pipeline_mode = #tpu.pipeline_mode<synchronous>, transform_indices = @transform_2, window_bounds = array<i64: 1, 144>}, {pipeline_mode = #tpu.pipeline_mode<synchronous>, transform_indices = @transform_3, window_bounds = array<i64: 144, 64>}, {pipeline_mode = #tpu.pipeline_mode<synchronous>, transform_indices = @transform_4, window_bounds = array<i64: 64, 64>}, {pipeline_mode = #tpu.pipeline_mode<synchronous>, transform_indices = @transform_5, window_bounds = array<i64: 1, 64>}, {transform_indices = @transform_6, window_bounds = array<i64: 128, 1>}]} {
    %c0 = arith.constant 0 : index
    %c0_0 = arith.constant 0 : index
    %0 = vector.load %arg1[%c0, %c0_0] : memref<128x6xf32, #tpu.memory_space<vmem>>, vector<128x6xf32>
    %c0_1 = arith.constant 0 : index
    %c0_2 = arith.constant 0 : index
    %1 = vector.load %arg2[%c0_1, %c0_2] : memref<6x144xf32, #tpu.memory_space<vmem>>, vector<6x144xf32>
    %cst = arith.constant dense<0.000000e+00> : vector<128x144xf32>
    %2 = tpu.matmul %0, %1, %cst {dimension_numbers = #tpu.dot_dimension_numbers<[1], [0], [0], [1], [0, 0, 1, 1], [], []>} : vector<128x6xf32>, vector<6x144xf32>, vector<128x144xf32> -> vector<128x144xf32>
    %c0_3 = arith.constant 0 : index
    %c0_4 = arith.constant 0 : index
    %3 = vector.load %arg3[%c0_3, %c0_4] : memref<1x144xf32, #tpu.memory_space<vmem>>, vector<1x144xf32>
    %4 = vector.broadcast %3 : vector<1x144xf32> to vector<128x144xf32>
    %5 = arith.addf %2, %4 : vector<128x144xf32>
    %6 = math.sin %5 : vector<128x144xf32>
    %7 = arith.truncf %6 : vector<128x144xf32> to vector<128x144xbf16>
    %c0_5 = arith.constant 0 : index
    %c0_6 = arith.constant 0 : index
    %8 = vector.load %arg4[%c0_5, %c0_6] : memref<144x64xbf16, #tpu.memory_space<vmem>>, vector<144x64xbf16>
    %cst_7 = arith.constant dense<0.000000e+00> : vector<128x64xf32>
    %9 = tpu.matmul %7, %8, %cst_7 {dimension_numbers = #tpu.dot_dimension_numbers<[1], [0], [0], [1], [0, 0, 1, 1], [], []>} : vector<128x144xbf16>, vector<144x64xbf16>, vector<128x64xf32> -> vector<128x64xf32>
    %cst_8 = arith.constant 0.000000e+00 : f32
    %10 = vector.broadcast %cst_8 : f32 to vector<128x64xf32>
    %11 = arith.maximumf %9, %10 : vector<128x64xf32>
    %12 = arith.truncf %11 : vector<128x64xf32> to vector<128x64xbf16>
    %c0_9 = arith.constant 0 : index
    %c0_10 = arith.constant 0 : index
    %13 = vector.load %arg5[%c0_9, %c0_10] : memref<64x64xbf16, #tpu.memory_space<vmem>>, vector<64x64xbf16>
    %cst_11 = arith.constant dense<0.000000e+00> : vector<128x64xf32>
    %14 = tpu.matmul %12, %13, %cst_11 {dimension_numbers = #tpu.dot_dimension_numbers<[1], [0], [0], [1], [0, 0, 1, 1], [], []>} : vector<128x64xbf16>, vector<64x64xbf16>, vector<128x64xf32> -> vector<128x64xf32>
    %cst_12 = arith.constant 0.000000e+00 : f32
    %15 = vector.broadcast %cst_12 : f32 to vector<128x64xf32>
    %16 = arith.maximumf %14, %15 : vector<128x64xf32>
    %c0_13 = arith.constant 0 : index
    %c0_14 = arith.constant 0 : index
    %17 = vector.load %arg6[%c0_13, %c0_14] : memref<1x64xf32, #tpu.memory_space<vmem>>, vector<1x64xf32>
    %18 = vector.broadcast %17 : vector<1x64xf32> to vector<128x64xf32>
    %19 = arith.mulf %16, %18 : vector<128x64xf32>
    %cst_15 = arith.constant dense<0.000000e+00> : vector<128xf32>
    %20 = vector.multi_reduction <add>, %19, %cst_15 [1] : vector<128x64xf32> to vector<128xf32>
    %21 = vector.shape_cast %20 : vector<128xf32> to vector<128x1xf32>
    %22 = arith.negf %21 : vector<128x1xf32>
    %23 = math.exp %22 : vector<128x1xf32>
    %cst_16 = arith.constant 1.000000e+00 : f32
    %24 = vector.broadcast %cst_16 : f32 to vector<128x1xf32>
    %25 = arith.addf %24, %23 : vector<128x1xf32>
    %26 = arith.divf %24, %25 : vector<128x1xf32>
    %c0_17 = arith.constant 0 : index
    %c0_18 = arith.constant 0 : index
    %27 = vector.load %arg7[%c0_17, %c0_18] : memref<128x1xf32, #tpu.memory_space<vmem>>, vector<128x1xf32>
    tpu.vector_store %arg7[%c0_17, %c0_18], %26 {strides = array<i32>} : memref<128x1xf32, #tpu.memory_space<vmem>>, vector<128x1xf32>,
    return
  }
  func.func @transform_0(%arg0: i32) -> (i32, i32) {
    %c0_i32 = arith.constant 0 : i32
    %c0_i32_0 = arith.constant 0 : i32
    return %arg0, %c0_i32 : i32, i32
  }
  func.func @transform_1(%arg0: i32) -> (i32, i32) {
    %c0_i32 = arith.constant 0 : i32
    %c0_i32_0 = arith.constant 0 : i32
    %c0_i32_1 = arith.constant 0 : i32
    return %c0_i32, %c0_i32_0 : i32, i32
  }
  func.func @transform_2(%arg0: i32) -> (i32, i32) {
    %c0_i32 = arith.constant 0 : i32
    %c0_i32_0 = arith.constant 0 : i32
    %c0_i32_1 = arith.constant 0 : i32
    return %c0_i32, %c0_i32_0 : i32, i32
  }
  func.func @transform_3(%arg0: i32) -> (i32, i32) {
    %c0_i32 = arith.constant 0 : i32
    %c0_i32_0 = arith.constant 0 : i32
    %c0_i32_1 = arith.constant 0 : i32
    return %c0_i32, %c0_i32_0 : i32, i32
  }
  func.func @transform_4(%arg0: i32) -> (i32, i32) {
    %c0_i32 = arith.constant 0 : i32
    %c0_i32_0 = arith.constant 0 : i32
    %c0_i32_1 = arith.constant 0 : i32
    return %c0_i32, %c0_i32_0 : i32, i32
  }
  func.func @transform_5(%arg0: i32) -> (i32, i32) {
    %c0_i32 = arith.constant 0 : i32
    %c0_i32_0 = arith.constant 0 : i32
    %c0_i32_1 = arith.constant 0 : i32
    return %c0_i32, %c0_i32_0 : i32, i32
  }
  func.func @transform_6(%arg0: i32) -> (i32, i32) {
    %c0_i32 = arith.constant 0 : i32
    %c0_i32_0 = arith.constant 0 : i32
    return %arg0, %c0_i32 : i32, i32
  }
}

</mosaic_0001>

<bundles_post_ra>
// kernel: tpu_custom_call.1
= control target key start
LH: loop header
LB: loop body
LE: loop exit
PB: predicated region body
PF: predicated region fallthrough
CT: control target
= control target key end

     0   :  { %vm103_vm0 = vcmask 1045504   ;;  %v4760_v2 = vmov 0.0   ;;  %vm54_vm1 = vcmask 48128   ;;  %v44_v19 = vlaneseq  ;;  %s8145_s1 = inlined_call_operand.vmem [shape: f32[6,144], index: 1, kind: input, shape index: {}]   ;;  %s8146_s0 = inlined_call_operand.vmem [shape: f32[128,6], index: 0, kind: input, shape index: {}]   ;;  %s8147_s2 = inlined_call_operand.vmem [shape: f32[1,144], index: 2, kind: input, shape index: {}]   ;;  %s8148_s3 = inlined_call_operand.vmem [shape: bf16[144,64], index: 3, kind: input, shape index: {}]   ;;  %s8149_s4 = inlined_call_operand.vmem [shape: bf16[64,64], index: 4, kind: input, shape index: {}]   ;;  %s8150_s5 = inlined_call_operand.vmem [shape: f32[1,64], index: 5, kind: input, shape index: {}]   ;;  %s8151_s6 = inlined_call_operand.vmem [shape: f32[128,1], index: 6, kind: output, shape index: {}]  }
   0x1   :  { %v41_v0 = vld [vmem:[%s8145_s1 + $0x8] sm:$0x3f]  ;;  %v40_v1 = vld [vmem:[%s8145_s1] sm:$0x3f]  ;;  %174 = vmatprep.mubr.f32.mxu0 %v4760_v2  ;;  %v26_v5 = vld [vmem:[%s8146_s0 + $0x10] sm:$0xff] }
   0x2   :  { %v24_v3 = vld [vmem:[%s8146_s0] sm:$0xff]  ;;  %4191 = vmatprep.subr.msk.mxu0 %vm103_vm0, %v41_v0  ;;  %v25_v4 = vld [vmem:[%s8146_s0 + $0x8] sm:$0xff]  ;;  %v27_v6 = vld [vmem:[%s8146_s0 + $0x18] sm:$0xff]  ;;  %v45_v20 = vshrl.u32 %v44_v19, 7  ;;  %v8166_v55 = vmov 683565275  }
   0x3   :  { %4192 = vmatpush1.msk.msra.mxu0 %vm103_vm0, %v40_v1  ;;  %v28_v7 = vld [vmem:[%s8146_s0 + $0x20] sm:$0xff]  ;;  %v29_v8 = vld [vmem:[%s8146_s0 + $0x28] sm:$0xff]  ;;  %v30_v9 = vld [vmem:[%s8146_s0 + $0x30] sm:$0xff]  ;;  %v8164_v58 = vmov 2475754826  }
   0x4   :  { %4193 = vmatmul.mubr.msk.f32.vlgmr.msra.gmra.mxu0 %vm54_vm1, %v24_v3  ;;  %v31_v10 = vld [vmem:[%s8146_s0 + $0x38] sm:$0xff]  ;;  %v32_v11 = vld [vmem:[%s8146_s0 + $0x40] sm:$0xff]  ;;  %v33_v12 = vld [vmem:[%s8146_s0 + $0x48] sm:$0xff]  ;;  %v46_v21 = vsub.s32 0, %v45_v20  ;;  %v50_v23 = vsub.s32 1, %v45_v20 }
   0x5   :  { %180 = vmatprep.mubr.f32.mxu0 %v4760_v2  ;;  %v34_v13 = vld [vmem:[%s8146_s0 + $0x50] sm:$0xff]  ;;  %v35_v14 = vld [vmem:[%s8146_s0 + $0x58] sm:$0xff]  ;;  %v36_v15 = vld [vmem:[%s8146_s0 + $0x60] sm:$0xff]  ;;  %v8162_v60 = vmov 2131351028  }
   0x6   :  { %v37_v16 = vld [vmem:[%s8146_s0 + $0x68] sm:$0xff]  ;;  %v38_v17 = vld [vmem:[%s8146_s0 + $0x70] sm:$0xff]  ;;  %v39_v18 = vld [vmem:[%s8146_s0 + $0x78] sm:$0xff]  ;;  %v8157_v62 = vmov 2102212464  }
   0x7   :  { %v42_v22 = vld [vmem:[%s8147_s2] sm:$0x3]  ;;  %v8168_v0 = vmov 920167782  }
   0x8   :  { %4194 = vmatmul.mubr.msk.f32.gmra.mxu0 %vm54_vm1, %v25_v4  ;;  %v4876_v24 = vrot.slane %v42_v22, %v46_v21  ;;  %v4878_v25 = vrot.slane %v42_v22, %v50_v23 }
   0x9   :  { %186 = vmatprep.mubr.f32.mxu0 %v4760_v2 }
   0xc   :  { %4195 = vmatmul.mubr.msk.f32.gmra.mxu0 %vm54_vm1, %v26_v5 }
   0xd   :  { %192 = vmatprep.mubr.f32.mxu0 %v4760_v2 }
  0x10   :  { %4196 = vmatmul.mubr.msk.f32.gmra.mxu0 %vm54_vm1, %v27_v6 }
  0x11   :  { %198 = vmatprep.mubr.f32.mxu0 %v4760_v2 }
  0x14   :  { %4197 = vmatmul.mubr.msk.f32.gmra.mxu0 %vm54_vm1, %v28_v7  ;;  %v8159_v7 = vmov 1326507024  }
  0x15   :  { %204 = vmatprep.mubr.f32.mxu0 %v4760_v2 }
  0x18   :  { %4198 = vmatmul.mubr.msk.f32.gmra.mxu0 %vm54_vm1, %v29_v8 }
  0x19   :  { %210 = vmatprep.mubr.f32.mxu0 %v4760_v2 }
  0x1c   :  { %4199 = vmatmul.mubr.msk.f32.gmra.mxu0 %vm54_vm1, %v30_v9 }
  0x1d   :  { %216 = vmatprep.mubr.f32.mxu0 %v4760_v2 }
  0x20   :  { %4200 = vmatmul.mubr.msk.f32.gmra.mxu0 %vm54_vm1, %v31_v10 }
  0x21   :  { %222 = vmatprep.mubr.f32.mxu0 %v4760_v2 }
  0x24   :  { %4201 = vmatmul.mubr.msk.f32.gmra.mxu0 %vm54_vm1, %v32_v11 }
  0x25   :  { %228 = vmatprep.mubr.f32.mxu0 %v4760_v2 }
  0x28   :  { %4202 = vmatmul.mubr.msk.f32.gmra.mxu0 %vm54_vm1, %v33_v12 }
  0x29   :  { %234 = vmatprep.mubr.f32.mxu0 %v4760_v2 }
  0x2c   :  { %4203 = vmatmul.mubr.msk.f32.gmra.mxu0 %vm54_vm1, %v34_v13 }
  0x2d   :  { %240 = vmatprep.mubr.f32.mxu0 %v4760_v2 }
  0x30   :  { %4204 = vmatmul.mubr.msk.f32.gmra.mxu0 %vm54_vm1, %v35_v14 }
  0x31   :  { %246 = vmatprep.mubr.f32.mxu0 %v4760_v2 }
  0x34   :  { %4205 = vmatmul.mubr.msk.f32.gmra.mxu0 %vm54_vm1, %v36_v15 }
  0x35   :  { %252 = vmatprep.mubr.f32.mxu0 %v4760_v2 }
  0x38   :  { %4206 = vmatmul.mubr.msk.f32.gmra.mxu0 %vm54_vm1, %v37_v16 }
  0x39   :  { %258 = vmatprep.mubr.f32.mxu0 %v4760_v2 }
  0x3c   :  { %4207 = vmatmul.mubr.msk.f32.gmra.mxu0 %vm54_vm1, %v38_v17 }
  0x3d   :  { %264 = vmatprep.mubr.f32.mxu0 %v4760_v2 }
  0x40   :  { %4208 = vmatmul.mubr.msk.f32.gmra.mxu0 %vm54_vm1, %v39_v18 }
  0xc4   :  { %v176_v26 = vpop.f32.mrf.mxu0 }
  0xc5   :  { %v4881_v27 = vadd.f32 %v176_v26, %v4876_v24 }
  0xc6   :  { %v178_v28 = vpop.f32.mrf.mxu0 }
  0xc7   :  { %8339 = vst [vmem:[#allocation2_spill] sm:$0xff] %v4881_v27  ;;  %v271_v29 = vand.u32 2147483647, %v4881_v27  ;;  %v274_v30 = vand.u32 2139095040, %v4881_v27  ;;  %v4886_v31 = vadd.f32 %v178_v28, %v4878_v25 }
  0xc8   :  { %v182_v32 = vpop.f32.mrf.mxu0 }
  0xc9   :  { %v275_v33 = vshrl.u32 %v274_v30, 23  ;;  %v278_v34 = vand.u32 8388607, %v271_v29  ;;  %v8153_v35 = vand.u32 2147483647, %v4886_v31  ;;  %v378_v36 = vand.u32 2139095040, %v4886_v31 }
  0xca   :  { %v4893_v38 = vadd.f32 %v182_v32, %v4876_v24  ;;  %v184_v45 = vpop.f32.mrf.mxu0 }
  0xcb   :  { %v4209_v37 = vadd.s32 4294967169, %v275_v33  ;;  %v379_v39 = vshrl.u32 %v378_v36, 23  ;;  %v279_v41 = vor.u32 8388608, %v278_v34  ;;  %v4897_v43 = vand.u32 8388607, %v8153_v35 }
  0xcc   :  { %8340 = vst [vmem:[#allocation3_spill] sm:$0xff] %v4893_v38  ;;  %v482_v44 = vand.u32 2139095040, %v4893_v38  ;;  %v8156_v52 = vand.u32 2147483647, %v4893_v38  ;;  %v4905_v53 = vadd.f32 %v184_v45, %v4878_v25 }
  0xcd   :  { %v281_v40 = vadd.s32 1, %v4209_v37  ;;  %v4213_v42 = vadd.s32 4294967169, %v379_v39  ;;  %v4900_v50 = vshll.u32 %v279_v41, 8  ;;  %v383_v51 = vor.u32 8388608, %v4897_v43 }
  0xce   :  { %v483_v57 = vshrl.u32 %v482_v44, 23  ;;  %v586_v30 = vand.u32 2139095040, %v4905_v53 }
  0xcf   :  { %vm282_vm2 = vcmp.gt.s32.totalorder %v281_v40, 0  ;;  %v385_v47 = vadd.s32 1, %v4213_v42 }
  0xd0   :  { %v283_v46 = vsel %vm282_vm2, %v281_v40, 0 }
  0xd1   :  { %v284_v48 = vshrl.u32 %v283_v46, 5  ;;  %v285_v49 = vand.u32 31, %v283_v46  ;;  %vm386_vm3 = vcmp.gt.s32.totalorder %v385_v47, 0 }
  0xd2   :  { %v387_v12 = vsel %vm386_vm3, %v385_v47, 0 }
  0xd3   :  { %v286_v54 = vsub.s32 32, %v285_v49  ;;  %v288_v56 = vshll.u32 %v8166_v55, %v285_v49  ;;  %v291_v59 = vshll.u32 %v8164_v58, %v285_v49  ;;  %v294_v61 = vshll.u32 %v8162_v60, %v285_v49 }
  0xd4   :  { %v297_v63 = vshll.u32 %v8157_v62, %v285_v49  ;;  %v300_v1 = vshll.u32 %v8168_v0, %v285_v49  ;;  %vm303_vm4 = vcmp.lt.s32.totalorder %v284_v48, 1  ;;  %vm305_vm5 = vcmp.lt.s32.totalorder %v284_v48, 3 }
  0xd5   :  { %v289_v2 = vshrl.u32 %v8164_v58, %v286_v54  ;;  %v292_v3 = vshrl.u32 %v8162_v60, %v286_v54  ;;  %v295_v4 = vshrl.u32 %v8157_v62, %v286_v54  ;;  %v287_v5 = vshrl.u32 %v8166_v55, %v286_v54 }
  0xd6   :  { %v298_v6 = vshrl.u32 %v8168_v0, %v286_v54  ;;  %v301_v8 = vshrl.u32 %v8159_v7, %v286_v54  ;;  %vm306_vm6 = vcmp.lt.s32.totalorder %v284_v48, 4  ;;  %v389_v15 = vand.u32 31, %v387_v12 }
  0xd7   :  { %v290_v9 = vor.u32 %v289_v2, %v288_v56  ;;  %v293_v10 = vor.u32 %v292_v3, %v291_v59  ;;  %v296_v11 = vor.u32 %v295_v4, %v294_v61  ;;  %vm304_vm7 = vcmp.lt.s32.totalorder %v284_v48, 2 }
  0xd8   :  { %v299_v13 = vor.u32 %v298_v6, %v297_v63  ;;  %v302_v14 = vor.u32 %v301_v8, %v300_v1  ;;  %v390_v23 = vsub.s32 32, %v389_v15  ;;  %v388_v36 = vshrl.u32 %v387_v12, 5 }
  0xd9   :  { %v307_v16 = vsel %vm303_vm4, %v287_v5, %v290_v9  ;;  %v308_v17 = vsel %vm306_vm6, %v296_v11, 2102212464  ;;  %v311_v18 = vsel %vm303_vm4, %v290_v9, %v293_v10  ;;  %v315_v19 = vsel %vm303_vm4, %v293_v10, %v296_v11 }
  0xda   :  { %v309_v20 = vsel %vm305_vm5, %v293_v10, %v308_v17  ;;  %v312_v21 = vsel %vm306_vm6, %v299_v13, 920167782  ;;  %v316_v22 = vsel %vm306_vm6, %v302_v14, 1326507024  ;;  %v392_v42 = vshll.u32 %v8166_v55, %v389_v15 }
  0xdb   :  { %v313_v26 = vsel %vm305_vm5, %v296_v11, %v312_v21  ;;  %v317_v28 = vsel %vm305_vm5, %v299_v13, %v316_v22  ;;  %v310_v32 = vsel %vm304_vm7, %v307_v16, %v309_v20  ;;  %v393_v44 = vshrl.u32 %v8164_v58, %v390_v23 }
  0xdc   :  { %v314_v33 = vsel %vm304_vm7, %v311_v18, %v313_v26  ;;  %v318_v34 = vsel %vm304_vm7, %v315_v19, %v317_v28  ;;  %v395_v45 = vshll.u32 %v8164_v58, %v389_v15  ;;  %v396_v46 = vshrl.u32 %v8162_v60, %v390_v23 }
  0xdd   :  { %v4927_v37 = vmul.u32.u64.low %v4900_v50, %v318_v34  ;;  %v4928_v39 = vmul.u32.u64.high %v4900_v50, %v318_v34, %v4927_v37  ;;  %v4931_v40 = vmul.u32.u64.low %v4900_v50, %v314_v33  ;;  %v4932_v41 = vmul.u32.u64.high %v4900_v50, %v314_v33, %v4931_v40 }
  0xde   :  { %v398_v47 = vshll.u32 %v8162_v60, %v389_v15  ;;  %v399_v48 = vshrl.u32 %v8157_v62, %v390_v23  ;;  %v401_v49 = vshll.u32 %v8157_v62, %v389_v15  ;;  %v402_v54 = vshrl.u32 %v8168_v0, %v390_v23 }
  0xdf   :  { %v394_v56 = vor.u32 %v393_v44, %v392_v42  ;;  %v397_v59 = vor.u32 %v396_v46, %v395_v45  ;;  %v404_v61 = vshll.u32 %v8168_v0, %v389_v15  ;;  %v405_v63 = vshrl.u32 %v8159_v7, %v390_v23 }
  0xe0   :  { %vm328_vm8 = vc.u32 %v4928_v39, %v4931_v40  ;;  %v329_v1 = vadd.s32 1, %v4932_v41  ;;  %v400_v2 = vor.u32 %v399_v48, %v398_v47  ;;  %v4217_v3 = vadd.s32 4294967169, %v483_v57 }
  0xe1   :  { %v326_v4 = vmul.u32 %v4900_v50, %v310_v32  ;;  %v403_v5 = vor.u32 %v402_v54, %v401_v49  ;;  %v406_v6 = vor.u32 %v405_v63, %v404_v61  ;;  %vm407_vm9 = vcmp.lt.s32.totalorder %v388_v36, 1 }
  0xe2   :  { %v330_v8 = vsel %vm328_vm8, %v329_v1, %v4932_v41  ;;  %vm410_vm10 = vcmp.lt.s32.totalorder %v388_v36, 4  ;;  %v415_v9 = vsel %vm407_vm9, %v394_v56, %v397_v59  ;;  %v423_v10 = vshll.u32 %v383_v51, 8 }
  0xe3   :  { %v331_v11 = vadd.s32 %v330_v8, %v326_v4  ;;  %vm409_vm11 = vcmp.lt.s32.totalorder %v388_v36, 3  ;;  %v416_v12 = vsel %vm410_vm10, %v403_v5, 920167782  ;;  %v419_v13 = vsel %vm407_vm9, %v397_v59, %v400_v2 }
  0xe4   :  { %vm408_vm12 = vcmp.lt.s32.totalorder %v388_v36, 2  ;;  %v417_v57 = vsel %vm409_vm11, %v400_v2, %v416_v12  ;;  %v420_v50 = vsel %vm410_vm10, %v406_v6, 1326507024  ;;  %v489_v14 = vadd.s32 1, %v4217_v3 }
  0xe5   :  { %v332_v15 = vadd.s32 536870912, %v331_v11  ;;  %v412_v16 = vsel %vm410_vm10, %v400_v2, 2102212464  ;;  %v418_v17 = vsel %vm408_vm12, %v415_v9, %v417_v57  ;;  %v421_v18 = vsel %vm409_vm11, %v403_v5, %v420_v50 }
  0xe6   :  { %v391_v19 = vshrl.u32 %v8166_v55, %v390_v23  ;;  %v422_v43 = vsel %vm408_vm12, %v419_v13, %v421_v18  ;;  %v4959_v51 = vmul.u32.u64.low %v423_v10, %v418_v17  ;;  %v4960_v20 = vmul.u32.u64.high %v423_v10, %v418_v17, %v4959_v51 }
  0xe7   :  { %v4963_v21 = vshrl.u32 %v332_v15, 30  ;;  %v4965_v22 = vmul.u32.u64.low %v423_v10, %v422_v43  ;;  %v4966_v26 = vmul.u32.u64.high %v423_v10, %v422_v43, %v4965_v22  ;;  %vm490_vm13 = vcmp.gt.s32.totalorder %v489_v14, 0 }
  0xe8   :  { %v411_v28 = vsel %vm407_vm9, %v391_v19, %v394_v56  ;;  %v413_v32 = vsel %vm409_vm11, %v397_v59, %v412_v16  ;;  %v491_v33 = vsel %vm490_vm13, %v489_v14, 0  ;;  %v587_v34 = vshrl.u32 %v586_v30, 23 }
  0xe9   :  { %8341 = vst [vmem:[#allocation4_spill] sm:$0xff] %v4963_v21  ;;  %v334_v23 = vshll.u32 %v4963_v21, 30  ;;  %v493_v37 = vand.u32 31, %v491_v33  ;;  %v414_v41 = vsel %vm408_vm12, %v411_v28, %v413_v32  ;;  %v433_v42 = vadd.s32 1, %v4960_v20 }
  0xea   :  { %v486_v44 = vand.u32 8388607, %v8156_v52  ;;  %vm432_vm14 = vc.u32 %v4966_v26, %v4959_v51  ;;  %v492_v47 = vshrl.u32 %v491_v33, 5  ;;  %v4221_v48 = vadd.s32 4294967169, %v587_v34 }
  0xeb   :  { %v494_v45 = vsub.s32 32, %v493_v37  ;;  %v4975_v46 = vsub.s32 %v331_v11, %v334_v23  ;;  %v496_v30 = vshll.u32 %v8166_v55, %v493_v37  ;;  %v499_v36 = vshll.u32 %v8164_v58, %v493_v37 }
  0xec   :  { %v502_v54 = vshll.u32 %v8162_v60, %v493_v37  ;;  %v505_v61 = vshll.u32 %v8157_v62, %v493_v37  ;;  %v434_v1 = vsel %vm432_vm14, %v433_v42, %v4960_v20  ;;  %v508_v3 = vshll.u32 %v8168_v0, %v493_v37 }
  0xed   :  { %v497_v49 = vshrl.u32 %v8164_v58, %v494_v45  ;;  %v500_v56 = vshrl.u32 %v8162_v60, %v494_v45  ;;  %v503_v59 = vshrl.u32 %v8157_v62, %v494_v45  ;;  %v506_v63 = vshrl.u32 %v8168_v0, %v494_v45 }
  0xee   :  { %v509_v8 = vshrl.u32 %v8159_v7, %v494_v45  ;;  %v430_v9 = vmul.u32 %v423_v10, %v414_v41  ;;  %v487_v11 = vor.u32 8388608, %v486_v44  ;;  %v337_v12 = vsub.s32 0, %v4975_v46 }
  0xef   :  { %v498_v2 = vor.u32 %v497_v49, %v496_v30  ;;  %v501_v4 = vor.u32 %v500_v56, %v499_v36  ;;  %v504_v5 = vor.u32 %v503_v59, %v502_v54  ;;  %v507_v6 = vor.u32 %v506_v63, %v505_v61 }
  0xf0   :  { %v510_v13 = vor.u32 %v509_v8, %v508_v3  ;;  %vm511_vm15 = vcmp.lt.s32.totalorder %v492_v47, 1  ;;  %v593_v57 = vadd.s32 1, %v4221_v48  ;;  %v435_v50 = vadd.s32 %v434_v1, %v430_v9  ;;  %v188_v1 = vpop.f32.mrf.mxu0 }
  0xf1   :  { %vm513_vm0 = vcmp.lt.s32.totalorder %v492_v47, 3  ;;  %vm514_vm1 = vcmp.lt.s32.totalorder %v492_v47, 4  ;;  %v519_v14 = vsel %vm511_vm15, %v498_v2, %v501_v4  ;;  %v495_v18 = vshrl.u32 %v8166_v55, %v494_v45 }
  0xf2   :  { %v516_v15 = vsel %vm514_vm1, %v504_v5, 2102212464  ;;  %v520_v16 = vsel %vm514_vm1, %v507_v6, 920167782  ;;  %v524_v17 = vsel %vm514_vm1, %v510_v13, 1326507024  ;;  %v523_v10 = vsel %vm511_vm15, %v501_v4, %v504_v5 }
  0xf3   :  { %vm512_vm2 = vcmp.lt.s32.totalorder %v492_v47, 2  ;;  %v521_v19 = vsel %vm513_vm0, %v504_v5, %v520_v16  ;;  %v4210_v43 = vmin.u32 %v337_v12, %v4975_v46  ;;  %v525_v22 = vsel %vm513_vm0, %v507_v6, %v524_v17 }
  0xf4   :  { %v522_v20 = vsel %vm512_vm2, %v519_v14, %v521_v19  ;;  %v527_v28 = vshll.u32 %v487_v11, 8  ;;  %v436_v32 = vadd.s32 536870912, %v435_v50  ;;  %v515_v33 = vsel %vm511_vm15, %v495_v18, %v498_v2 }
  0xf5   :  { %v517_v34 = vsel %vm513_vm0, %v501_v4, %v516_v15  ;;  %v526_v23 = vsel %vm512_vm2, %v523_v10, %v525_v22  ;;  %vm594_vm3 = vcmp.gt.s32.totalorder %v593_v57, 0  ;;  %v339_v44 = vclz %v4210_v43 }
  0xf6   :  { %v5001_v37 = vmul.u32.u64.low %v527_v28, %v522_v20  ;;  %v5002_v41 = vmul.u32.u64.high %v527_v28, %v522_v20, %v5001_v37  ;;  %v595_v42 = vsel %vm594_vm3, %v593_v57, 0  ;;  %v5008_v49 = vshrl.u32 %v436_v32, 30 }
  0xf7   :  { %v5005_v45 = vmul.u32.u64.low %v527_v28, %v526_v23  ;;  %v5006_v48 = vmul.u32.u64.high %v527_v28, %v526_v23, %v5005_v45  ;;  %v597_v30 = vand.u32 31, %v595_v42  ;;  %v518_v36 = vsel %vm512_vm2, %v515_v33, %v517_v34 }
  0xf8   :  { %v537_v54 = vadd.s32 1, %v5002_v41  ;;  %v8152_v59 = vand.u32 2147483647, %v4905_v53  ;;  %v4211_v61 = vadd.s32 4294967294, %v339_v44  ;;  %v534_v63 = vmul.u32 %v527_v28, %v518_v36 }
  0xf9   :  { %v598_v56 = vsub.s32 32, %v597_v30  ;;  %vm536_vm4 = vc.u32 %v5006_v48, %v5001_v37  ;;  %v438_v2 = vshll.u32 %v5008_v49, 30  ;;  %v5022_v8 = vadd.f32 %v188_v1, %v4876_v24 }
  0xfa   :  { %v538_v3 = vsel %vm536_vm4, %v537_v54, %v5002_v41  ;;  %v590_v47 = vand.u32 8388607, %v8152_v59  ;;  %vm4212_vm5 = vcmp.lt.s32.totalorder %v4211_v61, 0  ;;  %v600_v11 = vshll.u32 %v8166_v55, %v597_v30 }
  0xfb   :  { %v539_v4 = vadd.s32 %v538_v3, %v534_v63  ;;  %v601_v5 = vshrl.u32 %v8164_v58, %v598_v56  ;;  %v604_v6 = vshrl.u32 %v8162_v60, %v598_v56  ;;  %8342 = vst [vmem:[#allocation5_spill] sm:$0xff] %v5022_v8  ;;  %v607_v12 = vshrl.u32 %v8157_v62, %v598_v56 }
  0xfc   :  { %v5026_v13 = vsub.s32 %v435_v50, %v438_v2  ;;  %v603_v57 = vshll.u32 %v8164_v58, %v597_v30  ;;  %v609_v14 = vshll.u32 %v8157_v62, %v597_v30  ;;  %v610_v15 = vshrl.u32 %v8168_v0, %v598_v56 }
  0xfd   :  { %v540_v9 = vadd.s32 536870912, %v539_v4  ;;  %v596_v16 = vshrl.u32 %v595_v42, 5  ;;  %v602_v17 = vor.u32 %v601_v5, %v600_v11  ;;  %v606_v18 = vshll.u32 %v8162_v60, %v597_v30 }
  0xfe   :  { %v613_v19 = vshrl.u32 %v8159_v7, %v598_v56  ;;  %v605_v43 = vor.u32 %v604_v6, %v603_v57  ;;  %v611_v20 = vor.u32 %v610_v15, %v609_v14  ;;  %v612_v22 = vshll.u32 %v8168_v0, %v597_v30 }
  0xff   :  { %v5033_v10 = vshrl.u32 %v540_v9, 30  ;;  %v591_v50 = vor.u32 8388608, %v590_v47  ;;  %v608_v28 = vor.u32 %v607_v12, %v606_v18  ;;  %v342_v32 = vsel %vm4212_vm5, 0, %v4211_v61 }
 0x100   :  { %v614_v33 = vor.u32 %v613_v19, %v612_v22  ;;  %v441_v34 = vsub.s32 0, %v5026_v13  ;;  %vm615_vm6 = vcmp.lt.s32.totalorder %v596_v16, 1  ;;  %vm618_vm7 = vcmp.lt.s32.totalorder %v596_v16, 4 }
 0x101   :  { %8343 = vst [vmem:[#allocation6_spill] sm:$0xff] %v5033_v10  ;;  %v690_v23 = vand.u32 2139095040, %v5022_v8  ;;  %v542_v41 = vshll.u32 %v5033_v10, 30  ;;  %vm617_vm8 = vcmp.lt.s32.totalorder %v596_v16, 3  ;;  %v623_v42 = vsel %vm615_vm6, %v602_v17, %v605_v43 }
 0x102   :  { %v624_v44 = vsel %vm618_vm7, %v611_v20, 920167782  ;;  %vm616_vm9 = vcmp.lt.s32.totalorder %v596_v16, 2  ;;  %v627_v30 = vsel %vm615_vm6, %v605_v43, %v608_v28  ;;  %v631_v36 = vshll.u32 %v591_v50, 8 }
 0x103   :  { %v625_v45 = vsel %vm617_vm8, %v608_v28, %v624_v44  ;;  %v347_v54 = vsub.s32 4294967266, %v342_v32  ;;  %v620_v61 = vsel %vm618_vm7, %v608_v28, 2102212464  ;;  %v628_v1 = vsel %vm618_vm7, %v614_v33, 1326507024 }
 0x104   :  { %v626_v63 = vsel %vm616_vm9, %v623_v42, %v625_v45  ;;  %v599_v2 = vshrl.u32 %v8166_v55, %v598_v56  ;;  %v629_v3 = vsel %vm617_vm8, %v611_v20, %v628_v1  ;;  %v4214_v6 = vmin.u32 %v441_v34, %v5026_v13  ;;  %v190_v34 = vpop.f32.mrf.mxu0 }
 0x105   :  { %v5046_v5 = vmul.u32.u64.low %v631_v36, %v626_v63  ;;  %v5047_v47 = vmul.u32.u64.high %v631_v36, %v626_v63, %v5046_v5  ;;  %v5051_v9 = vsub.s32 %v539_v4, %v542_v41  ;;  %v630_v11 = vsel %vm616_vm9, %v627_v30, %v629_v3 }
 0x106   :  { %v691_v12 = vshrl.u32 %v690_v23, 23  ;;  %v619_v57 = vsel %vm615_vm6, %v599_v2, %v602_v17  ;;  %v621_v14 = vsel %vm617_vm8, %v605_v43, %v620_v61  ;;  %v343_v19 = vsub.s32 32, %v342_v32 }
 0x107   :  { %v5056_v15 = vmul.u32.u64.low %v631_v36, %v630_v11  ;;  %v5057_v18 = vmul.u32.u64.high %v631_v36, %v630_v11, %v5056_v15  ;;  %v348_v20 = vadd.s32 127, %v347_v54  ;;  %v641_v22 = vadd.s32 1, %v5047_v47 }
 0x108   :  { %v4225_v56 = vadd.s32 4294967169, %v691_v12  ;;  %v443_v50 = vclz %v4214_v6  ;;  %v545_v28 = vsub.s32 0, %v5051_v9  ;;  %v622_v4 = vsel %vm616_vm9, %v619_v57, %v621_v14 }
 0x109   :  { %v327_v17 = vadd.s32 %v4931_v40, %v4928_v39  ;;  %vm640_vm10 = vc.u32 %v5057_v18, %v5046_v5  ;;  %v349_v41 = vshll.u32 %v348_v20, 23  ;;  %v638_v42 = vmul.u32 %v631_v36, %v622_v4 }
 0x10a   :  { %v697_v33 = vadd.s32 1, %v4225_v56  ;;  %v642_v43 = vsel %vm640_vm10, %v641_v22, %v5047_v47  ;;  %v5068_v44 = vadd.f32 %v190_v34, %v4878_v25  ;;  %v4215_v45 = vadd.s32 4294967294, %v443_v50 }
 0x10b   :  { %v345_v23 = vshrl.u32 %v327_v17, %v343_v19  ;;  %v4218_v16 = vmin.u32 %v545_v28, %v5051_v9  ;;  %v8155_v30 = vand.u32 2147483647, %v5022_v8  ;;  %v344_v39 = vshll.u32 %v4975_v46, %v342_v32 }
 0x10c   :  { %vm698_vm11 = vcmp.gt.s32.totalorder %v697_v33, 0  ;;  %8344 = vst [vmem:[#allocation7_spill] sm:$0xff] %v5068_v44  ;;  %v643_v40 = vadd.s32 %v642_v43, %v638_v42  ;;  %v350_v1 = vor.u32 4788187, %v349_v41  ;;  %v794_v2 = vand.u32 2139095040, %v5068_v44 }
 0x10d   :  { %v699_v54 = vsel %vm698_vm11, %v697_v33, 0  ;;  %v346_v63 = vor.u32 %v345_v23, %v344_v39  ;;  %vm4216_vm12 = vcmp.lt.s32.totalorder %v4215_v45, 0  ;;  %v547_v3 = vclz %v4218_v16 }
 0x10e   :  { %v701_v61 = vand.u32 31, %v699_v54  ;;  %v694_v36 = vand.u32 8388607, %v8155_v30  ;;  %v644_v6 = vadd.s32 536870912, %v643_v40  ;;  %v700_v11 = vshrl.u32 %v699_v54, 5 }
 0x10f   :  { %v795_v22 = vshrl.u32 %v794_v2, 23  ;;  %v351_v34 = vand.u32 2147483647, %v350_v1  ;;  %v353_v17 = vcvt.s32.f32 %v346_v63  ;;  %v5087_v41 = vsel %vm4216_vm12, 0, %v4215_v45 }
 0x110   :  { %v702_v47 = vsub.s32 32, %v701_v61  ;;  %v704_v12 = vshll.u32 %v8166_v55, %v701_v61  ;;  %v707_v57 = vshll.u32 %v8164_v58, %v701_v61  ;;  %v710_v14 = vshll.u32 %v8162_v60, %v701_v61 }
 0x111   :  { %v713_v56 = vshll.u32 %v8157_v62, %v701_v61  ;;  %v716_v20 = vshll.u32 %v8168_v0, %v701_v61  ;;  %v695_v43 = vor.u32 8388608, %v694_v36  ;;  %v5089_v42 = vshrl.u32 %v644_v6, 30 }
 0x112   :  { %v705_v46 = vshrl.u32 %v8164_v58, %v702_v47  ;;  %v708_v32 = vshrl.u32 %v8162_v60, %v702_v47  ;;  %v711_v15 = vshrl.u32 %v8157_v62, %v702_v47  ;;  %v714_v19 = vshrl.u32 %v8168_v0, %v702_v47 }
 0x113   :  { %v717_v33 = vshrl.u32 %v8159_v7, %v702_v47  ;;  %vm719_vm13 = vcmp.lt.s32.totalorder %v700_v11, 1  ;;  %v4219_v54 = vadd.s32 4294967294, %v547_v3  ;;  %vm722_vm14 = vcmp.lt.s32.totalorder %v700_v11, 4 }
 0x114   :  { %v706_v50 = vor.u32 %v705_v46, %v704_v12  ;;  %v709_v28 = vor.u32 %v708_v32, %v707_v57  ;;  %v712_v4 = vor.u32 %v711_v15, %v710_v14  ;;  %v715_v23 = vor.u32 %v714_v19, %v713_v56 }
 0x115   :  { %v718_v16 = vor.u32 %v717_v33, %v716_v20  ;;  %v4229_v61 = vadd.s32 4294967169, %v795_v22  ;;  %vm721_vm15 = vcmp.lt.s32.totalorder %v700_v11, 3  ;;  %vm720_vm0 = vcmp.lt.s32.totalorder %v700_v11, 2 }
 0x116   :  { %v727_v39 = vsel %vm719_vm13, %v706_v50, %v709_v28  ;;  %v728_v2 = vsel %vm722_vm14, %v715_v23, 920167782  ;;  %v731_v12 = vsel %vm719_vm13, %v709_v28, %v712_v4  ;;  %v724_v63 = vsel %vm722_vm14, %v712_v4, 2102212464 }
 0x117   :  { %v732_v1 = vsel %vm722_vm14, %v718_v16, 1326507024  ;;  %v729_v36 = vsel %vm721_vm15, %v712_v4, %v728_v2  ;;  %v735_v45 = vshll.u32 %v695_v43, 8  ;;  %v646_v6 = vshll.u32 %v5089_v42, 30  ;;  %v194_v4 = vpop.f32.mrf.mxu0 }
 0x118   :  { %v703_v57 = vshrl.u32 %v8166_v55, %v702_v47  ;;  %v730_v3 = vsel %vm720_vm0, %v727_v39, %v729_v36  ;;  %v733_v46 = vsel %vm721_vm15, %v715_v23, %v732_v1  ;;  %v5098_v32 = vmul.f32 %v353_v17, %v351_v34 }
 0x119   :  { %vm4220_vm1 = vcmp.lt.s32.totalorder %v4219_v54, 0  ;;  %v734_v14 = vsel %vm720_vm0, %v731_v12, %v733_v46  ;;  %v801_v15 = vadd.s32 1, %v4229_v61  ;;  %v725_v19 = vsel %vm721_vm15, %v709_v28, %v724_v63 }
 0x11a   :  { %v723_v56 = vsel %vm719_vm13, %v703_v57, %v706_v50  ;;  %v5103_v20 = vmul.u32.u64.low %v735_v45, %v734_v14  ;;  %v5104_v22 = vmul.u32.u64.high %v735_v45, %v734_v14, %v5103_v20  ;;  %v451_v47 = vsub.s32 4294967266, %v5087_v41 }
 0x11b   :  { %v5107_v33 = vmul.u32.u64.low %v735_v45, %v730_v3  ;;  %v5108_v43 = vmul.u32.u64.high %v735_v45, %v730_v3, %v5107_v33  ;;  %vm802_vm2 = vcmp.gt.s32.totalorder %v801_v15, 0  ;;  %v5111_v34 = vsel %vm4220_vm1, 0, %v4219_v54 }
 0x11c   :  { %v5113_v17 = vsub.s32 %v643_v40, %v646_v6  ;;  %v8154_v23 = vand.u32 2147483647, %v5068_v44  ;;  %v803_v50 = vsel %vm802_vm2, %v801_v15, 0  ;;  %v5118_v28 = vadd.s32 %v4959_v51, %v4966_v26 }
 0x11d   :  { %v5122_v16 = vadd.s32 %v5001_v37, %v5006_v48  ;;  %v726_v39 = vsel %vm720_vm0, %v723_v56, %v725_v19  ;;  %v5126_v61 = vadd.f32 %v194_v4, %v4876_v24  ;;  %v355_v54 = vxor.u32 2147483648, %v5098_v32 }
 0x11e   :  { %v447_v40 = vsub.s32 32, %v5087_v41  ;;  %vm744_vm3 = vc.u32 %v5104_v22, %v5107_v33  ;;  %v805_v2 = vand.u32 31, %v803_v50  ;;  %v5132_v12 = vadd.s32 127, %v451_v47 }
 0x11f   :  { %8345 = vst [vmem:[#allocation8_spill] sm:$0xff] %v5126_v61  ;;  %v551_v51 = vsub.s32 32, %v5111_v34  ;;  %v555_v26 = vsub.s32 4294967266, %v5111_v34  ;;  %v745_v37 = vadd.s32 1, %v5108_v43  ;;  %v649_v48 = vsub.s32 0, %v5113_v17 }
 0x120   :  { %v742_v11 = vmul.u32 %v735_v45, %v726_v39  ;;  %v798_v1 = vand.u32 8388607, %v8154_v23  ;;  %v806_v63 = vsub.s32 32, %v805_v2  ;;  %v804_v6 = vshrl.u32 %v803_v50, 5 }
 0x121   :  { %v746_v36 = vsel %vm744_vm3, %v745_v37, %v5108_v43  ;;  %v808_v57 = vshll.u32 %v8166_v55, %v805_v2  ;;  %v898_v3 = vand.u32 2139095040, %v5126_v61  ;;  %v811_v15 = vshll.u32 %v8164_v58, %v805_v2 }
 0x122   :  { %v747_v46 = vadd.s32 %v746_v36, %v742_v11  ;;  %v809_v14 = vshrl.u32 %v8164_v58, %v806_v63  ;;  %v812_v56 = vshrl.u32 %v8162_v60, %v806_v63  ;;  %v814_v45 = vshll.u32 %v8162_v60, %v805_v2 }
 0x123   :  { %v815_v19 = vshrl.u32 %v8157_v62, %v806_v63  ;;  %v817_v20 = vshll.u32 %v8157_v62, %v805_v2  ;;  %v818_v4 = vshrl.u32 %v8168_v0, %v806_v63  ;;  %v799_v43 = vor.u32 8388608, %v798_v1 }
 0x124   :  { %v748_v47 = vadd.s32 536870912, %v747_v46  ;;  %v810_v50 = vor.u32 %v809_v14, %v808_v57  ;;  %v813_v39 = vor.u32 %v812_v56, %v811_v15  ;;  %v820_v36 = vshll.u32 %v8168_v0, %v805_v2 }
 0x125   :  { %v816_v37 = vor.u32 %v815_v19, %v814_v45  ;;  %v819_v11 = vor.u32 %v818_v4, %v817_v20  ;;  %v821_v59 = vshrl.u32 %v8159_v7, %v806_v63  ;;  %vm8248_vm4 = vcmp.lt.s32.totalorder %v4881_v27, 0 }
 0x126   :  { %v4222_v35 = vmin.u32 %v649_v48, %v5113_v17  ;;  %v5154_v23 = vshrl.u32 %v748_v47, 30  ;;  %vm823_vm5 = vcmp.lt.s32.totalorder %v804_v6, 1  ;;  %v899_v30 = vshrl.u32 %v898_v3, 23 }
 0x127   :  { %v807_v52 = vshrl.u32 %v8166_v55, %v806_v63  ;;  %v822_v62 = vor.u32 %v821_v59, %v820_v36  ;;  %vm825_vm6 = vcmp.lt.s32.totalorder %v804_v6, 3  ;;  %vm826_vm7 = vcmp.lt.s32.totalorder %v804_v6, 4 }
 0x128   :  { %8346 = vst [vmem:[#allocation9_spill] sm:$0xff] %v5154_v23  ;;  %v750_v1 = vshll.u32 %v5154_v23, 30  ;;  %v828_v57 = vsel %vm826_vm7, %v816_v37, 2102212464  ;;  %v831_v14 = vsel %vm823_vm5, %v810_v50, %v813_v39  ;;  %v832_v2 = vsel %vm826_vm7, %v819_v11, 920167782 }
 0x129   :  { %vm824_vm8 = vcmp.lt.s32.totalorder %v804_v6, 2  ;;  %v833_v15 = vsel %vm825_vm6, %v816_v37, %v832_v2  ;;  %v835_v56 = vsel %vm823_vm5, %v813_v39, %v816_v37  ;;  %v839_v45 = vshll.u32 %v799_v43, 8 }
 0x12a   :  { %v651_v19 = vclz %v4222_v35  ;;  %v827_v48 = vsel %vm823_vm5, %v807_v52, %v810_v50  ;;  %v834_v20 = vsel %vm824_vm8, %v831_v14, %v833_v15  ;;  %v836_v4 = vsel %vm826_vm7, %v822_v62, 1326507024  ;;  %v196_v62 = vpop.f32.mrf.mxu0 }
 0x12b   :  { %v829_v3 = vsel %vm825_vm6, %v813_v39, %v828_v57  ;;  %v837_v47 = vsel %vm825_vm6, %v819_v11, %v836_v4  ;;  %v5159_v63 = vmul.u32.u64.low %v839_v45, %v834_v20  ;;  %v5160_v59 = vmul.u32.u64.high %v839_v45, %v834_v20, %v5159_v63 }
 0x12c   :  { %v448_v36 = vshll.u32 %v5026_v13, %v5087_v41  ;;  %v5165_v7 = vsub.s32 %v747_v46, %v750_v1  ;;  %v838_v2 = vsel %vm824_vm8, %v835_v56, %v837_v47  ;;  %v4233_v37 = vadd.s32 4294967169, %v899_v30 }
 0x12d   :  { %v449_v35 = vshrl.u32 %v5118_v28, %v447_v40  ;;  %v556_v52 = vadd.s32 127, %v555_v26  ;;  %v5169_v43 = vmul.u32.u64.low %v839_v45, %v838_v2  ;;  %v5170_v50 = vmul.u32.u64.high %v839_v45, %v838_v2, %v5169_v43 }
 0x12e   :  { %v553_v39 = vshrl.u32 %v5122_v16, %v551_v51  ;;  %v830_v11 = vsel %vm824_vm8, %v827_v48, %v829_v3  ;;  %v8161_v57 = vand.u32 2147483647, %v5126_v61  ;;  %v905_v14 = vadd.s32 1, %v4233_v37 }
 0x12f   :  { %v356_v13 = vsel %vm8248_vm4, %v355_v54, %v5098_v32  ;;  %v453_v30 = vshll.u32 %v5132_v12, 23  ;;  %v4223_v41 = vadd.s32 4294967294, %v651_v19  ;;  %v849_v28 = vadd.s32 1, %v5160_v59 }
 0x130   :  { %v552_v40 = vshll.u32 %v5051_v9, %v5111_v34  ;;  %v753_v16 = vsub.s32 0, %v5165_v7  ;;  %vm906_vm9 = vcmp.gt.s32.totalorder %v905_v14, 0  ;;  %v5186_v51 = vadd.f32 %v196_v62, %v4878_v25 }
 0x131   :  { %v557_v26 = vshll.u32 %v556_v52, 23  ;;  %v846_v6 = vmul.u32 %v839_v45, %v830_v11  ;;  %vm848_vm10 = vc.u32 %v5170_v50, %v5159_v63  ;;  %v907_v32 = vsel %vm906_vm9, %v905_v14, 0 }
 0x132   :  { %8347 = vst [vmem:[#allocation10_spill] sm:$0xff] %v5186_v51  ;;  %v5190_v54 = vor.u32 %v553_v39, %v552_v40  ;;  %v850_v12 = vsel %vm848_vm10, %v849_v28, %v5160_v59  ;;  %v902_v46 = vand.u32 8388607, %v8161_v57  ;;  %v909_v9 = vand.u32 31, %v907_v32 }
 0x133   :  { %vm4224_vm11 = vcmp.lt.s32.totalorder %v4223_v41, 0  ;;  %v851_v34 = vadd.s32 %v850_v12, %v846_v6  ;;  %vm5197_vm12 = vcmp.le.f32.partialorder %v271_v29, 0.7853982  ;;  %v8348_v1 = vmov 0 }
 0x134   :  { %v8349_v1 = vsel %vm5197_vm12, 4294967295, %v8348_v1  ;;  %v5201_v15 = vor.u32 %v449_v35, %v448_v36  ;;  %v4226_v56 = vmin.u32 %v753_v16, %v5165_v7  ;;  %v910_v45 = vsub.s32 32, %v909_v9 }
 0x135   :  { %8350 = vst [vmem:[#allocation11_spill] sm:$0xff] %v8349_v1  ;;  %v5207_v19 = vsel %vm5197_vm12, %v4881_v27, %v356_v13  ;;  %v5209_v48 = vor.u32 4788187, %v453_v30  ;;  %v5211_v20 = vor.u32 4788187, %v557_v26  ;;  %v852_v4 = vadd.s32 536870912, %v851_v34 }
 0x136   :  { %v561_v29 = vcvt.s32.f32 %v5190_v54  ;;  %v5214_v3 = vsel %vm4224_vm11, 0, %v4223_v41  ;;  %v903_v47 = vor.u32 8388608, %v902_v46  ;;  %v1002_v59 = vand.u32 2139095040, %v5186_v51 }
 0x137   :  { %v5217_v36 = vshrl.u32 %v852_v4, 30  ;;  %v913_v2 = vshrl.u32 %v8164_v58, %v910_v45  ;;  %v916_v37 = vshrl.u32 %v8162_v60, %v910_v45  ;;  %v8351_v35 = vmov 2102212464  }
 0x138   :  { %v919_v52 = vshrl.u32 %v8351_v35, %v910_v45  ;;  %v755_v43 = vclz %v4226_v56  ;;  %v912_v62 = vshll.u32 %v8166_v55, %v909_v9  ;;  %v915_v39 = vshll.u32 %v8164_v58, %v909_v9 }
 0x139   :  { %v922_v11 = vshrl.u32 %v8168_v0, %v910_v45  ;;  %v854_v14 = vshll.u32 %v5217_v36, 30  ;;  %v908_v13 = vshrl.u32 %v907_v32, 5  ;;  %v918_v30 = vshll.u32 %v8162_v60, %v909_v9 }
 0x13a   :  { %v921_v41 = vshll.u32 %v8351_v35, %v909_v9  ;;  %v559_v28 = vand.u32 2147483647, %v5211_v20  ;;  %v914_v40 = vor.u32 %v913_v2, %v912_v62  ;;  %v917_v16 = vor.u32 %v916_v37, %v915_v39 }
 0x13b   :  { %v1003_v26 = vshrl.u32 %v1002_v59, 23  ;;  %v920_v6 = vor.u32 %v919_v52, %v918_v30  ;;  %v924_v12 = vshll.u32 %v8168_v0, %v909_v9  ;;  %v8352_v46 = vmov 1326507024  }
 0x13c   :  { %v923_v54 = vor.u32 %v922_v11, %v921_v41  ;;  %v925_v56 = vshrl.u32 %v8352_v46, %v910_v45  ;;  %v655_v4 = vsub.s32 32, %v5214_v3  ;;  %v659_v57 = vsub.s32 4294967266, %v5214_v3 }
 0x13d   :  { %v5233_v32 = vsub.s32 %v851_v34, %v854_v14  ;;  %v4227_v58 = vadd.s32 4294967294, %v755_v43  ;;  %vm927_vm13 = vcmp.lt.s32.totalorder %v908_v13, 1  ;;  %v943_v20 = vshll.u32 %v903_v47, 8 }
 0x13e   :  { %v926_v55 = vor.u32 %v925_v56, %v924_v12  ;;  %v8353_v2 = vmov 683565275   ;;  %vm930_vm14 = vcmp.lt.s32.totalorder %v908_v13, 4  ;;  %v935_v37 = vsel %vm927_vm13, %v914_v40, %v917_v16 }
 0x13f   :  { %v911_v59 = vshrl.u32 %v8353_v2, %v910_v45  ;;  %v4237_v52 = vadd.s32 4294967169, %v1003_v26  ;;  %vm929_vm15 = vcmp.lt.s32.totalorder %v908_v13, 3  ;;  %v932_v9 = vsel %vm930_vm14, %v920_v6, 2102212464 }
 0x140   :  { %v936_v62 = vsel %vm930_vm14, %v923_v54, 920167782  ;;  %v939_v39 = vsel %vm927_vm13, %v917_v16, %v920_v6  ;;  %v857_v11 = vsub.s32 0, %v5233_v32  ;;  %vm928_vm0 = vcmp.lt.s32.totalorder %v908_v13, 2 }
 0x141   :  { %v937_v34 = vsel %vm929_vm15, %v920_v6, %v936_v62  ;;  %v940_v14 = vsel %vm930_vm14, %v926_v55, 1326507024  ;;  %vm4228_vm1 = vcmp.lt.s32.totalorder %v4227_v58, 0  ;;  %v931_v30 = vsel %vm927_vm13, %v911_v59, %v914_v40 }
 0x142   :  { %v938_v43 = vsel %vm928_vm0, %v935_v37, %v937_v34  ;;  %v941_v41 = vsel %vm929_vm15, %v923_v54, %v940_v14  ;;  %v933_v47 = vsel %vm929_vm15, %v917_v16, %v932_v9  ;;  %v660_v26 = vadd.s32 127, %v659_v57 }
 0x143   :  { %v942_v45 = vsel %vm928_vm0, %v939_v39, %v941_v41  ;;  %v5240_v12 = vmul.u32.u64.low %v943_v20, %v938_v43  ;;  %v5241_v56 = vmul.u32.u64.high %v943_v20, %v938_v43, %v5240_v12  ;;  %v8354_v23 = vand.u32 2147483647, %v5186_v51 }
 0x144   :  { %v5244_v0 = vmul.u32.u64.low %v943_v20, %v942_v45  ;;  %v5245_v60 = vmul.u32.u64.high %v943_v20, %v942_v45, %v5244_v0  ;;  %v639_v55 = vadd.s32 %v5046_v5, %v5057_v18  ;;  %v5251_v40 = vsel %vm4228_vm1, 0, %v4227_v58  ;;  %v200_v5 = vpop.f32.mrf.mxu0 }
 0x145   :  { %v1006_v6 = vand.u32 8388607, %v8354_v23  ;;  %v4230_v16 = vmin.u32 %v857_v11, %v5233_v32  ;;  %v1009_v54 = vadd.s32 1, %v4237_v52  ;;  %4568 = vcosq.f32 %v5207_v19 }
 0x146   :  { %v455_v59 = vand.u32 2147483647, %v5209_v48  ;;  %v5256_v37 = vmul.f32 %v561_v29, %v559_v28  ;;  %v934_v57 = vsel %vm928_vm0, %v931_v30, %v933_v47  ;;  %v457_v0 = vcvt.s32.f32 %v5201_v15 }
 0x147   :  { %v657_v9 = vshrl.u32 %v639_v55, %v655_v4  ;;  %v953_v23 = vadd.s32 1, %v5241_v56  ;;  %vm1010_vm2 = vcmp.gt.s32.totalorder %v1009_v54, 0  ;;  %v656_v58 = vshll.u32 %v5113_v17, %v5214_v3 }
 0x148   :  { %v661_v18 = vshll.u32 %v660_v26, 23  ;;  %v763_v52 = vsub.s32 4294967266, %v5251_v40  ;;  %v1007_v62 = vor.u32 8388608, %v1006_v6  ;;  %v859_v39 = vclz %v4230_v16 }
 0x149   :  { %v950_v48 = vmul.u32 %v943_v20, %v934_v57  ;;  %vm952_vm3 = vc.u32 %v5245_v60, %v5240_v12  ;;  %v1011_v29 = vsel %vm1010_vm2, %v1009_v54, 0  ;;  %v5266_v13 = vmul.f32 %v457_v0, %v455_v59 }
 0x14a   :  { %v954_v28 = vsel %vm952_vm3, %v953_v23, %v5241_v56  ;;  %v5271_v4 = vadd.f32 %v200_v5, %v4876_v24  ;;  %v5273_v17 = vor.u32 %v657_v9, %v656_v58  ;;  %v743_v3 = vadd.s32 %v5107_v33, %v5104_v22 }
 0x14b   :  { %v955_v11 = vadd.s32 %v954_v28, %v950_v48  ;;  %v1013_v20 = vand.u32 31, %v1011_v29  ;;  %v5277_v34 = vor.u32 4788187, %v661_v18  ;;  %v759_v14 = vsub.s32 32, %v5251_v40 }
 0x14c   :  { %8355 = vst [vmem:[#allocation12_spill] sm:$0xff] %v5271_v4  ;;  %v760_v30 = vshll.u32 %v5165_v7, %v5251_v40  ;;  %v5282_v43 = vshll.u32 %v1007_v62, 8  ;;  %v5284_v41 = vadd.s32 127, %v763_v52  ;;  %v4231_v47 = vadd.s32 4294967294, %v859_v39 }
 0x14d   :  { %v956_v45 = vadd.s32 536870912, %v955_v11  ;;  %v1014_v56 = vsub.s32 32, %v1013_v20  ;;  %v1012_v26 = vshrl.u32 %v1011_v29, 5  ;;  %v1016_v6 = vshll.u32 %v8353_v2, %v1013_v20 }
 0x14e   :  { %v8356_v22 = vmov 2475754826   ;;  %v1106_v55 = vand.u32 2139095040, %v5271_v4  ;;  %v8358_v59 = vmov 2131351028   ;;  %v1025_v0 = vshll.u32 %v8351_v35, %v1013_v20 }
 0x14f   :  { %v1019_v33 = vshll.u32 %v8356_v22, %v1013_v20  ;;  %v5289_v16 = vshrl.u32 %v956_v45, 30  ;;  %v1017_v54 = vshrl.u32 %v8356_v22, %v1014_v56  ;;  %v1020_v7 = vshrl.u32 %v8358_v59, %v1014_v56 }
 0x150   :  { %v1022_v40 = vshll.u32 %v8358_v59, %v1013_v20  ;;  %v1023_v57 = vshrl.u32 %v8351_v35, %v1014_v56  ;;  %v8359_v9 = vmov 920167782   ;;  %vm8226_vm5 = vcmp.lt.s32.totalorder %v4893_v38, 0 }
 0x151   :  { %8357 = vst [vmem:[#allocation13_spill] sm:$0xff] %v5289_v16  ;;  %v1026_v23 = vshrl.u32 %v8359_v9, %v1014_v56  ;;  %v1028_v5 = vshll.u32 %v8359_v9, %v1013_v20  ;;  %v958_v58 = vshll.u32 %v5289_v16, 30  ;;  %v1018_v18 = vor.u32 %v1017_v54, %v1016_v6 }
 0x152   :  { %v1021_v52 = vor.u32 %v1020_v7, %v1019_v33  ;;  %v1029_v62 = vshrl.u32 %v8352_v46, %v1014_v56  ;;  %v1024_v39 = vor.u32 %v1023_v57, %v1022_v40  ;;  %vm1031_vm6 = vcmp.lt.s32.totalorder %v1012_v26, 1  ;;  %v5301_v28 = vpop.eup %4568 }
 0x153   :  { %v1027_v48 = vor.u32 %v1026_v23, %v1025_v0  ;;  %v1107_v29 = vshrl.u32 %v1106_v55, 23  ;;  %8360 = vst [vmem:[#allocation14_spill] sm:$0xff] %v5301_v28  ;;  %v5303_v45 = vsub.s32 %v955_v11, %v958_v58  ;;  %vm1032_vm7 = vcmp.lt.s32.totalorder %v1012_v26, 2 }
 0x154   :  { %v1030_v15 = vor.u32 %v1029_v62, %v1028_v5  ;;  %vm1034_vm8 = vcmp.lt.s32.totalorder %v1012_v26, 4  ;;  %vm1033_vm9 = vcmp.lt.s32.totalorder %v1012_v26, 3  ;;  %v1039_v10 = vsel %vm1031_vm6, %v1018_v18, %v1021_v52 }
 0x155   :  { %v1036_v20 = vsel %vm1034_vm8, %v1024_v39, 2102212464  ;;  %v1040_v16 = vsel %vm1034_vm8, %v1027_v48, 920167782  ;;  %v961_v6 = vsub.s32 0, %v5303_v45  ;;  %v1015_v33 = vshrl.u32 %v8353_v2, %v1014_v56 }
 0x156   :  { %v1041_v54 = vsel %vm1033_vm9, %v1024_v39, %v1040_v16  ;;  %v1043_v55 = vsel %vm1031_vm6, %v1021_v52, %v1024_v39  ;;  %vm8250_vm10 = vcmp.lt.s32.totalorder %v4886_v31, 0  ;;  %vm4232_vm11 = vcmp.lt.s32.totalorder %v4231_v47, 0 }
 0x157   :  { %v1042_v11 = vsel %vm1032_vm7, %v1039_v10, %v1041_v54  ;;  %v1044_v7 = vsel %vm1034_vm8, %v1030_v15, 1326507024  ;;  %v4241_v40 = vadd.s32 4294967169, %v1107_v29  ;;  %v761_v57 = vshrl.u32 %v743_v3, %v759_v14 }
 0x158   :  { %v1035_v0 = vsel %vm1031_vm6, %v1015_v33, %v1018_v18  ;;  %v1037_v23 = vsel %vm1033_vm9, %v1021_v52, %v1036_v20  ;;  %v1045_v5 = vsel %vm1033_vm9, %v1027_v48, %v1044_v7  ;;  %v4234_v56 = vmin.u32 %v961_v6, %v5303_v45 }
 0x159   :  { %v1046_v16 = vsel %vm1032_vm7, %v1043_v55, %v1045_v5  ;;  %v5318_v58 = vmul.u32.u64.low %v5282_v43, %v1042_v11  ;;  %v5319_v62 = vmul.u32.u64.high %v5282_v43, %v1042_v11, %v5318_v58  ;;  %v765_v10 = vshll.u32 %v5284_v41, 23 }
 0x15a   :  { %v5323_v15 = vsel %vm4232_vm11, 0, %v4231_v47  ;;  %v5326_v3 = vmul.u32.u64.low %v5282_v43, %v1046_v16  ;;  %v5327_v14 = vmul.u32.u64.high %v5282_v43, %v1046_v16, %v5326_v3  ;;  %v459_v18 = vxor.u32 2147483648, %v5266_v13 }
 0x15b   :  { %v8361_v52 = vxor.u32 2147483648, %v5256_v37  ;;  %v1038_v48 = vsel %vm1032_vm7, %v1035_v0, %v1037_v23  ;;  %v1113_v29 = vadd.s32 1, %v4241_v40  ;;  %v663_v20 = vand.u32 2147483647, %v5277_v34 }
 0x15c   :  { %v665_v41 = vcvt.s32.f32 %v5273_v17  ;;  %v762_v47 = vor.u32 %v761_v57, %v760_v30  ;;  %v8176_v6 = vand.u32 2147483647, %v5271_v4  ;;  %v867_v33 = vsub.s32 4294967266, %v5323_v15 }
 0x15d   :  { %v564_v39 = vsel %vm8226_vm5, %v8361_v52, %v5256_v37  ;;  %v963_v54 = vclz %v4234_v56  ;;  %v1057_v55 = vadd.s32 1, %v5319_v62  ;;  %vm1114_vm13 = vcmp.gt.s32.totalorder %v1113_v29, 0 }
 0x15e   :  { %v766_v11 = vor.u32 4788187, %v765_v10  ;;  %v1054_v7 = vmul.u32 %v5282_v43, %v1038_v48  ;;  %vm1056_vm14 = vc.u32 %v5327_v14, %v5318_v58  ;;  %v1115_v37 = vsel %vm1114_vm13, %v1113_v29, 0 }
 0x15f   :  { %4570 = vsinq.f32 %v5207_v19  ;;  %v8362_v17 = vand.u32 2147483647, %v4893_v38  ;;  %v8363_v34 = vmov 0  ;;  %v1058_v30 = vsel %vm1056_vm14, %v1057_v55, %v5319_v62 }
 0x160   :  { %v1117_v26 = vand.u32 31, %v1115_v37  ;;  %v5355_v40 = vsel %vm8250_vm10, %v459_v18, %v5266_v13  ;;  %v5362_v19 = vmul.f32 %v665_v41, %v663_v20  ;;  %v1059_v57 = vadd.s32 %v1058_v30, %v1054_v7  ;;  %v202_v7 = vpop.f32.mrf.mxu0 }
 0x161   :  { %vm5347_vm15 = vcmp.le.f32.partialorder %v8362_v17, 0.7853982  ;;  %v847_v0 = vadd.s32 %v5159_v63, %v5170_v50  ;;  %v868_v23 = vadd.s32 127, %v867_v33  ;;  %v4235_v5 = vadd.s32 4294967294, %v963_v54 }
 0x162   :  { %v8364_v34 = vsel %vm5347_vm15, 4294967295, %v8363_v34  ;;  %v5360_v43 = vsel %vm5347_vm15, %v4893_v38, %v564_v39  ;;  %v1118_v56 = vsub.s32 32, %v1117_v26  ;;  %v767_v16 = vand.u32 2147483647, %v766_v11 }
 0x163   :  { %8365 = vst [vmem:[#allocation15_spill] sm:$0xff] %v8364_v34  ;;  %v769_v62 = vcvt.s32.f32 %v762_v47  ;;  %v1060_v10 = vadd.s32 536870912, %v1059_v57  ;;  %v1110_v13 = vand.u32 8388607, %v8176_v6  ;;  %v863_v3 = vsub.s32 32, %v5323_v15 }
 0x164   :  { %v1121_v18 = vshrl.u32 %v8356_v22, %v1118_v56  ;;  %v1124_v52 = vshrl.u32 %v8358_v59, %v1118_v56  ;;  %v1127_v39 = vshrl.u32 %v8351_v35, %v1118_v56  ;;  %v1120_v63 = vshll.u32 %v8353_v2, %v1117_v26 }
 0x165   :  { %v5372_v48 = vshrl.u32 %v1060_v10, 30  ;;  %v1123_v50 = vshll.u32 %v8356_v22, %v1117_v26  ;;  %v1130_v29 = vshrl.u32 %v8359_v9, %v1118_v56  ;;  %v869_v20 = vshll.u32 %v868_v23, 23 }
 0x166   :  { %vm4236_vm0 = vcmp.lt.s32.totalorder %v4235_v5, 0  ;;  %v1126_v41 = vshll.u32 %v8358_v59, %v1117_v26  ;;  %v1129_v47 = vshll.u32 %v8351_v35, %v1117_v26  ;;  %v1116_v54 = vshrl.u32 %v1115_v37, 5 }
 0x167   :  { %v1062_v33 = vshll.u32 %v5372_v48, 30  ;;  %v1122_v55 = vor.u32 %v1121_v18, %v1120_v63  ;;  %v1125_v11 = vor.u32 %v1124_v52, %v1123_v50  ;;  %v1132_v10 = vshll.u32 %v8359_v9, %v1117_v26 }
 0x168   :  { %v1128_v17 = vor.u32 %v1127_v39, %v1126_v41  ;;  %v1131_v30 = vor.u32 %v1130_v29, %v1129_v47  ;;  %v1133_v6 = vshrl.u32 %v8352_v46, %v1118_v56  ;;  %v770_v34 = vmul.f32 %v769_v62, %v767_v16  ;;  %v206_v39 = vpop.f32.mrf.mxu0 }
 0x169   :  { %v864_v23 = vshll.u32 %v5233_v32, %v5323_v15  ;;  %v865_v38 = vshrl.u32 %v847_v0, %v863_v3  ;;  %v5384_v28 = vsub.s32 %v1059_v57, %v1062_v33  ;;  %v870_v1 = vor.u32 4788187, %v869_v20 }
 0x16a   :  { %v1111_v27 = vor.u32 8388608, %v1110_v13  ;;  %v1134_v21 = vor.u32 %v1133_v6, %v1132_v10  ;;  %v5387_v37 = vadd.f32 %v202_v7, %v4878_v25  ;;  %v5390_v18 = vsel %vm4236_vm0, 0, %v4235_v5 }
 0x16b   :  { %vm1135_vm1 = vcmp.lt.s32.totalorder %v1116_v54, 1  ;;  %vm1137_vm2 = vcmp.lt.s32.totalorder %v1116_v54, 3  ;;  %vm1138_vm3 = vcmp.lt.s32.totalorder %v1116_v54, 4  ;;  %v1065_v26 = vsub.s32 0, %v5384_v28 }
 0x16c   :  { %8366 = vst [vmem:[#allocation16_spill] sm:$0xff] %v5387_v37  ;;  %v1140_v16 = vsel %vm1138_vm3, %v1128_v17, 2102212464  ;;  %v1143_v32 = vsel %vm1135_vm1, %v1122_v55, %v1125_v11  ;;  %v1144_v15 = vsel %vm1138_vm3, %v1131_v30, 920167782  ;;  %v5394_v57 = vpop.eup %4570  ;;  %vm8211_vm6 = vcmp.lt.s32.totalorder %v5022_v8, 0 }
 0x16d   :  { %8367 = vst [vmem:[#allocation17_spill] sm:$0xff] %v5394_v57  ;;  %v1119_v6 = vshrl.u32 %v8353_v2, %v1118_v56  ;;  %vm1136_vm7 = vcmp.lt.s32.totalorder %v1116_v54, 2  ;;  %v1145_v0 = vsel %vm1137_vm2, %v1128_v17, %v1144_v15  ;;  %v1147_v5 = vsel %vm1135_vm1, %v1125_v11, %v1128_v17 }
 0x16e   :  { %v971_v62 = vsub.s32 4294967266, %v5390_v18  ;;  %v1146_v13 = vsel %vm1136_vm7, %v1143_v32, %v1145_v0  ;;  %v1148_v3 = vsel %vm1138_vm3, %v1134_v21, 1326507024  ;;  %v1151_v52 = vshll.u32 %v1111_v27, 8 }
 0x16f   :  { %v1139_v63 = vsel %vm1135_vm1, %v1119_v6, %v1122_v55  ;;  %v1141_v50 = vsel %vm1137_vm2, %v1125_v11, %v1140_v16  ;;  %v1149_v29 = vsel %vm1137_vm2, %v1131_v30, %v1148_v3  ;;  %v1210_v56 = vand.u32 2139095040, %v5387_v37 }
 0x170   :  { %v4238_v20 = vmin.u32 %v1065_v26, %v5384_v28  ;;  %v1150_v41 = vsel %vm1136_vm7, %v1147_v5, %v1149_v29  ;;  %v5408_v47 = vmul.u32.u64.low %v1151_v52, %v1146_v13  ;;  %v5409_v33 = vmul.u32.u64.high %v1151_v52, %v1146_v13, %v5408_v47 }
 0x171   :  { %vm8249_vm8 = vcmp.lt.s32.totalorder %v4905_v53, 0  ;;  %v866_v27 = vor.u32 %v865_v38, %v864_v23  ;;  %v5413_v21 = vmul.u32.u64.low %v1151_v52, %v1150_v41  ;;  %v5414_v7 = vmul.u32.u64.high %v1151_v52, %v1150_v41, %v5413_v21 }
 0x172   :  { %v5417_v55 = vadd.f32 %v206_v39, %v4876_v24  ;;  %4572 = vcosq.f32 %v5360_v43  ;;  %v8369_v11 = vand.u32 2147483647, %v5022_v8  ;;  %v8370_v17 = vmov 0 }
 0x173   :  { %v771_v30 = vxor.u32 2147483648, %v770_v34  ;;  %vm793_vm11 = vcmp.lt.s32.totalorder %v5068_v44, 0  ;;  %v1211_v10 = vshrl.u32 %v1210_v56, 23  ;;  %v871_v26 = vand.u32 2147483647, %v870_v1 }
 0x174   :  { %8368 = vst [vmem:[#allocation18_spill] sm:$0xff] %v5417_v55  ;;  %vm5422_vm9 = vcmp.le.f32.partialorder %v8369_v11, 0.7853982  ;;  %v967_v38 = vsub.s32 32, %v5390_v18  ;;  %v972_v23 = vadd.s32 127, %v971_v62  ;;  %v1142_v16 = vsel %vm1136_vm7, %v1139_v63, %v1141_v50 }
 0x175   :  { %v8371_v17 = vsel %vm5422_vm9, 4294967295, %v8370_v17  ;;  %v667_v32 = vxor.u32 2147483648, %v5362_v19  ;;  %v1067_v15 = vclz %v4238_v20  ;;  %v1161_v6 = vadd.s32 1, %v5409_v33 }
 0x176   :  { %8372 = vst [vmem:[#allocation19_spill] sm:$0xff] %v8371_v17  ;;  %v4245_v0 = vadd.s32 4294967169, %v1211_v10  ;;  %v873_v5 = vcvt.s32.f32 %v866_v27  ;;  %v877_v13 = vsub.s32 4, %v5217_v36  ;;  %v951_v3 = vadd.s32 %v5240_v12, %v5245_v60 }
 0x177   :  { %v1314_v39 = vand.u32 2139095040, %v5417_v55  ;;  %v772_v1 = vsel %vm8211_vm6, %v771_v30, %v770_v34  ;;  %v1158_v62 = vmul.u32 %v1151_v52, %v1142_v16  ;;  %vm1160_vm13 = vc.u32 %v5414_v7, %v5408_v47 }
 0x178   :  { %v1217_v54 = vadd.s32 1, %v4245_v0  ;;  %v5439_v63 = vmul.f32 %v873_v5, %v871_v26  ;;  %v969_v50 = vshrl.u32 %v951_v3, %v967_v38  ;;  %v973_v29 = vshll.u32 %v972_v23, 23 }
 0x179   :  { %v1162_v56 = vsel %vm1160_vm13, %v1161_v6, %v5409_v33  ;;  %v4239_v20 = vadd.s32 4294967294, %v1067_v15  ;;  %v8186_v60 = vand.u32 2147483647, %v5387_v37  ;;  %4574 = vsinq.f32 %v5360_v43 }
 0x17a   :  { %v1163_v41 = vadd.s32 %v1162_v56, %v1158_v62  ;;  %vm1218_vm14 = vcmp.gt.s32.totalorder %v1217_v54, 0  ;;  %v968_v12 = vshll.u32 %v5303_v45, %v5390_v18  ;;  %v1315_v52 = vshrl.u32 %v1314_v39, 23 }
 0x17b   :  { %v1219_v34 = vsel %vm1218_vm14, %v1217_v54, 0  ;;  %v5449_v27 = vsel %vm8249_vm8, %v667_v32, %v5362_v19  ;;  %v5454_v33 = vsel %vm793_vm11, %v877_v13, %v5217_v36  ;;  %v5459_v43 = vsel %vm5422_vm9, %v5022_v8, %v772_v1 }
 0x17c   :  { %v1164_v21 = vadd.s32 536870912, %v1163_v41  ;;  %v1221_v11 = vand.u32 31, %v1219_v34  ;;  %v875_v45 = vxor.u32 2147483648, %v5439_v63  ;;  %v970_v18 = vor.u32 %v969_v50, %v968_v12 }
 0x17d   :  { %v974_v30 = vor.u32 4788187, %v973_v29  ;;  %vm4240_vm0 = vcmp.lt.s32.totalorder %v4239_v20, 0  ;;  %v1214_v19 = vand.u32 8388607, %v8186_v60  ;;  %v1220_v36 = vshrl.u32 %v1219_v34, 5 }
 0x17e   :  { %v5462_v10 = vshrl.u32 %v1164_v21, 30  ;;  %v1222_v26 = vsub.s32 32, %v1221_v11  ;;  %v1224_v38 = vshll.u32 %v8353_v2, %v1221_v11  ;;  %v1227_v23 = vshll.u32 %v8356_v22, %v1221_v11 }
 0x17f   :  { %v4249_v16 = vadd.s32 4294967169, %v1315_v52  ;;  %v1230_v0 = vshll.u32 %v8358_v59, %v1221_v11  ;;  %v5472_v5 = vpop.eup %4572  ;;  %v1233_v3 = vshll.u32 %v8351_v35, %v1221_v11  ;;  %v5479_v62 = vsel %vm4240_vm0, 0, %v4239_v20 }
 0x180   :  { %8373 = vst [vmem:[#allocation20_spill] sm:$0xff] %v5462_v10  ;;  %v1166_v32 = vshll.u32 %v5462_v10, 30  ;;  %v1225_v15 = vshrl.u32 %v8356_v22, %v1222_v26  ;;  %v1228_v6 = vshrl.u32 %v8358_v59, %v1222_v26  ;;  %8374 = vst [vmem:[#allocation21_spill] sm:$0xff] %v5472_v5  ;;  %v1231_v13 = vshrl.u32 %v8351_v35, %v1222_v26 }
 0x181   :  { %v1234_v39 = vshrl.u32 %v8359_v9, %v1222_v26  ;;  %v1237_v1 = vshrl.u32 %v8352_v46, %v1222_v26  ;;  %v1236_v29 = vshll.u32 %v8359_v9, %v1221_v11  ;;  %v977_v56 = vcvt.s32.f32 %v970_v18 }
 0x182   :  { %v1226_v54 = vor.u32 %v1225_v15, %v1224_v38  ;;  %v1229_v50 = vor.u32 %v1228_v6, %v1227_v23  ;;  %v1215_v12 = vor.u32 8388608, %v1214_v19  ;;  %v1232_v34 = vor.u32 %v1231_v13, %v1230_v0 }
 0x183   :  { %v1235_v52 = vor.u32 %v1234_v39, %v1233_v3  ;;  %v8375_v21 = vand.u32 2147483647, %v5068_v44  ;;  %v975_v10 = vand.u32 2147483647, %v974_v30  ;;  %v5488_v17 = vsub.s32 %v1163_v41, %v1166_v32 }
 0x184   :  { %v1238_v8 = vor.u32 %v1237_v1, %v1236_v29  ;;  %vm1239_vm2 = vcmp.lt.s32.totalorder %v1220_v36, 1  ;;  %v1075_v20 = vsub.s32 4294967266, %v5479_v62  ;;  %vm1242_vm3 = vcmp.lt.s32.totalorder %v1220_v36, 4 }
 0x185   :  { %vm5484_vm1 = vcmp.le.f32.partialorder %v8375_v21, 0.7853982  ;;  %v1247_v38 = vsel %vm1239_vm2, %v1226_v54, %v1229_v50  ;;  %v1321_v11 = vadd.s32 1, %v4249_v16  ;;  %v1223_v18 = vshrl.u32 %v8353_v2, %v1222_v26 }
 0x186   :  { %vm1241_vm7 = vcmp.lt.s32.totalorder %v1220_v36, 3  ;;  %v1244_v19 = vsel %vm1242_vm3, %v1232_v34, 2102212464  ;;  %v1248_v23 = vsel %vm1242_vm3, %v1235_v52, 920167782  ;;  %vm1240_vm13 = vcmp.lt.s32.totalorder %v1220_v36, 2  ;;  %v5492_v13 = vpop.eup %4574 }
 0x187   :  { %v1249_v15 = vsel %vm1241_vm7, %v1232_v34, %v1248_v23  ;;  %v1251_v6 = vsel %vm1239_vm2, %v1229_v50, %v1232_v34  ;;  %v1255_v0 = vshll.u32 %v1215_v12, 8  ;;  %8378 = vst [vmem:[#allocation22_spill] sm:$0xff] %v5492_v13  ;;  %v1169_v41 = vsub.s32 0, %v5488_v17 }
 0x188   :  { %v1243_v30 = vsel %vm1239_vm2, %v1223_v18, %v1226_v54  ;;  %v1250_v32 = vsel %vm1240_vm13, %v1247_v38, %v1249_v15  ;;  %v1252_v3 = vsel %vm1242_vm3, %v1238_v8, 1326507024  ;;  %v1245_v39 = vsel %vm1241_vm7, %v1229_v50, %v1244_v19 }
 0x189   :  { %v1253_v1 = vsel %vm1241_vm7, %v1235_v52, %v1252_v3  ;;  %v5496_v16 = vmul.u32.u64.low %v1255_v0, %v1250_v32  ;;  %v5497_v29 = vmul.u32.u64.high %v1255_v0, %v1250_v32, %v5496_v16  ;;  %v876_v26 = vsel %vm793_vm11, %v875_v45, %v5439_v63  ;;  %v208_v52 = vpop.f32.mrf.mxu0 }
 0x18a   :  { %v5503_v34 = vmul.f32 %v977_v56, %v975_v10  ;;  %v1254_v12 = vsel %vm1240_vm13, %v1251_v6, %v1253_v1  ;;  %vm1322_vm14 = vcmp.gt.s32.totalorder %v1321_v11, 0  ;;  %v8192_v8 = vand.u32 2147483647, %v5417_v55 }
 0x18b   :  { %v5506_v21 = vmul.u32.u64.low %v1255_v0, %v1254_v12  ;;  %v5507_v54 = vmul.u32.u64.high %v1255_v0, %v1254_v12, %v5506_v21  ;;  %v1323_v50 = vsel %vm1322_vm14, %v1321_v11, 0  ;;  %v1071_v38 = vsub.s32 32, %v5479_v62 }
 0x18c   :  { %v1076_v18 = vadd.s32 127, %v1075_v20  ;;  %v1246_v19 = vsel %vm1240_vm13, %v1243_v30, %v1245_v39  ;;  %v1325_v23 = vand.u32 31, %v1323_v50  ;;  %4576 = vcosq.f32 %v5459_v43 }
 0x18d   :  { %v4242_v45 = vmin.u32 %v1169_v41, %v5488_v17  ;;  %v1265_v10 = vadd.s32 1, %v5497_v29  ;;  %v5521_v56 = vsel %vm5484_vm1, %v5068_v44, %v876_v26  ;;  %v1055_v36 = vadd.s32 %v5318_v58, %v5327_v14 }
 0x18e   :  { %v1326_v20 = vsub.s32 32, %v1325_v23  ;;  %v5526_v11 = vadd.f32 %v208_v52, %v4878_v25  ;;  %v1072_v6 = vshll.u32 %v5384_v28, %v5479_v62  ;;  %v1262_v41 = vmul.u32 %v1255_v0, %v1246_v19 }
 0x18f   :  { %vm1264_vm11 = vc.u32 %v5507_v54, %v5496_v16  ;;  %v1073_v30 = vshrl.u32 %v1055_v36, %v1071_v38  ;;  %v1077_v32 = vshll.u32 %v1076_v18, 23  ;;  %v1318_v58 = vand.u32 8388607, %v8192_v8 }
 0x190   :  { %8379 = vst [vmem:[#allocation23_spill] sm:$0xff] %v5526_v11  ;;  %v1266_v3 = vsel %vm1264_vm11, %v1265_v10, %v5497_v29  ;;  %v1171_v14 = vclz %v4242_v45  ;;  %v1329_v1 = vshrl.u32 %v8356_v22, %v1326_v20  ;;  %v1332_v26 = vshrl.u32 %v8358_v59, %v1326_v20 }
 0x191   :  { %v1267_v39 = vadd.s32 %v1266_v3, %v1262_v41  ;;  %v1328_v12 = vshll.u32 %v8353_v2, %v1325_v23  ;;  %v1331_v28 = vshll.u32 %v8356_v22, %v1325_v23  ;;  %v1334_v62 = vshll.u32 %v8358_v59, %v1325_v23 }
 0x192   :  { %v1335_v0 = vshrl.u32 %v8351_v35, %v1326_v20  ;;  %v1324_v52 = vshrl.u32 %v1323_v50, 5  ;;  %v1337_v29 = vshll.u32 %v8351_v35, %v1325_v23  ;;  %v1338_v38 = vshrl.u32 %v8359_v9, %v1326_v20 }
 0x193   :  { %v1268_v21 = vadd.s32 536870912, %v1267_v39  ;;  %v1074_v18 = vor.u32 %v1073_v30, %v1072_v6  ;;  %v1330_v19 = vor.u32 %v1329_v1, %v1328_v12  ;;  %v1333_v45 = vor.u32 %v1332_v26, %v1331_v28 }
 0x194   :  { %v1336_v10 = vor.u32 %v1335_v0, %v1334_v62  ;;  %v1339_v41 = vor.u32 %v1338_v38, %v1337_v29  ;;  %v1340_v3 = vshll.u32 %v8359_v9, %v1325_v23  ;;  %v1341_v8 = vshrl.u32 %v8352_v46, %v1326_v20 }
 0x195   :  { %v5544_v36 = vshrl.u32 %v1268_v21, 30  ;;  %v1078_v15 = vor.u32 4788187, %v1077_v32  ;;  %v4243_v63 = vadd.s32 4294967294, %v1171_v14  ;;  %v1319_v44 = vor.u32 8388608, %v1318_v58 }
 0x196   :  { %v1418_v50 = vand.u32 2139095040, %v5526_v11  ;;  %v1342_v13 = vor.u32 %v1341_v8, %v1340_v3  ;;  %vm1343_vm0 = vcmp.lt.s32.totalorder %v1324_v52, 1  ;;  %vm1346_vm2 = vcmp.lt.s32.totalorder %v1324_v52, 4 }
 0x197   :  { %v1270_v5 = vshll.u32 %v5544_v36, 30  ;;  %vm8210_vm3 = vcmp.lt.s32.totalorder %v5126_v61, 0  ;;  %v1327_v6 = vshrl.u32 %v8353_v2, %v1326_v20  ;;  %vm1345_vm7 = vcmp.lt.s32.totalorder %v1324_v52, 3 }
 0x198   :  { %v1351_v30 = vsel %vm1343_vm0, %v1330_v19, %v1333_v45  ;;  %v1352_v23 = vsel %vm1346_vm2, %v1339_v41, 920167782  ;;  %vm1344_vm13 = vcmp.lt.s32.totalorder %v1324_v52, 2  ;;  %v1348_v32 = vsel %vm1346_vm2, %v1336_v10, 2102212464 }
 0x199   :  { %v5554_v1 = vsub.s32 %v1267_v39, %v1270_v5  ;;  %v1353_v58 = vsel %vm1345_vm7, %v1336_v10, %v1352_v23  ;;  %v5558_v14 = vpop.eup %4576  ;;  %vm4244_vm14 = vcmp.lt.s32.totalorder %v4243_v63, 0  ;;  %v1359_v26 = vshll.u32 %v1319_v44, 8  ;;  %v212_v39 = vpop.f32.mrf.mxu0 }
 0x19a   :  { %8380 = vst [vmem:[#allocation24_spill] sm:$0xff] %v5558_v14  ;;  %v1354_v8 = vsel %vm1344_vm13, %v1351_v30, %v1353_v58  ;;  %v1419_v12 = vshrl.u32 %v1418_v50, 23  ;;  %v1347_v28 = vsel %vm1343_vm0, %v1327_v6, %v1330_v19  ;;  %v1355_v62 = vsel %vm1343_vm0, %v1333_v45, %v1336_v10 }
 0x19b   :  { %v1273_v20 = vsub.s32 0, %v5554_v1  ;;  %v1356_v5 = vsel %vm1346_vm2, %v1342_v13, 1326507024  ;;  %v8381_v0 = vand.u32 2147483647, %v5126_v61  ;;  %v8382_v21 = vmov 0 }
 0x19c   :  { %v1349_v29 = vsel %vm1345_vm7, %v1333_v45, %v1348_v32  ;;  %v1357_v44 = vsel %vm1345_vm7, %v1339_v41, %v1356_v5  ;;  %v5573_v38 = vmul.u32.u64.low %v1359_v26, %v1354_v8  ;;  %v5574_v3 = vmul.u32.u64.high %v1359_v26, %v1354_v8, %v5573_v38 }
 0x19d   :  { %vm5567_vm11 = vcmp.le.f32.partialorder %v8381_v0, 0.7853982  ;;  %v1079_v19 = vand.u32 2147483647, %v1078_v15  ;;  %v4246_v10 = vmin.u32 %v1273_v20, %v5554_v1  ;;  %v1358_v13 = vsel %vm1344_vm13, %v1355_v62, %v1357_v44 }
 0x19e   :  { %v8383_v21 = vsel %vm5567_vm11, 4294967295, %v8382_v21  ;;  %v8196_v50 = vand.u32 2147483647, %v5526_v11  ;;  %v5580_v6 = vmul.u32.u64.low %v1359_v26, %v1358_v13  ;;  %v5581_v30 = vmul.u32.u64.high %v1359_v26, %v1358_v13, %v5580_v6 }
 0x19f   :  { %8384 = vst [vmem:[#allocation25_spill] sm:$0xff] %v8383_v21  ;;  %v4253_v23 = vadd.s32 4294967169, %v1419_v12  ;;  %v5584_v58 = vadd.f32 %v212_v39, %v4876_v24  ;;  %v1081_v45 = vcvt.s32.f32 %v1074_v18  ;;  %v5587_v41 = vsel %vm4244_vm14, 0, %v4243_v63 }
 0x1a0   :  { %v1275_v32 = vclz %v4246_v10  ;;  %v1350_v15 = vsel %vm1344_vm13, %v1347_v28, %v1349_v29  ;;  %4578 = vsinq.f32 %v5459_v43  ;;  %v8386_v8 = vsel %vm5484_vm1, 0, %v5454_v33  ;;  %v214_v43 = vpop.f32.mrf.mxu0 }
 0x1a1   :  { %8385 = vst [vmem:[#allocation26_spill] sm:$0xff] %v5584_v58  ;;  %v5595_v20 = vadd.s32 3, %v8386_v8  ;;  %v1369_v12 = vadd.s32 1, %v5574_v3  ;;  %v1425_v62 = vadd.s32 1, %v4253_v23  ;;  %4580 = vcosq.f32 %v5521_v56 }
 0x1a2   :  { %v8388_v63 = vxor.u32 2147483648, %v5503_v34  ;;  %v5604_v18 = vmul.f32 %v1081_v45, %v1079_v19  ;;  %v1422_v60 = vand.u32 8388607, %v8196_v50  ;;  %v1179_v33 = vsub.s32 4294967266, %v5587_v41 }
 0x1a3   :  { %8387 = vst [vmem:[#allocation27_spill] sm:$0xff] %v5595_v20  ;;  %v1366_v28 = vmul.u32 %v1359_v26, %v1350_v15  ;;  %vm1368_vm1 = vc.u32 %v5581_v30, %v5573_v38  ;;  %vm1426_vm0 = vcmp.gt.s32.totalorder %v1425_v62, 0  ;;  %v4247_v5 = vadd.s32 4294967294, %v1275_v32 }
 0x1a4   :  { %v980_v52 = vsel %vm8210_vm3, %v8388_v63, %v5503_v34  ;;  %v1370_v39 = vsel %vm1368_vm1, %v1369_v12, %v5574_v3  ;;  %v1427_v0 = vsel %vm1426_vm0, %v1425_v62, 0  ;;  %v1522_v29 = vand.u32 2139095040, %v5584_v58 }
 0x1a5   :  { %4582 = vsinq.f32 %v5521_v56  ;;  %v1371_v34 = vadd.s32 %v1370_v39, %v1366_v28  ;;  %v1429_v44 = vand.u32 31, %v1427_v0  ;;  %v5615_v19 = vadd.f32 %v214_v43, %v4878_v25 }
 0x1a6   :  { %v5620_v26 = vsel %vm5567_vm11, %v5126_v61, %v980_v52  ;;  %v1159_v3 = vadd.s32 %v5408_v47, %v5414_v7  ;;  %v1175_v13 = vsub.s32 32, %v5587_v41  ;;  %v5626_v6 = vadd.s32 127, %v1179_v33 }
 0x1a7   :  { %8389 = vst [vmem:[#allocation28_spill] sm:$0xff] %v5615_v19  ;;  %v1372_v56 = vadd.s32 536870912, %v1371_v34  ;;  %v1423_v23 = vor.u32 8388608, %v1422_v60  ;;  %v1430_v45 = vsub.s32 32, %v1429_v44  ;;  %vm4248_vm2 = vcmp.lt.s32.totalorder %v4247_v5, 0 }
 0x1a8   :  { %v1428_v32 = vshrl.u32 %v1427_v0, 5  ;;  %v1432_v15 = vshll.u32 %v8353_v2, %v1429_v44  ;;  %v1523_v8 = vshrl.u32 %v1522_v29, 23  ;;  %v1435_v63 = vshll.u32 %v8356_v22, %v1429_v44 }
 0x1a9   :  { %v5629_v12 = vshrl.u32 %v1372_v56, 30  ;;  %v1433_v62 = vshrl.u32 %v8356_v22, %v1430_v45  ;;  %v1436_v47 = vshrl.u32 %v8358_v59, %v1430_v45  ;;  %v1438_v7 = vshll.u32 %v8358_v59, %v1429_v44 }
 0x1aa   :  { %v1439_v52 = vshrl.u32 %v8351_v35, %v1430_v45  ;;  %v1441_v60 = vshll.u32 %v8351_v35, %v1429_v44  ;;  %v1442_v43 = vshrl.u32 %v8359_v9, %v1430_v45  ;;  %v5638_v33 = vsel %vm4248_vm2, 0, %v4247_v5 }
 0x1ab   :  { %8390 = vst [vmem:[#allocation29_spill] sm:$0xff] %v5629_v12  ;;  %v1374_v28 = vshll.u32 %v5629_v12, 30  ;;  %v1434_v39 = vor.u32 %v1433_v62, %v1432_v15  ;;  %v1437_v0 = vor.u32 %v1436_v47, %v1435_v63  ;;  %v1177_v29 = vshrl.u32 %v1159_v3, %v1175_v13 }
 0x1ac   :  { %v1181_v56 = vshll.u32 %v5626_v6, 23  ;;  %v1440_v50 = vor.u32 %v1439_v52, %v1438_v7  ;;  %v1443_v10 = vor.u32 %v1442_v43, %v1441_v60  ;;  %v1444_v61 = vshll.u32 %v8359_v9, %v1429_v44 }
 0x1ad   :  { %v5642_v21 = vsub.s32 %v1371_v34, %v1374_v28  ;;  %v1445_v14 = vshrl.u32 %v8352_v46, %v1430_v45  ;;  %v1463_v20 = vshll.u32 %v1423_v23, 8  ;;  %v5646_v57 = vpop.eup %4578  ;;  %v1283_v5 = vsub.s32 4294967266, %v5638_v33 }
 0x1ae   :  { %8391 = vst [vmem:[#allocation30_spill] sm:$0xff] %v5646_v57  ;;  %vm1447_vm7 = vcmp.lt.s32.totalorder %v1428_v32, 1  ;;  %vm1450_vm13 = vcmp.lt.s32.totalorder %v1428_v32, 4  ;;  %v4257_v15 = vadd.s32 4294967169, %v1523_v8  ;;  %v5649_v62 = vpop.eup %4580  ;;  %vm1001_vm14 = vcmp.lt.s32.totalorder %v5186_v51, 0 }
 0x1af   :  { %8392 = vst [vmem:[#allocation31_spill] sm:$0xff] %v5649_v62  ;;  %v1377_v3 = vsub.s32 0, %v5642_v21  ;;  %v1446_v34 = vor.u32 %v1445_v14, %v1444_v61  ;;  %v1452_v13 = vsel %vm1450_vm13, %v1440_v50, 2102212464  ;;  %v1455_v44 = vsel %vm1447_vm7, %v1434_v39, %v1437_v0 }
 0x1b0   :  { %v1431_v6 = vshrl.u32 %v8353_v2, %v1430_v45  ;;  %vm1449_vm1 = vcmp.lt.s32.totalorder %v1428_v32, 3  ;;  %v1456_v23 = vsel %vm1450_vm13, %v1443_v10, 920167782  ;;  %v1459_v63 = vsel %vm1447_vm7, %v1437_v0, %v1440_v50 }
 0x1b1   :  { %v4250_v47 = vmin.u32 %v1377_v3, %v5642_v21  ;;  %vm1448_vm0 = vcmp.lt.s32.totalorder %v1428_v32, 2  ;;  %v1457_v8 = vsel %vm1449_vm1, %v1440_v50, %v1456_v23  ;;  %v1460_v7 = vsel %vm1450_vm13, %v1446_v34, 1326507024 }
 0x1b2   :  { %v5657_v52 = vpop.eup %4582  ;;  %v8394_v60 = vand.u32 2147483647, %v5186_v51  ;;  %v1451_v14 = vsel %vm1447_vm7, %v1431_v6, %v1434_v39  ;;  %v1453_v45 = vsel %vm1449_vm1, %v1437_v0, %v1452_v13  ;;  %v1458_v43 = vsel %vm1448_vm0, %v1455_v44, %v1457_v8 }
 0x1b3   :  { %8393 = vst [vmem:[#allocation32_spill] sm:$0xff] %v5657_v52  ;;  %v1461_v28 = vsel %vm1449_vm1, %v1443_v10, %v1460_v7  ;;  %v1379_v12 = vclz %v4250_v47  ;;  %v5668_v57 = vmul.u32.u64.low %v1463_v20, %v1458_v43  ;;  %v5669_v50 = vmul.u32.u64.high %v1463_v20, %v1458_v43, %v5668_v57 }
 0x1b4   :  { %vm5661_vm2 = vcmp.le.f32.partialorder %v8394_v60, 0.7853982  ;;  %v1462_v3 = vsel %vm1448_vm0, %v1459_v63, %v1461_v28  ;;  %v1176_v34 = vshll.u32 %v5488_v17, %v5587_v41  ;;  %v1529_v62 = vadd.s32 1, %v4257_v15 }
 0x1b5   :  { %v5674_v23 = vmul.u32.u64.low %v1463_v20, %v1462_v3  ;;  %v5675_v60 = vmul.u32.u64.high %v1463_v20, %v1462_v3, %v5674_v23  ;;  %v1085_v39 = vsub.s32 4, %v5372_v48  ;;  %v1284_v0 = vadd.s32 127, %v1283_v5 }
 0x1b6   :  { %v4251_v13 = vadd.s32 4294967294, %v1379_v12  ;;  %v1454_v10 = vsel %vm1448_vm0, %v1451_v14, %v1453_v45  ;;  %4584 = vcosq.f32 %v5620_v26  ;;  %v5680_v44 = vor.u32 %v1177_v29, %v1176_v34 }
 0x1b7   :  { %v8206_v6 = vand.u32 2147483647, %v5584_v58  ;;  %vm1530_vm7 = vcmp.gt.s32.totalorder %v1529_v62, 0  ;;  %v5683_v63 = vor.u32 4788187, %v1181_v56  ;;  %v1473_v17 = vadd.s32 1, %v5669_v50 }
 0x1b8   :  { %vm4252_vm13 = vcmp.lt.s32.totalorder %v4251_v13, 0  ;;  %v1531_v41 = vsel %vm1530_vm7, %v1529_v62, 0  ;;  %v8397_v15 = vxor.u32 2147483648, %v5604_v18  ;;  %v1279_v12 = vsub.s32 32, %v5638_v33 }
 0x1b9   :  { %v1470_v5 = vmul.u32 %v1463_v20, %v1454_v10  ;;  %vm1472_vm1 = vc.u32 %v5675_v60, %v5668_v57  ;;  %4586 = vsinq.f32 %v5620_v26  ;;  %v5698_v29 = vsel %vm1001_vm14, %v1085_v39, %v5372_v48 }
 0x1ba   :  { %v1084_v32 = vsel %vm1001_vm14, %v8397_v15, %v5604_v18  ;;  %v1285_v56 = vshll.u32 %v1284_v0, 23  ;;  %v1474_v62 = vsel %vm1472_vm1, %v1473_v17, %v5669_v50  ;;  %v1263_v47 = vadd.s32 %v5496_v16, %v5507_v54 }
 0x1bb   :  { %v5703_v18 = vsel %vm4252_vm13, 0, %v4251_v13  ;;  %v1475_v8 = vadd.s32 %v1474_v62, %v1470_v5  ;;  %v1533_v20 = vand.u32 31, %v1531_v41  ;;  %v5708_v7 = vsel %vm5661_vm2, %v5186_v51, %v1084_v32 }
 0x1bc   :  { %v1526_v14 = vand.u32 8388607, %v8206_v6  ;;  %v1280_v45 = vshll.u32 %v5554_v1, %v5638_v33  ;;  %v1281_v16 = vshrl.u32 %v1263_v47, %v1279_v12  ;;  %v5716_v28 = vor.u32 4788187, %v1285_v56 }
 0x1bd   :  { %v1476_v54 = vadd.s32 536870912, %v1475_v8  ;;  %v1534_v43 = vsub.s32 32, %v1533_v20  ;;  %v1387_v3 = vsub.s32 4294967266, %v5703_v18  ;;  %v5719_v50 = vshrl.u32 %v1531_v41, 5 }
 0x1be   :  { %v1536_v34 = vshll.u32 %v8353_v2, %v1533_v20  ;;  %v1539_v0 = vshll.u32 %v8356_v22, %v1533_v20  ;;  %v1542_v1 = vshll.u32 %v8358_v59, %v1533_v20  ;;  %v1545_v10 = vshll.u32 %v8351_v35, %v1533_v20 }
 0x1bf   :  { %v5722_v23 = vshrl.u32 %v1476_v54, 30  ;;  %v1537_v39 = vshrl.u32 %v8356_v22, %v1534_v43  ;;  %v1540_v13 = vshrl.u32 %v8358_v59, %v1534_v43  ;;  %v1543_v33 = vshrl.u32 %v8351_v35, %v1534_v43 }
 0x1c0   :  { %v1546_v17 = vshrl.u32 %v8359_v9, %v1534_v43  ;;  %v8209_v12 = vand.u32 2147483647, %v5615_v19  ;;  %v1282_v5 = vor.u32 %v1281_v16, %v1280_v45  ;;  %v1527_v56 = vor.u32 8388608, %v1526_v14 }
 0x1c1   :  { %v1478_v41 = vshll.u32 %v5722_v23, 30  ;;  %v1538_v15 = vor.u32 %v1537_v39, %v1536_v34  ;;  %v1541_v32 = vor.u32 %v1540_v13, %v1539_v0  ;;  %v1544_v62 = vor.u32 %v1543_v33, %v1542_v1 }
 0x1c2   :  { %v1547_v47 = vor.u32 %v1546_v17, %v1545_v10  ;;  %v1287_v54 = vand.u32 2147483647, %v5716_v28  ;;  %v1548_v48 = vshll.u32 %v8359_v9, %v1533_v20  ;;  %v1549_v26 = vshrl.u32 %v8352_v46, %v1534_v43 }
 0x1c3   :  { %v5734_v6 = vsub.s32 %v1475_v8, %v1478_v41  ;;  %v5738_v51 = vpop.eup %4584  ;;  %v1388_v52 = vadd.s32 127, %v1387_v3  ;;  %vm1551_vm14 = vcmp.lt.s32.totalorder %v5719_v50, 1  ;;  %vm1552_vm0 = vcmp.lt.s32.totalorder %v5719_v50, 2 }
 0x1c4   :  { %8398 = vst [vmem:[#allocation33_spill] sm:$0xff] %v5738_v51  ;;  %v1626_v45 = vand.u32 2139095040, %v5615_v19  ;;  %v1550_v16 = vor.u32 %v1549_v26, %v1548_v48  ;;  %vm1554_vm7 = vcmp.lt.s32.totalorder %v5719_v50, 4  ;;  %v1559_v8 = vsel %vm1551_vm14, %v1538_v15, %v1541_v32 }
 0x1c5   :  { %v1481_v14 = vsub.s32 0, %v5734_v6  ;;  %v1535_v20 = vshrl.u32 %v8353_v2, %v1534_v43  ;;  %vm1553_vm13 = vcmp.lt.s32.totalorder %v5719_v50, 3  ;;  %v1560_v28 = vsel %vm1554_vm7, %v1547_v47, 920167782 }
 0x1c6   :  { %v1563_v3 = vsel %vm1551_vm14, %v1541_v32, %v1544_v62  ;;  %v5751_v34 = vpop.eup %4586  ;;  %v1556_v0 = vsel %vm1554_vm7, %v1544_v62, 2102212464  ;;  %v1561_v26 = vsel %vm1553_vm13, %v1544_v62, %v1560_v28  ;;  %v1564_v48 = vsel %vm1554_vm7, %v1550_v16, 1326507024 }
 0x1c7   :  { %8399 = vst [vmem:[#allocation34_spill] sm:$0xff] %v5751_v34  ;;  %v4254_v39 = vmin.u32 %v1481_v14, %v5734_v6  ;;  %vm1209_vm1 = vcmp.lt.s32.totalorder %v5387_v37, 0  ;;  %v1562_v43 = vsel %vm1552_vm0, %v1559_v8, %v1561_v26  ;;  %v1565_v13 = vsel %vm1553_vm13, %v1547_v47, %v1564_v48 }
 0x1c8   :  { %v1567_v1 = vshll.u32 %v1527_v56, 8  ;;  %v1627_v33 = vshrl.u32 %v1626_v45, 23  ;;  %v1383_v10 = vsub.s32 32, %v5703_v18  ;;  %v1555_v41 = vsel %vm1551_vm14, %v1535_v20, %v1538_v15 }
 0x1c9   :  { %v1483_v17 = vclz %v4254_v39  ;;  %v1566_v62 = vsel %vm1552_vm0, %v1563_v3, %v1565_v13  ;;  %v1557_v14 = vsel %vm1553_vm13, %v1541_v32, %v1556_v0  ;;  %v1389_v26 = vshll.u32 %v1388_v52, 23 }
 0x1ca   :  { %v5768_v16 = vmul.u32.u64.low %v1567_v1, %v1566_v62  ;;  %v5769_v28 = vmul.u32.u64.high %v1567_v1, %v1566_v62, %v5768_v16  ;;  %v4261_v8 = vadd.s32 4294967169, %v1627_v33  ;;  %v1088_v15 = vsel %vm5661_vm2, 0, %v5698_v29 }
 0x1cb   :  { %v4255_v47 = vadd.s32 4294967294, %v1483_v17  ;;  %v5771_v56 = vmul.u32.u64.low %v1567_v1, %v1562_v43  ;;  %v5772_v45 = vmul.u32.u64.high %v1567_v1, %v1562_v43, %v5771_v56  ;;  %4588 = vcosq.f32 %v5708_v7  ;;  %v218_v17 = vpop.f32.mrf.mxu0 }
 0x1cc   :  { %v1289_v20 = vcvt.s32.f32 %v1282_v5  ;;  %v1633_v3 = vadd.s32 1, %v4261_v8  ;;  %v8400_v32 = vand.u32 2147483647, %v5683_v63  ;;  %v8401_v39 = vcvt.s32.f32 %v5680_v44 }
 0x1cd   :  { %v1293_v52 = vsub.s32 4, %v5544_v36  ;;  %v1367_v48 = vadd.s32 %v5573_v38, %v5581_v30  ;;  %v1558_v43 = vsel %vm1552_vm0, %v1555_v41, %v1557_v14  ;;  %vm4256_vm2 = vcmp.lt.s32.totalorder %v4255_v47, 0 }
 0x1ce   :  { %v5783_v0 = vmul.f32 %v8401_v39, %v8400_v32  ;;  %v5790_v61 = vmul.f32 %v1289_v20, %v1287_v54  ;;  %vm1576_vm14 = vc.u32 %v5769_v28, %v5771_v56  ;;  %vm1634_vm7 = vcmp.gt.s32.totalorder %v1633_v3, 0 }
 0x1cf   :  { %v1385_v63 = vshrl.u32 %v1367_v48, %v1383_v10  ;;  %v5794_v29 = vor.u32 4788187, %v1389_v26  ;;  %v1577_v44 = vadd.s32 1, %v5772_v45  ;;  %v1630_v5 = vand.u32 8388607, %v8209_v12 }
 0x1d0   :  { %4590 = vsinq.f32 %v5708_v7  ;;  %v5800_v38 = vadd.s32 3, %v1088_v15  ;;  %v1574_v30 = vmul.u32 %v1567_v1, %v1558_v43  ;;  %v1635_v50 = vsel %vm1634_vm7, %v1633_v3, 0 }
 0x1d1   :  { %v5805_v54 = vsel %vm1209_vm1, %v1293_v52, %v5544_v36  ;;  %v1384_v13 = vshll.u32 %v5642_v21, %v5703_v18  ;;  %v5809_v33 = vsel %vm4256_vm2, 0, %v4255_v47  ;;  %v1578_v10 = vsel %vm1576_vm14, %v1577_v44, %v5772_v45 }
 0x1d2   :  { %8402 = vst [vmem:[#allocation35_spill] sm:$0xff] %v5800_v38  ;;  %v1187_v41 = vxor.u32 2147483648, %v5783_v0  ;;  %v1579_v62 = vadd.s32 %v1578_v10, %v1574_v30  ;;  %v1637_v1 = vand.u32 31, %v1635_v50  ;;  %v1471_v36 = vadd.s32 %v5668_v57, %v5675_v60 }
 0x1d3   :  { %v5814_v14 = vor.u32 %v1385_v63, %v1384_v13  ;;  %v1631_v8 = vor.u32 8388608, %v1630_v5  ;;  %v1487_v21 = vsub.s32 32, %v5809_v33  ;;  %v5821_v47 = vadd.f32 %v218_v17, %v4876_v24 }
 0x1d4   :  { %v1580_v18 = vadd.s32 536870912, %v1579_v62  ;;  %v1638_v26 = vsub.s32 32, %v1637_v1  ;;  %v1491_v45 = vsub.s32 4294967266, %v5809_v33  ;;  %v1636_v15 = vshrl.u32 %v1635_v50, 5 }
 0x1d5   :  { %8403 = vst [vmem:[#allocation36_spill] sm:$0xff] %v5821_v47  ;;  %v1640_v20 = vshll.u32 %v8353_v2, %v1637_v1  ;;  %v1643_v3 = vshll.u32 %v8356_v22, %v1637_v1  ;;  %v1646_v60 = vshll.u32 %v8358_v59, %v1637_v1  ;;  %vm8223_vm0 = vcmp.lt.s32.totalorder %v5271_v4, 0 }
 0x1d6   :  { %v5826_v32 = vshrl.u32 %v1580_v18, 30  ;;  %v1641_v39 = vshrl.u32 %v8356_v22, %v1638_v26  ;;  %v1644_v57 = vshrl.u32 %v8358_v59, %v1638_v26  ;;  %v1647_v52 = vshrl.u32 %v8351_v35, %v1638_v26 }
 0x1d7   :  { %v1649_v48 = vshll.u32 %v8351_v35, %v1637_v1  ;;  %v1650_v43 = vshrl.u32 %v8359_v9, %v1638_v26  ;;  %v1652_v63 = vshll.u32 %v8359_v9, %v1637_v1  ;;  %v1653_v50 = vshrl.u32 %v8352_v46, %v1638_v26 }
 0x1d8   :  { %8404 = vst [vmem:[#allocation37_spill] sm:$0xff] %v5826_v32  ;;  %v1582_v44 = vshll.u32 %v5826_v32, 30  ;;  %v1642_v5 = vor.u32 %v1641_v39, %v1640_v20  ;;  %v1645_v30 = vor.u32 %v1644_v57, %v1643_v3  ;;  %v5838_v13 = vpop.eup %4588  ;;  %v8406_v10 = vand.u32 2147483647, %v5387_v37 }
 0x1d9   :  { %8405 = vst [vmem:[#allocation38_spill] sm:$0xff] %v5838_v13  ;;  %v1492_v18 = vadd.s32 127, %v1491_v45  ;;  %v1648_v12 = vor.u32 %v1647_v52, %v1646_v60  ;;  %v1651_v16 = vor.u32 %v1650_v43, %v1649_v48  ;;  %vm1655_vm2 = vcmp.lt.s32.totalorder %v1636_v15, 1 }
 0x1da   :  { %vm5842_vm13 = vcmp.le.f32.partialorder %v8406_v10, 0.7853982  ;;  %v5846_v7 = vsub.s32 %v1579_v62, %v1582_v44  ;;  %v1654_v1 = vor.u32 %v1653_v50, %v1652_v63  ;;  %vm1656_vm14 = vcmp.lt.s32.totalorder %v1636_v15, 2 }
 0x1db   :  { %vm1658_vm7 = vcmp.lt.s32.totalorder %v1636_v15, 4  ;;  %v8409_v20 = vand.u32 2147483647, %v5271_v4  ;;  %v8410_v3 = vmov 0  ;;  %vm1657_vm6 = vcmp.lt.s32.totalorder %v1636_v15, 3 }
 0x1dc   :  { %v1660_v39 = vsel %vm1658_vm7, %v1648_v12, 2102212464  ;;  %v1663_v57 = vsel %vm1655_vm2, %v1642_v5, %v1645_v30  ;;  %v1664_v10 = vsel %vm1658_vm7, %v1651_v16, 920167782  ;;  %v1585_v45 = vsub.s32 0, %v5846_v7 }
 0x1dd   :  { %vm5850_vm3 = vcmp.le.f32.partialorder %v8409_v20, 0.7853982  ;;  %v1639_v60 = vshrl.u32 %v8353_v2, %v1638_v26  ;;  %v1665_v62 = vsel %vm1657_vm6, %v1648_v12, %v1664_v10  ;;  %v1667_v52 = vsel %vm1655_vm2, %v1645_v30, %v1648_v12  ;;  %v5859_v48 = vpop.eup %4590 }
 0x1de   :  { %v8411_v3 = vsel %vm5850_vm3, 4294967295, %v8410_v3  ;;  %8413 = vst [vmem:[#allocation40_spill] sm:$0xff] %v5859_v48  ;;  %v1666_v43 = vsel %vm1656_vm14, %v1663_v57, %v1665_v62  ;;  %v1668_v63 = vsel %vm1658_vm7, %v1654_v1, 1326507024  ;;  %v1671_v44 = vshll.u32 %v1631_v8, 8 }
 0x1df   :  { %8412 = vst [vmem:[#allocation39_spill] sm:$0xff] %v8411_v3  ;;  %v1730_v50 = vand.u32 2139095040, %v5821_v47  ;;  %v4258_v20 = vmin.u32 %v1585_v45, %v5846_v7  ;;  %v1659_v32 = vsel %vm1655_vm2, %v1639_v60, %v1642_v5  ;;  %v1661_v51 = vsel %vm1657_vm6, %v1645_v30, %v1660_v39  ;;  %v220_v39 = vpop.f32.mrf.mxu0 }
 0x1e0   :  { %v1669_v26 = vsel %vm1657_vm6, %v1651_v16, %v1668_v63  ;;  %v1493_v34 = vshll.u32 %v1492_v18, 23  ;;  %v5868_v12 = vmul.u32.u64.low %v1671_v44, %v1666_v43  ;;  %v5869_v13 = vmul.u32.u64.high %v1671_v44, %v1666_v43, %v5868_v12 }
 0x1e1   :  { %v1670_v10 = vsel %vm1656_vm14, %v1667_v52, %v1669_v26  ;;  %v1188_v8 = vsel %vm8223_vm0, %v1187_v41, %v5783_v0  ;;  %v1393_v1 = vcvt.s32.f32 %v5814_v14  ;;  %vm8218_vm2 = vcmp.lt.s32.totalorder %v5417_v55, 0 }
 0x1e2   :  { %v5876_v57 = vmul.u32.u64.low %v1671_v44, %v1670_v10  ;;  %v5877_v45 = vmul.u32.u64.high %v1671_v44, %v1670_v10, %v5876_v57  ;;  %v1489_v5 = vshrl.u32 %v1471_v36, %v1487_v21  ;;  %v1587_v16 = vclz %v4258_v20 }
 0x1e3   :  { %v1662_v30 = vsel %vm1656_vm14, %v1659_v32, %v1661_v51  ;;  %v1731_v18 = vshrl.u32 %v1730_v50, 23  ;;  %v8414_v60 = vxor.u32 2147483648, %v5790_v61  ;;  %v1296_v0 = vsel %vm5842_vm13, 0, %v5805_v54 }
 0x1e4   :  { %v8415_v41 = vand.u32 2147483647, %v5794_v29  ;;  %v8219_v36 = vand.u32 2147483647, %v5821_v47  ;;  %v1488_v51 = vshll.u32 %v5734_v6, %v5809_v33  ;;  %v1494_v21 = vor.u32 4788187, %v1493_v34 }
 0x1e5   :  { %v1292_v62 = vsel %vm1209_vm1, %v8414_v60, %v5790_v61  ;;  %v1681_v15 = vadd.s32 1, %v5869_v13  ;;  %v4265_v32 = vadd.s32 4294967169, %v1731_v18  ;;  %v1191_v61 = vsel %vm5850_vm3, %v5271_v4, %v1188_v8 }
 0x1e6   :  { %v1394_v14 = vmul.f32 %v1393_v1, %v8415_v41  ;;  %v1678_v52 = vmul.u32 %v1671_v44, %v1662_v30  ;;  %vm1680_vm6 = vc.u32 %v5877_v45, %v5868_v12  ;;  %v5901_v29 = vadd.f32 %v220_v39, %v4878_v25  ;;  %v224_v1 = vpop.f32.mrf.mxu0 }
 0x1e7   :  { %v1490_v54 = vor.u32 %v1489_v5, %v1488_v51  ;;  %v4259_v43 = vadd.s32 4294967294, %v1587_v16  ;;  %v1682_v63 = vsel %vm1680_vm6, %v1681_v15, %v5869_v13  ;;  %v1737_v6 = vadd.s32 1, %v4265_v32 }
 0x1e8   :  { %8416 = vst [vmem:[#allocation41_spill] sm:$0xff] %v5901_v29  ;;  %v5907_v34 = vsel %vm5842_vm13, %v5387_v37, %v1292_v62  ;;  %v1395_v33 = vxor.u32 2147483648, %v1394_v14  ;;  %v1683_v50 = vadd.s32 %v1682_v63, %v1678_v52  ;;  %v1734_v44 = vand.u32 8388607, %v8219_v36 }
 0x1e9   :  { %4592 = vcosq.f32 %v1191_v61  ;;  %v5911_v20 = vadd.s32 3, %v1296_v0  ;;  %v1495_v26 = vand.u32 2147483647, %v1494_v21  ;;  %vm1738_vm1 = vcmp.gt.s32.totalorder %v1737_v6, 0 }
 0x1ea   :  { %4594 = vsinq.f32 %v1191_v61  ;;  %v1684_v10 = vadd.s32 536870912, %v1683_v50  ;;  %v1739_v8 = vsel %vm1738_vm1, %v1737_v6, 0  ;;  %v1834_v13 = vand.u32 2139095040, %v5901_v29 }
 0x1eb   :  { %8417 = vst [vmem:[#allocation42_spill] sm:$0xff] %v5911_v20  ;;  %4596 = vcosq.f32 %v5907_v34  ;;  %v1497_v17 = vcvt.s32.f32 %v1490_v54  ;;  %vm4260_vm13 = vcmp.lt.s32.totalorder %v4259_v43, 0  ;;  %v1741_v57 = vand.u32 31, %v1739_v8 }
 0x1ec   :  { %v5917_v5 = vsel %vm8218_vm2, %v1395_v33, %v1394_v14  ;;  %v5920_v30 = vshrl.u32 %v1684_v10, 30  ;;  %v1735_v18 = vor.u32 8388608, %v1734_v44  ;;  %v1575_v60 = vadd.s32 %v5771_v56, %v5769_v28 }
 0x1ed   :  { %v5922_v39 = vmul.f32 %v1497_v17, %v1495_v26  ;;  %v1742_v62 = vsub.s32 32, %v1741_v57  ;;  %v5927_v0 = vadd.f32 %v224_v1, %v4876_v24  ;;  %v5929_v41 = vsel %vm4260_vm13, 0, %v4259_v43 }
 0x1ee   :  { %v1686_v51 = vshll.u32 %v5920_v30, 30  ;;  %v1744_v14 = vshll.u32 %v8353_v2, %v1741_v57  ;;  %v1835_v21 = vshrl.u32 %v1834_v13, 23  ;;  %v1747_v32 = vshll.u32 %v8356_v22, %v1741_v57 }
 0x1ef   :  { %8418 = vst [vmem:[#allocation43_spill] sm:$0xff] %v5927_v0  ;;  %v1745_v15 = vshrl.u32 %v8356_v22, %v1742_v62  ;;  %v1748_v61 = vshrl.u32 %v8358_v59, %v1742_v62  ;;  %v1751_v52 = vshrl.u32 %v8351_v35, %v1742_v62  ;;  %v1740_v56 = vshrl.u32 %v1739_v8, 5 }
 0x1f0   :  { %v5937_v28 = vsub.s32 %v1683_v50, %v1686_v51  ;;  %v5939_v54 = vshll.u32 %v1735_v18, 8  ;;  %v8217_v43 = vand.u32 2147483647, %v5901_v29  ;;  %v1595_v63 = vsub.s32 4294967266, %v5929_v41 }
 0x1f1   :  { %v1746_v6 = vor.u32 %v1745_v15, %v1744_v14  ;;  %v1749_v33 = vor.u32 %v1748_v61, %v1747_v32  ;;  %v1750_v44 = vshll.u32 %v8358_v59, %v1741_v57  ;;  %v1753_v10 = vshll.u32 %v8351_v35, %v1741_v57 }
 0x1f2   :  { %v1689_v26 = vsub.s32 0, %v5937_v28  ;;  %v1754_v13 = vshrl.u32 %v8359_v9, %v1742_v62  ;;  %v4269_v1 = vadd.s32 4294967169, %v1835_v21  ;;  %v1591_v50 = vsub.s32 32, %v5929_v41 }
 0x1f3   :  { %v1752_v8 = vor.u32 %v1751_v52, %v1750_v44  ;;  %v1756_v17 = vshll.u32 %v8359_v9, %v1741_v57  ;;  %v1757_v18 = vshrl.u32 %v8352_v46, %v1742_v62  ;;  %vm1759_vm14 = vcmp.lt.s32.totalorder %v1740_v56, 1 }
 0x1f4   :  { %v4262_v51 = vmin.u32 %v1689_v26, %v5937_v28  ;;  %v1755_v14 = vor.u32 %v1754_v13, %v1753_v10  ;;  %v1838_v15 = vand.u32 8388607, %v8217_v43  ;;  %v8419_v32 = vand.u32 2147483647, %v5417_v55 }
 0x1f5   :  { %v8420_v61 = vmov 0  ;;  %vm1417_vm6 = vcmp.lt.s32.totalorder %v5526_v11, 0  ;;  %v1596_v21 = vadd.s32 127, %v1595_v63  ;;  %v1758_v52 = vor.u32 %v1757_v18, %v1756_v17 }
 0x1f6   :  { %vm5955_vm7 = vcmp.le.f32.partialorder %v8419_v32, 0.7853982  ;;  %vm1762_vm1 = vcmp.lt.s32.totalorder %v1740_v56, 4  ;;  %v1767_v57 = vsel %vm1759_vm14, %v1746_v6, %v1749_v33  ;;  %v5961_v44 = vpop.eup %4592  ;;  %v1691_v26 = vclz %v4262_v51 }
 0x1f7   :  { %v8421_v61 = vsel %vm5955_vm7, 4294967295, %v8420_v61  ;;  %8423 = vst [vmem:[#allocation45_spill] sm:$0xff] %v5961_v44  ;;  %vm1761_vm13 = vcmp.lt.s32.totalorder %v1740_v56, 3  ;;  %v1768_v10 = vsel %vm1762_vm1, %v1755_v14, 920167782  ;;  %v1841_v13 = vadd.s32 1, %v4269_v1  ;;  %v5964_v43 = vpop.eup %4594 }
 0x1f8   :  { %8422 = vst [vmem:[#allocation44_spill] sm:$0xff] %v8421_v61  ;;  %8424 = vst [vmem:[#allocation46_spill] sm:$0xff] %v5964_v43  ;;  %v1743_v32 = vshrl.u32 %v8353_v2, %v1742_v62  ;;  %vm1760_vm2 = vcmp.lt.s32.totalorder %v1740_v56, 2  ;;  %v1764_v36 = vsel %vm1762_vm1, %v1752_v8, 2102212464  ;;  %v1769_v63 = vsel %vm1761_vm13, %v1752_v8, %v1768_v10  ;;  %v5969_v17 = vpop.eup %4596 }
 0x1f9   :  { %8425 = vst [vmem:[#allocation47_spill] sm:$0xff] %v5969_v17  ;;  %v1593_v18 = vshrl.u32 %v1575_v60, %v1591_v50  ;;  %v4263_v16 = vadd.s32 4294967294, %v1691_v26  ;;  %v1770_v44 = vsel %vm1760_vm2, %v1767_v57, %v1769_v63  ;;  %v1771_v51 = vsel %vm1759_vm14, %v1749_v33, %v1752_v8 }
 0x1fa   :  { %v1763_v3 = vsel %vm1759_vm14, %v1743_v32, %v1746_v6  ;;  %v1772_v1 = vsel %vm1762_vm1, %v1758_v52, 1326507024  ;;  %v5976_v43 = vmul.u32.u64.low %v5939_v54, %v1770_v44  ;;  %v5977_v62 = vmul.u32.u64.high %v5939_v54, %v1770_v44, %v5976_v43 }
 0x1fb   :  { %vm4264_vm0 = vcmp.lt.s32.totalorder %v4263_v16, 0  ;;  %v1765_v10 = vsel %vm1761_vm13, %v1749_v33, %v1764_v36  ;;  %v1773_v4 = vsel %vm1761_vm13, %v1755_v14, %v1772_v1  ;;  %vm1842_vm5 = vcmp.gt.s32.totalorder %v1841_v13, 0 }
 0x1fc   :  { %v1597_v60 = vshll.u32 %v1596_v21, 23  ;;  %v5982_v50 = vsel %vm4264_vm0, 0, %v4263_v16  ;;  %v1774_v8 = vsel %vm1760_vm2, %v1771_v51, %v1773_v4  ;;  %v1843_v57 = vsel %vm1842_vm5, %v1841_v13, 0 }
 0x1fd   :  { %4598 = vsinq.f32 %v5907_v34  ;;  %v1592_v6 = vshll.u32 %v5846_v7, %v5929_v41  ;;  %v1699_v52 = vsub.s32 4294967266, %v5982_v50  ;;  %v1839_v44 = vor.u32 8388608, %v1838_v15 }
 0x1fe   :  { %v1766_v26 = vsel %vm1760_vm2, %v1763_v3, %v1765_v10  ;;  %v5991_v36 = vmul.u32.u64.low %v5939_v54, %v1774_v8  ;;  %v5992_v33 = vmul.u32.u64.high %v5939_v54, %v1774_v8, %v5991_v36  ;;  %v1845_v14 = vand.u32 31, %v1843_v57 }
 0x1ff   :  { %v5998_v4 = vsel %vm5955_vm7, %v5417_v55, %v5917_v5  ;;  %v1499_v34 = vxor.u32 2147483648, %v5922_v39  ;;  %v8426_v7 = vsub.s32 4, %v5722_v23  ;;  %v1785_v3 = vadd.s32 1, %v5977_v62 }
 0x200   :  { %v6009_v41 = vor.u32 %v1593_v18, %v1592_v6  ;;  %v6011_v56 = vor.u32 4788187, %v1597_v60  ;;  %v1846_v15 = vsub.s32 32, %v1845_v14  ;;  %v1938_v21 = vand.u32 2139095040, %v5927_v0 }
 0x201   :  { %v6006_v16 = vsel %vm1417_vm6, %v8426_v7, %v5722_v23  ;;  %v6014_v5 = vadd.s32 127, %v1699_v52  ;;  %v1782_v13 = vmul.u32 %v5939_v54, %v1766_v26  ;;  %v1844_v32 = vshrl.u32 %v1843_v57, 5 }
 0x202   :  { %v6017_v63 = vshll.u32 %v1839_v44, 8  ;;  %vm1784_vm5 = vc.u32 %v5992_v33, %v5976_v43  ;;  %v1848_v23 = vshll.u32 %v8353_v2, %v1845_v14  ;;  %v1849_v18 = vshrl.u32 %v8356_v22, %v1846_v15 }
 0x203   :  { %v1851_v51 = vshll.u32 %v8356_v22, %v1845_v14  ;;  %v1786_v1 = vsel %vm1784_vm5, %v1785_v3, %v5977_v62  ;;  %v1852_v10 = vshrl.u32 %v8358_v59, %v1846_v15  ;;  %v1854_v60 = vshll.u32 %v8358_v59, %v1845_v14 }
 0x204   :  { %v1857_v54 = vshll.u32 %v8351_v35, %v1845_v14  ;;  %v1787_v8 = vadd.s32 %v1786_v1, %v1782_v13  ;;  %v1850_v57 = vor.u32 %v1849_v18, %v1848_v23  ;;  %v1855_v6 = vshrl.u32 %v8351_v35, %v1846_v15 }
 0x205   :  { %v1858_v52 = vshrl.u32 %v8359_v9, %v1846_v15  ;;  %v1853_v44 = vor.u32 %v1852_v10, %v1851_v51  ;;  %v1860_v26 = vshll.u32 %v8359_v9, %v1845_v14  ;;  %v1861_v36 = vshrl.u32 %v8352_v46, %v1846_v15 }
 0x206   :  { %vm1863_vm0 = vcmp.lt.s32.totalorder %v1844_v32, 1  ;;  %v1788_v7 = vadd.s32 536870912, %v1787_v8  ;;  %v1847_v62 = vshrl.u32 %v8353_v2, %v1846_v15  ;;  %v1856_v3 = vor.u32 %v1855_v6, %v1854_v60 }
 0x207   :  { %v1859_v61 = vor.u32 %v1858_v52, %v1857_v54  ;;  %v1862_v55 = vor.u32 %v1861_v36, %v1860_v26  ;;  %vm1865_vm2 = vcmp.lt.s32.totalorder %v1844_v32, 3  ;;  %vm1866_vm14 = vcmp.lt.s32.totalorder %v1844_v32, 4 }
 0x208   :  { %v1871_v13 = vsel %vm1863_vm0, %v1850_v57, %v1853_v44  ;;  %v8427_v23 = vand.u32 2147483647, %v5526_v11  ;;  %v6039_v51 = vshrl.u32 %v1788_v7, 30  ;;  %v1868_v14 = vsel %vm1866_vm14, %v1856_v3, 2102212464 }
 0x209   :  { %v1872_v1 = vsel %vm1866_vm14, %v1859_v61, 920167782  ;;  %v1875_v10 = vsel %vm1863_vm0, %v1853_v44, %v1856_v3  ;;  %vm1864_vm13 = vcmp.lt.s32.totalorder %v1844_v32, 2  ;;  %v1867_v37 = vsel %vm1863_vm0, %v1847_v62, %v1850_v57 }
 0x20a   :  { %vm6035_vm1 = vcmp.le.f32.partialorder %v8427_v23, 0.7853982  ;;  %8430 = vst [vmem:[#allocation48_spill] sm:$0xff] %v6039_v51  ;;  %v1873_v15 = vsel %vm1865_vm2, %v1856_v3, %v1872_v1  ;;  %v1876_v60 = vsel %vm1866_vm14, %v1862_v55, 1326507024  ;;  %v6042_v54 = vpop.eup %4598  ;;  %v1790_v6 = vshll.u32 %v6039_v51, 30 }
 0x20b   :  { %8431 = vst [vmem:[#allocation49_spill] sm:$0xff] %v6042_v54  ;;  %v1869_v52 = vsel %vm1865_vm2, %v1853_v44, %v1868_v14  ;;  %v1874_v26 = vsel %vm1864_vm13, %v1871_v13, %v1873_v15  ;;  %v1877_v36 = vsel %vm1865_vm2, %v1859_v61, %v1876_v60  ;;  %v1599_v7 = vand.u32 2147483647, %v6011_v56  ;;  %v226_v15 = vpop.f32.mrf.mxu0 }
 0x20c   :  { %v1878_v23 = vsel %vm1864_vm13, %v1875_v10, %v1877_v36  ;;  %v6051_v17 = vmul.u32.u64.low %v6017_v63, %v1874_v26  ;;  %v6052_v57 = vmul.u32.u64.high %v6017_v63, %v1874_v26, %v6051_v17  ;;  %v1695_v55 = vsub.s32 32, %v5982_v50 }
 0x20d   :  { %v6056_v62 = vsub.s32 %v1787_v8, %v1790_v6  ;;  %v6059_v3 = vmul.u32.u64.low %v6017_v63, %v1878_v23  ;;  %v6060_v44 = vmul.u32.u64.high %v6017_v63, %v1878_v23, %v6059_v3  ;;  %4600 = vcosq.f32 %v5998_v4 }
 0x20e   :  { %v1601_v61 = vcvt.s32.f32 %v6009_v41  ;;  %v1870_v56 = vsel %vm1864_vm13, %v1867_v37, %v1869_v52  ;;  %v1939_v13 = vshrl.u32 %v1938_v21, 23  ;;  %v1500_v14 = vsel %vm1417_vm6, %v1499_v34, %v5922_v39 }
 0x20f   :  { %v1679_v1 = vadd.s32 %v5868_v12, %v5877_v45  ;;  %v1701_v8 = vshll.u32 %v6014_v5, 23  ;;  %v1793_v10 = vsub.s32 0, %v6056_v62  ;;  %v1889_v6 = vadd.s32 1, %v6052_v57 }
 0x210   :  { %v1602_v60 = vmul.f32 %v1601_v61, %v1599_v7  ;;  %v8233_v41 = vand.u32 2147483647, %v5927_v0  ;;  %v4273_v32 = vadd.s32 4294967169, %v1939_v13  ;;  %v1886_v52 = vmul.u32 %v6017_v63, %v1870_v56  ;;  %v230_v56 = vpop.f32.mrf.mxu0 }
 0x211   :  { %v1697_v37 = vshrl.u32 %v1679_v1, %v1695_v55  ;;  %v4266_v21 = vmin.u32 %v1793_v10, %v6056_v62  ;;  %vm1888_vm6 = vc.u32 %v6060_v44, %v6051_v17  ;;  %v1503_v12 = vsel %vm6035_vm1, %v5526_v11, %v1500_v14 }
 0x212   :  { %v1890_v45 = vsel %vm1888_vm6, %v1889_v6, %v6052_v57  ;;  %v1945_v39 = vadd.s32 1, %v4273_v32  ;;  %v6083_v34 = vadd.f32 %v226_v15, %v4878_v25  ;;  %v1696_v5 = vshll.u32 %v5937_v28, %v5982_v50 }
 0x213   :  { %v1702_v26 = vor.u32 4788187, %v1701_v8  ;;  %v1795_v36 = vclz %v4266_v21  ;;  %v1891_v7 = vadd.s32 %v1890_v45, %v1886_v52  ;;  %4602 = vsinq.f32 %v5998_v4 }
 0x214   :  { %8432 = vst [vmem:[#allocation50_spill] sm:$0xff] %v6083_v34  ;;  %v1603_v63 = vxor.u32 2147483648, %v1602_v60  ;;  %v1942_v23 = vand.u32 8388607, %v8233_v41  ;;  %vm1946_vm5 = vcmp.gt.s32.totalorder %v1945_v39, 0  ;;  %v1698_v55 = vor.u32 %v1697_v37, %v1696_v5 }
 0x215   :  { %v4267_v3 = vadd.s32 4294967294, %v1795_v36  ;;  %v1892_v57 = vadd.s32 536870912, %v1891_v7  ;;  %v1947_v61 = vsel %vm1946_vm5, %v1945_v39, 0  ;;  %4604 = vcosq.f32 %v1503_v12 }
 0x216   :  { %vm8239_vm0 = vcmp.lt.s32.totalorder %v5584_v58, 0  ;;  %v1949_v28 = vand.u32 31, %v1947_v61  ;;  %v1703_v50 = vand.u32 2147483647, %v1702_v26  ;;  %v2042_v14 = vand.u32 2139095040, %v6083_v34 }
 0x217   :  { %vm4268_vm2 = vcmp.lt.s32.totalorder %v4267_v3, 0  ;;  %v6094_v4 = vshrl.u32 %v1892_v57, 30  ;;  %4606 = vsinq.f32 %v1503_v12  ;;  %v1943_v1 = vor.u32 8388608, %v1942_v23 }
 0x218   :  { %v1950_v8 = vsub.s32 32, %v1949_v28  ;;  %v6098_v10 = vadd.f32 %v230_v56, %v4876_v24  ;;  %v1604_v15 = vsel %vm8239_vm0, %v1603_v63, %v1602_v60  ;;  %v1705_v6 = vcvt.s32.f32 %v1698_v55 }
 0x219   :  { %v1709_v32 = vsub.s32 4, %v5920_v30  ;;  %v1894_v37 = vshll.u32 %v6094_v4, 30  ;;  %v1783_v21 = vadd.s32 %v5976_v43, %v5992_v33  ;;  %v6106_v52 = vsel %vm4268_vm2, 0, %v4267_v3 }
 0x21a   :  { %8433 = vst [vmem:[#allocation51_spill] sm:$0xff] %v6098_v10  ;;  %v1953_v12 = vshrl.u32 %v8356_v22, %v1950_v8  ;;  %v1956_v45 = vshrl.u32 %v8358_v59, %v1950_v8  ;;  %v6110_v39 = vpop.eup %4600  ;;  %v6112_v5 = vmul.f32 %v1705_v6, %v1703_v50  ;;  %v8240_v60 = vand.u32 2147483647, %v6083_v34 }
 0x21b   :  { %8434 = vst [vmem:[#allocation52_spill] sm:$0xff] %v6110_v39  ;;  %v6114_v26 = vsub.s32 %v1891_v7, %v1894_v37  ;;  %v2043_v36 = vshrl.u32 %v2042_v14, 23  ;;  %v1952_v63 = vshll.u32 %v8353_v2, %v1949_v28  ;;  %v1955_v23 = vshll.u32 %v8356_v22, %v1949_v28 }
 0x21c   :  { %v1959_v43 = vshrl.u32 %v8351_v35, %v1950_v8  ;;  %v6120_v33 = vshll.u32 %v1943_v1, 8  ;;  %v1803_v55 = vsub.s32 4294967266, %v6106_v52  ;;  %v1948_v57 = vshrl.u32 %v1947_v61, 5 }
 0x21d   :  { %v1897_v3 = vsub.s32 0, %v6114_v26  ;;  %v1958_v56 = vshll.u32 %v8358_v59, %v1949_v28  ;;  %v8435_v7 = vand.u32 2147483647, %v5584_v58  ;;  %v8436_v50 = vmov 0 }
 0x21e   :  { %vm1625_vm13 = vcmp.lt.s32.totalorder %v5615_v19, 0  ;;  %v1954_v14 = vor.u32 %v1953_v12, %v1952_v63  ;;  %v1957_v6 = vor.u32 %v1956_v45, %v1955_v23  ;;  %v1961_v1 = vshll.u32 %v8351_v35, %v1949_v28 }
 0x21f   :  { %vm6127_vm14 = vcmp.le.f32.partialorder %v8435_v7, 0.7853982  ;;  %v1962_v37 = vshrl.u32 %v8359_v9, %v1950_v8  ;;  %v4270_v41 = vmin.u32 %v1897_v3, %v6114_v26  ;;  %v1960_v13 = vor.u32 %v1959_v43, %v1958_v56 }
 0x220   :  { %v8437_v50 = vsel %vm6127_vm14, 4294967295, %v8436_v50  ;;  %v4277_v61 = vadd.s32 4294967169, %v2043_v36  ;;  %v2046_v51 = vand.u32 8388607, %v8240_v60  ;;  %v1964_v7 = vshll.u32 %v8359_v9, %v1949_v28  ;;  %v6140_v12 = vpop.eup %4602 }
 0x221   :  { %8438 = vst [vmem:[#allocation53_spill] sm:$0xff] %v8437_v50  ;;  %v1963_v39 = vor.u32 %v1962_v37, %v1961_v1  ;;  %v1965_v11 = vshrl.u32 %v8352_v46, %v1950_v8  ;;  %v2146_v54 = vand.u32 2139095040, %v6098_v10  ;;  %8439 = vst [vmem:[#allocation54_spill] sm:$0xff] %v6140_v12  ;;  %v1799_v45 = vsub.s32 32, %v6106_v52 }
 0x222   :  { %v1899_v63 = vclz %v4270_v41  ;;  %v1951_v23 = vshrl.u32 %v8353_v2, %v1950_v8  ;;  %vm1967_vm6 = vcmp.lt.s32.totalorder %v1948_v57, 1  ;;  %v1804_v43 = vadd.s32 127, %v1803_v55  ;;  %v6144_v56 = vpop.eup %4604 }
 0x223   :  { %v1966_v36 = vor.u32 %v1965_v11, %v1964_v7  ;;  %vm1970_vm5 = vcmp.lt.s32.totalorder %v1948_v57, 4  ;;  %v1975_v3 = vsel %vm1967_vm6, %v1954_v14, %v1957_v6  ;;  %8440 = vst [vmem:[#allocation55_spill] sm:$0xff] %v6144_v56  ;;  %vm1969_vm2 = vcmp.lt.s32.totalorder %v1948_v57, 3 }
 0x224   :  { %v4271_v1 = vadd.s32 4294967294, %v1899_v63  ;;  %v1972_v28 = vsel %vm1970_vm5, %v1960_v13, 2102212464  ;;  %v1976_v37 = vsel %vm1970_vm5, %v1963_v39, 920167782  ;;  %vm1968_vm0 = vcmp.lt.s32.totalorder %v1948_v57, 2  ;;  %v6146_v48 = vpop.eup %4606 }
 0x225   :  { %v1977_v60 = vsel %vm1969_vm2, %v1960_v13, %v1976_v37  ;;  %v1979_v20 = vsel %vm1967_vm6, %v1957_v6, %v1960_v13  ;;  %v1980_v12 = vsel %vm1970_vm5, %v1966_v36, 1326507024  ;;  %8441 = vst [vmem:[#allocation56_spill] sm:$0xff] %v6146_v48  ;;  %v1971_v41 = vsel %vm1967_vm6, %v1951_v23, %v1954_v14 }
 0x226   :  { %v1978_v8 = vsel %vm1968_vm0, %v1975_v3, %v1977_v60  ;;  %v1981_v38 = vsel %vm1969_vm2, %v1963_v39, %v1980_v12  ;;  %v2049_v55 = vadd.s32 1, %v4277_v61  ;;  %v1973_v11 = vsel %vm1969_vm2, %v1957_v6, %v1972_v28 }
 0x227   :  { %v1982_v7 = vsel %vm1968_vm0, %v1979_v20, %v1981_v38  ;;  %v6151_v56 = vmul.u32.u64.low %v6120_v33, %v1978_v8  ;;  %v6152_v63 = vmul.u32.u64.high %v6120_v33, %v1978_v8, %v6151_v56  ;;  %v6158_v13 = vsel %vm6127_vm14, %v5584_v58, %v1604_v15 }
 0x228   :  { %v6163_v14 = vsel %vm1625_vm13, %v1709_v32, %v5920_v30  ;;  %vm4272_vm6 = vcmp.lt.s32.totalorder %v4271_v1, 0  ;;  %v2047_v39 = vor.u32 8388608, %v2046_v51  ;;  %v1801_v60 = vshrl.u32 %v1783_v21, %v1799_v45 }
 0x229   :  { %v1805_v6 = vshll.u32 %v1804_v43, 23  ;;  %v6166_v38 = vmul.u32.u64.low %v6120_v33, %v1982_v7  ;;  %v6167_v20 = vmul.u32.u64.high %v6120_v33, %v1982_v7, %v6166_v38  ;;  %v1974_v12 = vsel %vm1968_vm0, %v1971_v41, %v1973_v11 }
 0x22a   :  { %vm2050_vm5 = vcmp.gt.s32.totalorder %v2049_v55, 0  ;;  %v2147_v15 = vshrl.u32 %v2146_v54, 23  ;;  %v1800_v23 = vshll.u32 %v6056_v62, %v6106_v52  ;;  %v6173_v36 = vsel %vm4272_vm6, 0, %v4271_v1 }
 0x22b   :  { %v1993_v30 = vadd.s32 1, %v6152_v63  ;;  %v2051_v51 = vsel %vm2050_vm5, %v2049_v55, 0  ;;  %v1887_v32 = vadd.s32 %v6051_v17, %v6060_v44  ;;  %v6178_v45 = vshll.u32 %v2047_v39, 8 }
 0x22c   :  { %v2053_v21 = vand.u32 31, %v2051_v51  ;;  %v1802_v57 = vor.u32 %v1801_v60, %v1800_v23  ;;  %v1806_v3 = vor.u32 4788187, %v1805_v6  ;;  %v1990_v54 = vmul.u32 %v6120_v33, %v1974_v12 }
 0x22d   :  { %vm1992_vm0 = vc.u32 %v6167_v20, %v6151_v56  ;;  %v1903_v62 = vsub.s32 32, %v6173_v36  ;;  %v1907_v52 = vsub.s32 4294967266, %v6173_v36  ;;  %v2052_v44 = vshrl.u32 %v2051_v51, 5 }
 0x22e   :  { %v1994_v1 = vsel %vm1992_vm0, %v1993_v30, %v6152_v63  ;;  %v2054_v28 = vsub.s32 32, %v2053_v21  ;;  %v2056_v37 = vshll.u32 %v8353_v2, %v2053_v21  ;;  %v4281_v41 = vadd.s32 4294967169, %v2147_v15 }
 0x22f   :  { %v1995_v17 = vadd.s32 %v1994_v1, %v1990_v54  ;;  %v2059_v55 = vshll.u32 %v8356_v22, %v2053_v21  ;;  %v2062_v11 = vshll.u32 %v8358_v59, %v2053_v21  ;;  %v2065_v60 = vshll.u32 %v8351_v35, %v2053_v21 }
 0x230   :  { %v2057_v8 = vshrl.u32 %v8356_v22, %v2054_v28  ;;  %v2060_v33 = vshrl.u32 %v8358_v59, %v2054_v28  ;;  %v2063_v39 = vshrl.u32 %v8351_v35, %v2054_v28  ;;  %v2066_v63 = vshrl.u32 %v8359_v9, %v2054_v28 }
 0x231   :  { %v1996_v7 = vadd.s32 536870912, %v1995_v17  ;;  %v1809_v6 = vcvt.s32.f32 %v1802_v57  ;;  %v2068_v15 = vshll.u32 %v8359_v9, %v2053_v21  ;;  %v2069_v54 = vshrl.u32 %v8352_v46, %v2054_v28 }
 0x232   :  { %v2058_v38 = vor.u32 %v2057_v8, %v2056_v37  ;;  %v2061_v12 = vor.u32 %v2060_v33, %v2059_v55  ;;  %v2064_v30 = vor.u32 %v2063_v39, %v2062_v11  ;;  %v2067_v51 = vor.u32 %v2066_v63, %v2065_v60 }
 0x233   :  { %v6196_v23 = vshrl.u32 %v1996_v7, 30  ;;  %v1807_v1 = vand.u32 2147483647, %v1806_v3  ;;  %v1905_v61 = vshrl.u32 %v1887_v32, %v1903_v62  ;;  %v1908_v43 = vadd.s32 127, %v1907_v52 }
 0x234   :  { %v2153_v50 = vadd.s32 1, %v4281_v41  ;;  %v8443_v58 = vand.u32 2147483647, %v5615_v19  ;;  %v2070_v37 = vor.u32 %v2069_v54, %v2068_v15  ;;  %vm2071_vm6 = vcmp.lt.s32.totalorder %v2052_v44, 1 }
 0x235   :  { %8442 = vst [vmem:[#allocation57_spill] sm:$0xff] %v6196_v23  ;;  %v1998_v57 = vshll.u32 %v6196_v23, 30  ;;  %vm2074_vm5 = vcmp.lt.s32.totalorder %v2052_v44, 4  ;;  %v2055_v21 = vshrl.u32 %v8353_v2, %v2054_v28  ;;  %vm2073_vm0 = vcmp.lt.s32.totalorder %v2052_v44, 3 }
 0x236   :  { %vm6201_vm2 = vcmp.le.f32.partialorder %v8443_v58, 0.7853982  ;;  %v2079_v8 = vsel %vm2071_vm6, %v2058_v38, %v2061_v12  ;;  %v2080_v32 = vsel %vm2074_vm5, %v2067_v51, 920167782  ;;  %vm2072_vm4 = vcmp.lt.s32.totalorder %v2052_v44, 2 }
 0x237   :  { %v6209_v3 = vsub.s32 %v1995_v17, %v1998_v57  ;;  %v2076_v58 = vsel %vm2074_vm5, %v2064_v30, 2102212464  ;;  %v2081_v62 = vsel %vm2073_vm0, %v2064_v30, %v2080_v32  ;;  %v6213_v52 = vmul.f32 %v1809_v6, %v1807_v1 }
 0x238   :  { %v1909_v41 = vshll.u32 %v1908_v43, 23  ;;  %v2082_v55 = vsel %vm2072_vm4, %v2079_v8, %v2081_v62  ;;  %v2083_v33 = vsel %vm2071_vm6, %v2061_v12, %v2064_v30  ;;  %v1904_v28 = vshll.u32 %v6114_v26, %v6173_v36  ;;  %v232_v62 = vpop.f32.mrf.mxu0 }
 0x239   :  { %v2001_v11 = vsub.s32 0, %v6209_v3  ;;  %v2075_v17 = vsel %vm2071_vm6, %v2055_v21, %v2058_v38  ;;  %v2084_v7 = vsel %vm2074_vm5, %v2070_v37, 1326507024  ;;  %v2077_v39 = vsel %vm2073_vm0, %v2061_v12, %v2076_v58 }
 0x23a   :  { %v2085_v60 = vsel %vm2073_vm0, %v2067_v51, %v2084_v7  ;;  %v6225_v63 = vmul.u32.u64.low %v6178_v45, %v2082_v55  ;;  %v6226_v43 = vmul.u32.u64.high %v6178_v45, %v2082_v55, %v6225_v63  ;;  %v1906_v6 = vor.u32 %v1905_v61, %v1904_v28 }
 0x23b   :  { %v4274_v15 = vmin.u32 %v2001_v11, %v6209_v3  ;;  %v2086_v26 = vsel %vm2072_vm4, %v2083_v33, %v2085_v60  ;;  %vm2154_vm8 = vcmp.gt.s32.totalorder %v2153_v50, 0  ;;  %v1910_v36 = vor.u32 4788187, %v1909_v41 }
 0x23c   :  { %v6232_v38 = vmul.u32.u64.low %v6178_v45, %v2086_v26  ;;  %v6233_v30 = vmul.u32.u64.high %v6178_v45, %v2086_v26, %v6232_v38  ;;  %v2155_v54 = vsel %vm2154_vm8, %v2153_v50, 0  ;;  %v2078_v51 = vsel %vm2072_vm4, %v2075_v17, %v2077_v39 }
 0x23d   :  { %v2003_v12 = vclz %v4274_v15  ;;  %v8446_v1 = vand.u32 2147483647, %v6098_v10  ;;  %v2157_v37 = vand.u32 31, %v2155_v54  ;;  %v8447_v61 = vsel %vm6035_vm1, 0, %v6006_v16 }
 0x23e   :  { %v6242_v21 = vadd.s32 3, %v8447_v61  ;;  %4608 = vcosq.f32 %v6158_v13  ;;  %v2097_v50 = vadd.s32 1, %v6226_v43  ;;  %v8448_v44 = vxor.u32 2147483648, %v6112_v5 }
 0x23f   :  { %v2150_v57 = vand.u32 8388607, %v8446_v1  ;;  %v1811_v18 = vxor.u32 2147483648, %v6213_v52  ;;  %v4275_v16 = vadd.s32 4294967294, %v2003_v12  ;;  %v2158_v58 = vsub.s32 32, %v2157_v37 }
 0x240   :  { %v6254_v32 = vsel %vm1625_vm13, %v8448_v44, %v6112_v5  ;;  %v1911_v41 = vand.u32 2147483647, %v1910_v36  ;;  %v1913_v55 = vcvt.s32.f32 %v1906_v6  ;;  %v2094_v33 = vmul.u32 %v6178_v45, %v2078_v51 }
 0x241   :  { %vm2096_vm4 = vc.u32 %v6233_v30, %v6225_v63  ;;  %vm4276_vm8 = vcmp.lt.s32.totalorder %v4275_v16, 0  ;;  %v2151_v11 = vor.u32 8388608, %v2150_v57  ;;  %v2161_v17 = vshrl.u32 %v8356_v22, %v2158_v58 }
 0x242   :  { %v2098_v28 = vsel %vm2096_vm4, %v2097_v50, %v6226_v43  ;;  %v6262_v5 = vsel %vm4276_vm8, 0, %v4275_v16  ;;  %v2164_v39 = vshrl.u32 %v8358_v59, %v2158_v58  ;;  %v6266_v60 = vadd.f32 %v232_v62, %v4878_v25 }
 0x243   :  { %v2099_v7 = vadd.s32 %v2098_v28, %v2094_v33  ;;  %v2011_v6 = vsub.s32 4294967266, %v6262_v5  ;;  %v2160_v45 = vshll.u32 %v8353_v2, %v2157_v37  ;;  %v2163_v15 = vshll.u32 %v8356_v22, %v2157_v37 }
 0x244   :  { %8449 = vst [vmem:[#allocation58_spill] sm:$0xff] %v6266_v60  ;;  %v2167_v26 = vshrl.u32 %v8351_v35, %v2158_v58  ;;  %v2156_v36 = vshrl.u32 %v2155_v54, 5  ;;  %v2169_v38 = vshll.u32 %v8351_v35, %v2157_v37  ;;  %v2170_v12 = vshrl.u32 %v8359_v9, %v2158_v58 }
 0x245   :  { %v2100_v43 = vadd.s32 536870912, %v2099_v7  ;;  %v2162_v51 = vor.u32 %v2161_v17, %v2160_v45  ;;  %v2165_v1 = vor.u32 %v2164_v39, %v2163_v15  ;;  %v2166_v57 = vshll.u32 %v8358_v59, %v2157_v37 }
 0x246   :  { %v2173_v61 = vshrl.u32 %v8352_v46, %v2158_v58  ;;  %v1991_v50 = vadd.s32 %v6151_v56, %v6167_v20  ;;  %v2012_v44 = vadd.s32 127, %v2011_v6  ;;  %v2171_v62 = vor.u32 %v2170_v12, %v2169_v38 }
 0x247   :  { %v6278_v16 = vshrl.u32 %v2100_v43, 30  ;;  %v6280_v33 = vmul.f32 %v1913_v55, %v1911_v41  ;;  %v2168_v54 = vor.u32 %v2167_v26, %v2166_v57  ;;  %v2172_v28 = vshll.u32 %v8359_v9, %v2157_v37 }
 0x248   :  { %v6283_v8 = vshll.u32 %v2151_v11, 8  ;;  %vm8269_vm1 = vcmp.lt.s32.totalorder %v5821_v47, 0  ;;  %v2007_v17 = vsub.s32 32, %v6262_v5  ;;  %vm2175_vm13 = vcmp.lt.s32.totalorder %v2156_v36, 1 }
 0x249   :  { %v2102_v39 = vshll.u32 %v6278_v16, 30  ;;  %v2250_v56 = vand.u32 2139095040, %v6266_v60  ;;  %v2159_v20 = vshrl.u32 %v8353_v2, %v2158_v58  ;;  %v2174_v6 = vor.u32 %v2173_v61, %v2172_v28 }
 0x24a   :  { %vm2178_vm6 = vcmp.lt.s32.totalorder %v2156_v36, 4  ;;  %v2183_v41 = vsel %vm2175_vm13, %v2162_v51, %v2165_v1  ;;  %v2013_v55 = vshll.u32 %v2012_v44, 23  ;;  %vm2177_vm5 = vcmp.lt.s32.totalorder %v2156_v36, 3  ;;  %v236_v44 = vpop.f32.mrf.mxu0 }
 0x24b   :  { %v6291_v45 = vsub.s32 %v2099_v7, %v2102_v39  ;;  %v2184_v37 = vsel %vm2178_vm6, %v2171_v62, 920167782  ;;  %v6294_v11 = vpop.eup %4608  ;;  %vm1833_vm0 = vcmp.lt.s32.totalorder %v5901_v29, 0  ;;  %v2008_v15 = vshll.u32 %v6209_v3, %v6262_v5 }
 0x24c   :  { %8450 = vst [vmem:[#allocation59_spill] sm:$0xff] %v6294_v11  ;;  %vm2176_vm4 = vcmp.lt.s32.totalorder %v2156_v36, 2  ;;  %v2180_v58 = vsel %vm2178_vm6, %v2168_v54, 2102212464  ;;  %v2185_v26 = vsel %vm2177_vm5, %v2168_v54, %v2184_v37  ;;  %v8451_v43 = vand.u32 2147483647, %v5821_v47 }
 0x24d   :  { %v8452_v7 = vmov 0  ;;  %v2009_v38 = vshrl.u32 %v1991_v50, %v2007_v17  ;;  %v2105_v12 = vsub.s32 0, %v6291_v45  ;;  %v2186_v57 = vsel %vm2176_vm4, %v2183_v41, %v2185_v26 }
 0x24e   :  { %vm6303_vm8 = vcmp.le.f32.partialorder %v8451_v43, 0.7853982  ;;  %v2187_v61 = vsel %vm2175_vm13, %v2165_v1, %v2168_v54  ;;  %v2179_v3 = vsel %vm2175_vm13, %v2159_v20, %v2162_v51  ;;  %v2188_v5 = vsel %vm2178_vm6, %v2174_v6, 1326507024 }
 0x24f   :  { %v8453_v7 = vsel %vm6303_vm8, 4294967295, %v8452_v7  ;;  %v6313_v28 = vmul.u32.u64.low %v6283_v8, %v2186_v57  ;;  %v6314_v39 = vmul.u32.u64.high %v6283_v8, %v2186_v57, %v6313_v28  ;;  %v2014_v37 = vor.u32 4788187, %v2013_v55 }
 0x250   :  { %8454 = vst [vmem:[#allocation60_spill] sm:$0xff] %v8453_v7  ;;  %v4278_v43 = vmin.u32 %v2105_v12, %v6291_v45  ;;  %v2181_v50 = vsel %vm2177_vm5, %v2165_v1, %v2180_v58  ;;  %v2189_v17 = vsel %vm2177_vm5, %v2171_v62, %v2188_v5  ;;  %v8455_v41 = vand.u32 2147483647, %v5901_v29 }
 0x251   :  { %v1917_v51 = vsub.s32 4, %v6094_v4  ;;  %v2190_v20 = vsel %vm2176_vm4, %v2187_v61, %v2189_v17  ;;  %v2251_v6 = vshrl.u32 %v2250_v56, 23  ;;  %v6329_v26 = vadd.f32 %v236_v44, %v4876_v24 }
 0x252   :  { %vm6322_vm10 = vcmp.le.f32.partialorder %v8455_v41, 0.7853982  ;;  %v2010_v55 = vor.u32 %v2009_v38, %v2008_v15  ;;  %v2107_v12 = vclz %v4278_v43  ;;  %v1812_v62 = vsel %vm8269_vm1, %v1811_v18, %v6213_v52 }
 0x253   :  { %8458 = vst [vmem:[#allocation61_spill] sm:$0xff] %v6329_v26  ;;  %v6332_v1 = vmul.u32.u64.low %v6283_v8, %v2190_v20  ;;  %v6333_v58 = vmul.u32.u64.high %v6283_v8, %v2190_v20, %v6332_v1  ;;  %v2182_v57 = vsel %vm2176_vm4, %v2179_v3, %v2181_v50  ;;  %v2201_v61 = vadd.s32 1, %v6314_v39 }
 0x254   :  { %v4285_v56 = vadd.s32 4294967169, %v2251_v6  ;;  %v1915_v44 = vxor.u32 2147483648, %v6280_v33  ;;  %v2015_v5 = vand.u32 2147483647, %v2014_v37  ;;  %v4279_v15 = vadd.s32 4294967294, %v2107_v12 }
 0x255   :  { %v8251_v38 = vand.u32 2147483647, %v6266_v60  ;;  %4610 = vsinq.f32 %v6158_v13  ;;  %v1711_v43 = vsel %vm6201_vm2, %v5615_v19, %v6254_v32  ;;  %v2354_v52 = vand.u32 2139095040, %v6329_v26 }
 0x256   :  { %v2257_v17 = vadd.s32 1, %v4285_v56  ;;  %v6353_v18 = vsel %vm1833_vm0, %v1917_v51, %v6094_v4  ;;  %v2017_v36 = vcvt.s32.f32 %v2010_v55  ;;  %v2198_v3 = vmul.u32 %v6283_v8, %v2182_v57 }
 0x257   :  { %vm2200_vm13 = vc.u32 %v6333_v58, %v6313_v28  ;;  %v6361_v13 = vsel %vm6303_vm8, %v5821_v47, %v1812_v62  ;;  %vm4280_vm6 = vcmp.lt.s32.totalorder %v4279_v15, 0  ;;  %v1916_v4 = vsel %vm1833_vm0, %v1915_v44, %v6280_v33 }
 0x258   :  { %v2202_v32 = vsel %vm2200_vm13, %v2201_v61, %v6314_v39  ;;  %vm2258_vm5 = vcmp.gt.s32.totalorder %v2257_v17, 0  ;;  %v6367_v37 = vmul.f32 %v2017_v36, %v2015_v5  ;;  %v2254_v8 = vand.u32 8388607, %v8251_v38 }
 0x259   :  { %v2203_v50 = vadd.s32 %v2202_v32, %v2198_v3  ;;  %4612 = vcosq.f32 %v1711_v43  ;;  %v8459_v41 = vsel %vm6201_vm2, 0, %v6163_v14  ;;  %v2259_v20 = vsel %vm2258_vm5, %v2257_v17, 0 }
 0x25a   :  { %v6375_v51 = vadd.s32 3, %v8459_v41  ;;  %v2355_v39 = vshrl.u32 %v2354_v52, 23  ;;  %4614 = vsinq.f32 %v1711_v43  ;;  %v6380_v6 = vsel %vm4280_vm6, 0, %v4279_v15 }
 0x25b   :  { %v2204_v55 = vadd.s32 536870912, %v2203_v50  ;;  %4616 = vcosq.f32 %v6361_v13  ;;  %v6386_v48 = vsel %vm6322_vm10, %v5901_v29, %v1916_v4  ;;  %v2095_v14 = vadd.s32 %v6225_v63, %v6233_v30 }
 0x25c   :  { %v2261_v12 = vand.u32 31, %v2259_v20  ;;  %v2255_v57 = vor.u32 8388608, %v2254_v8  ;;  %v2111_v56 = vsub.s32 32, %v6380_v6  ;;  %v2115_v44 = vsub.s32 4294967266, %v6380_v6 }
 0x25d   :  { %v6391_v62 = vshrl.u32 %v2204_v55, 30  ;;  %v4289_v15 = vadd.s32 4294967169, %v2355_v39  ;;  %v6397_v17 = vshrl.u32 %v2259_v20, 5  ;;  %vm8261_vm0 = vcmp.lt.s32.totalorder %v5927_v0, 0 }
 0x25e   :  { %v2262_v5 = vsub.s32 32, %v2261_v12  ;;  %v2264_v63 = vshll.u32 %v8353_v2, %v2261_v12  ;;  %v2267_v30 = vshll.u32 %v8356_v22, %v2261_v12  ;;  %v2270_v3 = vshll.u32 %v8358_v59, %v2261_v12 }
 0x25f   :  { %8460 = vst [vmem:[#allocation62_spill] sm:$0xff] %v6391_v62  ;;  %v2206_v43 = vshll.u32 %v6391_v62, 30  ;;  %v2273_v8 = vshll.u32 %v8351_v35, %v2261_v12  ;;  %v2276_v20 = vshll.u32 %v8359_v9, %v2261_v12  ;;  %v2113_v33 = vshrl.u32 %v2095_v14, %v2111_v56 }
 0x260   :  { %v2265_v52 = vshrl.u32 %v8356_v22, %v2262_v5  ;;  %v2268_v36 = vshrl.u32 %v8358_v59, %v2262_v5  ;;  %v2271_v32 = vshrl.u32 %v8351_v35, %v2262_v5  ;;  %v2274_v41 = vshrl.u32 %v8359_v9, %v2262_v5 }
 0x261   :  { %v6405_v4 = vsub.s32 %v2203_v50, %v2206_v43  ;;  %v2277_v61 = vshrl.u32 %v8352_v46, %v2262_v5  ;;  %v6414_v7 = vshll.u32 %v2255_v57, 8  ;;  %v2116_v50 = vadd.s32 127, %v2115_v44 }
 0x262   :  { %v2266_v39 = vor.u32 %v2265_v52, %v2264_v63  ;;  %v2269_v55 = vor.u32 %v2268_v36, %v2267_v30  ;;  %v2272_v38 = vor.u32 %v2271_v32, %v2270_v3  ;;  %v6411_v1 = vpop.eup %4610  ;;  %v2275_v23 = vor.u32 %v2274_v41, %v2273_v8 }
 0x263   :  { %8461 = vst [vmem:[#allocation63_spill] sm:$0xff] %v6411_v1  ;;  %v2209_v62 = vsub.s32 0, %v6405_v4  ;;  %v2278_v43 = vor.u32 %v2277_v61, %v2276_v20  ;;  %vm2279_vm2 = vcmp.lt.s32.totalorder %v6397_v17, 1  ;;  %v2361_v47 = vadd.s32 1, %v4289_v15 }
 0x264   :  { %v2263_v63 = vshrl.u32 %v8353_v2, %v2262_v5  ;;  %vm2282_vm4 = vcmp.lt.s32.totalorder %v6397_v17, 4  ;;  %v2287_v14 = vsel %vm2279_vm2, %v2266_v39, %v2269_v55  ;;  %vm2281_vm13 = vcmp.lt.s32.totalorder %v6397_v17, 3 }
 0x265   :  { %v4282_v12 = vmin.u32 %v2209_v62, %v6405_v4  ;;  %v2288_v57 = vsel %vm2282_vm4, %v2275_v23, 920167782  ;;  %v2291_v61 = vsel %vm2279_vm2, %v2269_v55, %v2272_v38  ;;  %v2292_v56 = vsel %vm2282_vm4, %v2278_v43, 1326507024 }
 0x266   :  { %v6426_v44 = vpop.eup %4612  ;;  %vm2280_vm6 = vcmp.lt.s32.totalorder %v6397_v17, 2  ;;  %v2284_v62 = vsel %vm2282_vm4, %v2272_v38, 2102212464  ;;  %v2289_v5 = vsel %vm2281_vm13, %v2272_v38, %v2288_v57  ;;  %v2112_v52 = vshll.u32 %v6291_v45, %v6380_v6 }
 0x267   :  { %v2211_v15 = vclz %v4282_v12  ;;  %v6431_v30 = vpop.eup %4614  ;;  %v2117_v36 = vshll.u32 %v2116_v50, 23  ;;  %v2290_v3 = vsel %vm2280_vm6, %v2287_v14, %v2289_v5  ;;  %v2293_v32 = vsel %vm2281_vm13, %v2275_v23, %v2292_v56 }
 0x268   :  { %v6439_v8 = vpop.eup %4616  ;;  %v2283_v20 = vsel %vm2279_vm2, %v2263_v63, %v2266_v39  ;;  %v2294_v38 = vsel %vm2280_vm6, %v2291_v61, %v2293_v32  ;;  %vm2362_vm5 = vcmp.gt.s32.totalorder %v2361_v47, 0  ;;  %v2285_v45 = vsel %vm2281_vm13, %v2269_v55, %v2284_v62  ;;  %v238_v61 = vpop.f32.mrf.mxu0 }
 0x269   :  { %8462 = vst [vmem:[#allocation64_spill] sm:$0xff] %v6439_v8  ;;  %v4283_v41 = vadd.s32 4294967294, %v2211_v15  ;;  %v6448_v6 = vmul.u32.u64.low %v6414_v7, %v2294_v38  ;;  %v6449_v50 = vmul.u32.u64.high %v6414_v7, %v2294_v38, %v6448_v6  ;;  %v2363_v43 = vsel %vm2362_vm5, %v2361_v47, 0 }
 0x26a   :  { %v2114_v12 = vor.u32 %v2113_v33, %v2112_v52  ;;  %v6452_v23 = vmul.u32.u64.low %v6414_v7, %v2290_v3  ;;  %v6453_v14 = vmul.u32.u64.high %v6414_v7, %v2290_v3, %v6452_v23  ;;  %4618 = vsinq.f32 %v6361_v13 }
 0x26b   :  { %vm4284_vm4 = vcmp.lt.s32.totalorder %v4283_v41, 0  ;;  %v2118_v39 = vor.u32 4788187, %v2117_v36  ;;  %v2365_v57 = vand.u32 31, %v2363_v43  ;;  %4620 = vcosq.f32 %v6386_v48 }
 0x26c   :  { %v6457_v63 = vsel %vm4284_vm4, 0, %v4283_v41  ;;  %v8463_v47 = vsel %vm6322_vm10, 0, %v6353_v18  ;;  %v2286_v56 = vsel %vm2280_vm6, %v2283_v20, %v2285_v45  ;;  %v8464_v13 = vxor.u32 2147483648, %v6367_v37 }
 0x26d   :  { %v6464_v33 = vadd.s32 3, %v8463_v47  ;;  %v2219_v62 = vsub.s32 4294967266, %v6457_v63  ;;  %vm2304_vm2 = vc.u32 %v6449_v50, %v6452_v23  ;;  %v2366_v54 = vsub.s32 32, %v2365_v57 }
 0x26e   :  { %v6474_v15 = vsel %vm8261_vm0, %v8464_v13, %v6367_v37  ;;  %v2121_v18 = vcvt.s32.f32 %v2114_v12  ;;  %v2305_v5 = vadd.s32 1, %v6453_v14  ;;  %v8465_v52 = vand.u32 2147483647, %v6329_v26 }
 0x26f   :  { %v6483_v36 = vadd.f32 %v238_v61, %v4878_v25  ;;  %v2119_v3 = vand.u32 2147483647, %v2118_v39  ;;  %v2302_v32 = vmul.u32 %v6414_v7, %v2286_v56  ;;  %v2369_v37 = vshrl.u32 %v8356_v22, %v2366_v54 }
 0x270   :  { %v2358_v17 = vand.u32 8388607, %v8465_v52  ;;  %v2372_v41 = vshrl.u32 %v8358_v59, %v2366_v54  ;;  %v2306_v20 = vsel %vm2304_vm2, %v2305_v5, %v6453_v14  ;;  %v2368_v38 = vshll.u32 %v8353_v2, %v2365_v57 }
 0x271   :  { %8466 = vst [vmem:[#allocation65_spill] sm:$0xff] %v6483_v36  ;;  %v2371_v45 = vshll.u32 %v8356_v22, %v2365_v57  ;;  %v2375_v6 = vshrl.u32 %v8351_v35, %v2366_v54  ;;  %v2220_v12 = vadd.s32 127, %v2219_v62  ;;  %v2307_v47 = vadd.s32 %v2306_v20, %v2302_v32 }
 0x272   :  { %v6492_v13 = vshrl.u32 %v2363_v43, 5  ;;  %v2374_v39 = vshll.u32 %v8358_v59, %v2365_v57  ;;  %v2370_v61 = vor.u32 %v2369_v37, %v2368_v38  ;;  %v2377_v56 = vshll.u32 %v8351_v35, %v2365_v57 }
 0x273   :  { %v2373_v7 = vor.u32 %v2372_v41, %v2371_v45  ;;  %v2378_v52 = vshrl.u32 %v8359_v9, %v2366_v54  ;;  %v2308_v55 = vadd.s32 536870912, %v2307_v47  ;;  %v2380_v5 = vshll.u32 %v8359_v9, %v2365_v57 }
 0x274   :  { %v2376_v14 = vor.u32 %v2375_v6, %v2374_v39  ;;  %v2381_v8 = vshrl.u32 %v8352_v46, %v2366_v54  ;;  %v2122_v11 = vmul.f32 %v2121_v18, %v2119_v3  ;;  %v2199_v62 = vadd.s32 %v6313_v28, %v6333_v58 }
 0x275   :  { %v2215_v43 = vsub.s32 32, %v6457_v63  ;;  %v2379_v32 = vor.u32 %v2378_v52, %v2377_v56  ;;  %v8467_v37 = vand.u32 2147483647, %v5927_v0  ;;  %v8468_v41 = vmov 0 }
 0x276   :  { %vm2041_vm13 = vcmp.lt.s32.totalorder %v6083_v34, 0  ;;  %v6509_v20 = vshrl.u32 %v2308_v55, 30  ;;  %v2359_v57 = vor.u32 8388608, %v2358_v17  ;;  %v2382_v38 = vor.u32 %v2381_v8, %v2380_v5 }
 0x277   :  { %vm6504_vm10 = vcmp.le.f32.partialorder %v8467_v37, 0.7853982  ;;  %vm2386_vm6 = vcmp.lt.s32.totalorder %v6492_v13, 4  ;;  %vm2383_vm5 = vcmp.lt.s32.totalorder %v6492_v13, 1  ;;  %vm2385_vm4 = vcmp.lt.s32.totalorder %v6492_v13, 3  ;;  %v6522_v17 = vpop.eup %4618 }
 0x278   :  { %v8469_v41 = vsel %vm6504_vm10, 4294967295, %v8468_v41  ;;  %v2392_v28 = vsel %vm2386_vm6, %v2379_v32, 920167782  ;;  %v2221_v18 = vshll.u32 %v2220_v12, 23  ;;  %v2310_v3 = vshll.u32 %v6509_v20, 30  ;;  %8471 = vst [vmem:[#allocation67_spill] sm:$0xff] %v6522_v17  ;;  %v6534_v5 = vpop.eup %4620 }
 0x279   :  { %8470 = vst [vmem:[#allocation66_spill] sm:$0xff] %v8469_v41  ;;  %v2391_v55 = vsel %vm2383_vm5, %v2370_v61, %v2373_v7  ;;  %v2393_v8 = vsel %vm2385_vm4, %v2376_v14, %v2392_v28  ;;  %v8472_v45 = vand.u32 2147483647, %v6083_v34  ;;  %v2123_v39 = vxor.u32 2147483648, %v2122_v11  ;;  %8475 = vst [vmem:[#allocation68_spill] sm:$0xff] %v6534_v5 }
 0x27a   :  { %v2217_v56 = vshrl.u32 %v2199_v62, %v2215_v43  ;;  %v2395_v12 = vsel %vm2383_vm5, %v2373_v7, %v2376_v14  ;;  %v2396_v52 = vsel %vm2386_vm6, %v2382_v38, 1326507024  ;;  %v6536_v37 = vsub.s32 %v2307_v47, %v2310_v3 }
 0x27b   :  { %vm6526_vm2 = vcmp.le.f32.partialorder %v8472_v45, 0.7853982  ;;  %vm2384_vm0 = vcmp.lt.s32.totalorder %v6492_v13, 2  ;;  %v2388_v28 = vsel %vm2386_vm6, %v2376_v14, 2102212464  ;;  %v2397_v45 = vsel %vm2385_vm4, %v2379_v32, %v2396_v52 }
 0x27c   :  { %v2367_v62 = vshrl.u32 %v8353_v2, %v2366_v54  ;;  %v2394_v43 = vsel %vm2384_vm0, %v2391_v55, %v2393_v8  ;;  %v2398_v38 = vsel %vm2384_vm0, %v2395_v12, %v2397_v45  ;;  %v2399_v58 = vshll.u32 %v2359_v57, 8 }
 0x27d   :  { %v2216_v47 = vshll.u32 %v6405_v4, %v6457_v63  ;;  %v2222_v3 = vor.u32 4788187, %v2221_v18  ;;  %v2313_v17 = vsub.s32 0, %v6536_v37  ;;  %v2458_v14 = vand.u32 2139095040, %v6483_v36  ;;  %v242_v4 = vpop.f32.mrf.mxu0 }
 0x27e   :  { %v2387_v32 = vsel %vm2383_vm5, %v2367_v62, %v2370_v61  ;;  %v2389_v54 = vsel %vm2385_vm4, %v2373_v7, %v2388_v28  ;;  %v6556_v52 = vmul.u32.u64.low %v2399_v58, %v2398_v38  ;;  %v6557_v55 = vmul.u32.u64.high %v2399_v58, %v2398_v38, %v6556_v52 }
 0x27f   :  { %v2218_v8 = vor.u32 %v2217_v56, %v2216_v47  ;;  %v4286_v57 = vmin.u32 %v2313_v17, %v6536_v37  ;;  %v6560_v12 = vmul.u32.u64.low %v2399_v58, %v2394_v43  ;;  %v6561_v45 = vmul.u32.u64.high %v2399_v58, %v2394_v43, %v6560_v12 }
 0x280   :  { %v2023_v63 = vsel %vm6504_vm10, %v5927_v0, %v6474_v15  ;;  %v2124_v61 = vsel %vm2041_vm13, %v2123_v39, %v2122_v11  ;;  %v8476_v7 = vsub.s32 4, %v6278_v16  ;;  %v2459_v17 = vshrl.u32 %v2458_v14, 23 }
 0x281   :  { %v2223_v56 = vand.u32 2147483647, %v2222_v3  ;;  %v2315_v28 = vclz %v4286_v57  ;;  %v2390_v62 = vsel %vm2384_vm0, %v2387_v32, %v2389_v54  ;;  %v8477_v43 = vand.u32 2147483647, %v6483_v36 }
 0x282   :  { %v2126_v18 = vsel %vm2041_vm13, %v8476_v7, %v6278_v16  ;;  %4622 = vsinq.f32 %v6386_v48  ;;  %vm2408_vm6 = vc.u32 %v6557_v55, %v6560_v12  ;;  %v4293_v11 = vadd.s32 4294967169, %v2459_v17 }
 0x283   :  { %v2462_v38 = vand.u32 8388607, %v8477_v43  ;;  %v6583_v15 = vadd.f32 %v242_v4, %v4876_v24  ;;  %v2128_v16 = vsel %vm6526_vm2, 0, %v2126_v18  ;;  %v2225_v39 = vcvt.s32.f32 %v2218_v8 }
 0x284   :  { %v4287_v47 = vadd.s32 4294967294, %v2315_v28  ;;  %v2409_v13 = vadd.s32 1, %v6561_v45  ;;  %4624 = vcosq.f32 %v2023_v63  ;;  %v6591_v3 = vsel %vm6526_vm2, %v6083_v34, %v2124_v61 }
 0x285   :  { %8478 = vst [vmem:[#allocation69_spill] sm:$0xff] %v6583_v15  ;;  %v2406_v48 = vmul.u32 %v2399_v58, %v2390_v62  ;;  %v2465_v14 = vadd.s32 1, %v4293_v11  ;;  %v6593_v32 = vmul.f32 %v2225_v39, %v2223_v56  ;;  %v2463_v52 = vor.u32 8388608, %v2462_v38 }
 0x286   :  { %vm4288_vm0 = vcmp.lt.s32.totalorder %v4287_v47, 0  ;;  %v2410_v54 = vsel %vm2408_vm6, %v2409_v13, %v6561_v45  ;;  %v2562_v8 = vand.u32 2139095040, %v6583_v15  ;;  %4626 = vsinq.f32 %v2023_v63 }
 0x287   :  { %v2318_v57 = vsel %vm4288_vm0, 0, %v4287_v47  ;;  %v2411_v4 = vadd.s32 %v2410_v54, %v2406_v48  ;;  %vm2466_vm13 = vcmp.gt.s32.totalorder %v2465_v14, 0  ;;  %v6597_v7 = vadd.s32 3, %v2128_v16 }
 0x288   :  { %v2323_v18 = vsub.s32 4294967266, %v2318_v57  ;;  %v2467_v6 = vsel %vm2466_vm13, %v2465_v14, 0  ;;  %4628 = vcosq.f32 %v6591_v3  ;;  %v2303_v58 = vadd.s32 %v6452_v23, %v6449_v50 }
 0x289   :  { %8479 = vst [vmem:[#allocation70_spill] sm:$0xff] %v6597_v7  ;;  %v2412_v61 = vadd.s32 536870912, %v2411_v4  ;;  %v2469_v17 = vand.u32 31, %v2467_v6  ;;  %v6603_v28 = vshll.u32 %v2463_v52, 8  ;;  %v2319_v43 = vsub.s32 32, %v2318_v57 }
 0x28a   :  { %v2324_v56 = vadd.s32 127, %v2323_v18  ;;  %v2563_v11 = vshrl.u32 %v2562_v8, 23  ;;  %v2320_v16 = vshll.u32 %v6536_v37, %v2318_v57  ;;  %v6609_v39 = vshrl.u32 %v2467_v6, 5 }
 0x28b   :  { %v6606_v63 = vshrl.u32 %v2412_v61, 30  ;;  %v2470_v38 = vsub.s32 32, %v2469_v17  ;;  %v2472_v50 = vshll.u32 %v8353_v2, %v2469_v17  ;;  %v2475_v23 = vshll.u32 %v8356_v22, %v2469_v17 }
 0x28c   :  { %v2325_v47 = vshll.u32 %v2324_v56, 23  ;;  %v2478_v54 = vshll.u32 %v8358_v59, %v2469_v17  ;;  %v2481_v8 = vshll.u32 %v8351_v35, %v2469_v17  ;;  %v2321_v57 = vshrl.u32 %v2303_v58, %v2319_v43 }
 0x28d   :  { %8480 = vst [vmem:[#allocation71_spill] sm:$0xff] %v6606_v63  ;;  %v2414_v13 = vshll.u32 %v6606_v63, 30  ;;  %v2473_v48 = vshrl.u32 %v8356_v22, %v2470_v38  ;;  %v2476_v14 = vshrl.u32 %v8358_v59, %v2470_v38  ;;  %v2479_v52 = vshrl.u32 %v8351_v35, %v2470_v38 }
 0x28e   :  { %v2482_v37 = vshrl.u32 %v8359_v9, %v2470_v38  ;;  %vm8287_vm5 = vcmp.lt.s32.totalorder %v6098_v10, 0  ;;  %v2484_v63 = vshll.u32 %v8359_v9, %v2469_v17  ;;  %v2485_v41 = vshrl.u32 %v8352_v46, %v2470_v38 }
 0x28f   :  { %v6620_v18 = vsub.s32 %v2411_v4, %v2414_v13  ;;  %v2474_v6 = vor.u32 %v2473_v48, %v2472_v50  ;;  %v2477_v61 = vor.u32 %v2476_v14, %v2475_v23  ;;  %v6622_v56 = vpop.eup %4622  ;;  %v2480_v62 = vor.u32 %v2479_v52, %v2478_v54 }
 0x290   :  { %8481 = vst [vmem:[#allocation72_spill] sm:$0xff] %v6622_v56  ;;  %v2483_v45 = vor.u32 %v2482_v37, %v2481_v8  ;;  %v2326_v0 = vor.u32 4788187, %v2325_v47  ;;  %v2471_v7 = vshrl.u32 %v8353_v2, %v2470_v38  ;;  %v4297_v58 = vadd.s32 4294967169, %v2563_v11 }
 0x291   :  { %v2417_v34 = vsub.s32 0, %v6620_v18  ;;  %v6629_v4 = vpop.eup %4624  ;;  %v2486_v43 = vor.u32 %v2485_v41, %v2484_v63  ;;  %vm2487_vm4 = vcmp.lt.s32.totalorder %v6609_v39, 1  ;;  %vm2489_vm2 = vcmp.lt.s32.totalorder %v6609_v39, 3 }
 0x292   :  { %8482 = vst [vmem:[#allocation73_spill] sm:$0xff] %v6629_v4  ;;  %vm2490_vm6 = vcmp.lt.s32.totalorder %v6609_v39, 4  ;;  %vm2249_vm0 = vcmp.lt.s32.totalorder %v6266_v60, 0  ;;  %v2495_v23 = vsel %vm2487_vm4, %v2474_v6, %v2477_v61  ;;  %v8483_v13 = vand.u32 2147483647, %v6098_v10 }
 0x293   :  { %v4290_v17 = vmin.u32 %v2417_v34, %v6620_v18  ;;  %v2492_v50 = vsel %vm2490_vm6, %v2480_v62, 2102212464  ;;  %v2496_v47 = vsel %vm2490_vm6, %v2483_v45, 920167782  ;;  %v8484_v38 = vmov 0  ;;  %v6645_v48 = vpop.eup %4626 }
 0x294   :  { %vm6638_vm13 = vcmp.le.f32.partialorder %v8483_v13, 0.7853982  ;;  %v2322_v41 = vor.u32 %v2321_v57, %v2320_v16  ;;  %vm2488_vm1 = vcmp.lt.s32.totalorder %v6609_v39, 2  ;;  %v2497_v63 = vsel %vm2489_vm2, %v2480_v62, %v2496_v47  ;;  %8487 = vst [vmem:[#allocation75_spill] sm:$0xff] %v6645_v48 }
 0x295   :  { %v8485_v38 = vsel %vm6638_vm13, 4294967295, %v8484_v38  ;;  %v2499_v11 = vsel %vm2487_vm4, %v2477_v61, %v2480_v62  ;;  %v2419_v14 = vclz %v4290_v17  ;;  %v2491_v34 = vsel %vm2487_vm4, %v2471_v7, %v2474_v6  ;;  %v6649_v8 = vpop.eup %4628  ;;  %v244_v62 = vpop.f32.mrf.mxu0 }
 0x296   :  { %8486 = vst [vmem:[#allocation74_spill] sm:$0xff] %v8485_v38  ;;  %v2498_v54 = vsel %vm2488_vm1, %v2495_v23, %v2497_v63  ;;  %v2500_v52 = vsel %vm2490_vm6, %v2486_v43, 1326507024  ;;  %8488 = vst [vmem:[#allocation76_spill] sm:$0xff] %v6649_v8  ;;  %v2493_v37 = vsel %vm2489_vm2, %v2477_v61, %v2492_v50  ;;  %4630 = vsinq.f32 %v6591_v3 }
 0x297   :  { %v2501_v16 = vsel %vm2489_vm2, %v2483_v45, %v2500_v52  ;;  %v6656_v57 = vmul.u32.u64.low %v6603_v28, %v2498_v54  ;;  %v6657_v47 = vmul.u32.u64.high %v6603_v28, %v2498_v54, %v6656_v57  ;;  %v2327_v7 = vand.u32 2147483647, %v2326_v0 }
 0x298   :  { %v4291_v6 = vadd.s32 4294967294, %v2419_v14  ;;  %v2502_v43 = vsel %vm2488_vm1, %v2499_v11, %v2501_v16  ;;  %v2333_v17 = vsub.s32 4, %v6509_v20  ;;  %v2569_v45 = vadd.s32 1, %v4297_v58  ;;  %v248_v58 = vpop.f32.mrf.mxu0 }
 0x299   :  { %v6665_v61 = vmul.u32.u64.low %v6603_v28, %v2502_v43  ;;  %v6666_v50 = vmul.u32.u64.high %v6603_v28, %v2502_v43, %v6665_v61  ;;  %v8489_v23 = vxor.u32 2147483648, %v6593_v32  ;;  %v2329_v63 = vcvt.s32.f32 %v2322_v41 }
 0x29a   :  { %vm4292_vm4 = vcmp.lt.s32.totalorder %v4291_v6, 0  ;;  %v2494_v0 = vsel %vm2488_vm1, %v2491_v34, %v2493_v37  ;;  %v2513_v11 = vadd.s32 1, %v6657_v47  ;;  %v8490_v14 = vand.u32 2147483647, %v6583_v15 }
 0x29b   :  { %v2228_v13 = vsel %vm8287_vm5, %v8489_v23, %v6593_v32  ;;  %v6675_v3 = vsel %vm4292_vm4, 0, %v4291_v6  ;;  %vm2570_vm2 = vcmp.gt.s32.totalorder %v2569_v45, 0  ;;  %v2330_v52 = vmul.f32 %v2329_v63, %v2327_v7 }
 0x29c   :  { %v2566_v54 = vand.u32 8388607, %v8490_v14  ;;  %v2427_v16 = vsub.s32 4294967266, %v6675_v3  ;;  %v2571_v43 = vsel %vm2570_vm2, %v2569_v45, 0  ;;  %v6682_v32 = vadd.f32 %v244_v62, %v4878_v25 }
 0x29d   :  { %v6687_v39 = vsel %vm2249_vm0, %v2333_v17, %v6509_v20  ;;  %v2510_v41 = vmul.u32 %v6603_v28, %v2494_v0  ;;  %vm2512_vm1 = vc.u32 %v6666_v50, %v6656_v57  ;;  %v2573_v34 = vand.u32 31, %v2571_v43 }
 0x29e   :  { %8491 = vst [vmem:[#allocation77_spill] sm:$0xff] %v6682_v32  ;;  %v6695_v37 = vsel %vm6638_vm13, %v6098_v10, %v2228_v13  ;;  %v2407_v62 = vadd.s32 %v6560_v12, %v6557_v55  ;;  %v2514_v7 = vsel %vm2512_vm1, %v2513_v11, %v6657_v47  ;;  %v6701_v6 = vadd.f32 %v248_v58, %v4876_v24 }
 0x29f   :  { %v2428_v20 = vadd.s32 127, %v2427_v16  ;;  %v2515_v17 = vadd.s32 %v2514_v7, %v2510_v41  ;;  %v2567_v28 = vor.u32 8388608, %v2566_v54  ;;  %v2574_v61 = vsub.s32 32, %v2573_v34 }
 0x2a0   :  { %8492 = vst [vmem:[#allocation78_spill] sm:$0xff] %v6701_v6  ;;  %v2331_v45 = vxor.u32 2147483648, %v2330_v52  ;;  %v2423_v23 = vsub.s32 32, %v6675_v3  ;;  %v2572_v63 = vshrl.u32 %v2571_v43, 5  ;;  %v2666_v0 = vand.u32 2139095040, %v6682_v32 }
 0x2a1   :  { %v2516_v13 = vadd.s32 536870912, %v2515_v17  ;;  %v2576_v14 = vshll.u32 %v8353_v2, %v2573_v34  ;;  %v2577_v55 = vshrl.u32 %v8356_v22, %v2574_v61  ;;  %v2580_v12 = vshrl.u32 %v8358_v59, %v2574_v61 }
 0x2a2   :  { %v2579_v47 = vshll.u32 %v8356_v22, %v2573_v34  ;;  %v2582_v11 = vshll.u32 %v8358_v59, %v2573_v34  ;;  %v2583_v54 = vshrl.u32 %v8351_v35, %v2574_v61  ;;  %v2586_v58 = vshrl.u32 %v8359_v9, %v2574_v61 }
 0x2a3   :  { %v2429_v16 = vshll.u32 %v2428_v20, 23  ;;  %v6712_v41 = vshrl.u32 %v2516_v13, 30  ;;  %v2578_v43 = vor.u32 %v2577_v55, %v2576_v14  ;;  %v2585_v7 = vshll.u32 %v8351_v35, %v2573_v34  ;;  %v6723_v29 = vpop.eup %4630 }
 0x2a4   :  { %v8493_v4 = vand.u32 2147483647, %v6266_v60  ;;  %v2581_v48 = vor.u32 %v2580_v12, %v2579_v47  ;;  %v2584_v10 = vor.u32 %v2583_v54, %v2582_v11  ;;  %v2588_v8 = vshll.u32 %v8359_v9, %v2573_v34  ;;  %8496 = vst [vmem:[#allocation79_spill] sm:$0xff] %v6723_v29 }
 0x2a5   :  { %v2589_v1 = vshrl.u32 %v8352_v46, %v2574_v61  ;;  %v2332_v20 = vsel %vm2249_vm0, %v2331_v45, %v2330_v52  ;;  %v2518_v13 = vshll.u32 %v6712_v41, 30  ;;  %v2587_v14 = vor.u32 %v2586_v58, %v2585_v7 }
 0x2a6   :  { %vm6717_vm6 = vcmp.le.f32.partialorder %v8493_v4, 0.7853982  ;;  %v2424_v4 = vshll.u32 %v6620_v18, %v6675_v3  ;;  %v2425_v19 = vshrl.u32 %v2407_v62, %v2423_v23  ;;  %v2607_v47 = vshll.u32 %v2567_v28, 8 }
 0x2a7   :  { %v2590_v12 = vor.u32 %v2589_v1, %v2588_v8  ;;  %v6731_v11 = vsub.s32 %v2515_v17, %v2518_v13  ;;  %vm2591_vm4 = vcmp.lt.s32.totalorder %v2572_v63, 1  ;;  %vm2594_vm2 = vcmp.lt.s32.totalorder %v2572_v63, 4 }
 0x2a8   :  { %v2667_v34 = vshrl.u32 %v2666_v0, 23  ;;  %v2430_v54 = vor.u32 4788187, %v2429_v16  ;;  %v2575_v29 = vshrl.u32 %v8353_v2, %v2574_v61  ;;  %v2596_v52 = vsel %vm2594_vm2, %v2584_v10, 2102212464 }
 0x2a9   :  { %v2599_v45 = vsel %vm2591_vm4, %v2578_v43, %v2581_v48  ;;  %v2521_v58 = vsub.s32 0, %v6731_v11  ;;  %vm2592_vm0 = vcmp.lt.s32.totalorder %v2572_v63, 2  ;;  %vm2593_vm1 = vcmp.lt.s32.totalorder %v2572_v63, 3 }
 0x2aa   :  { %v2600_v7 = vsel %vm2594_vm2, %v2587_v14, 920167782  ;;  %v2595_v55 = vsel %vm2591_vm4, %v2575_v29, %v2578_v43  ;;  %v2603_v3 = vsel %vm2591_vm4, %v2581_v48, %v2584_v10  ;;  %v2604_v1 = vsel %vm2594_vm2, %v2590_v12, 1326507024 }
 0x2ab   :  { %v2601_v18 = vsel %vm2593_vm1, %v2584_v10, %v2600_v7  ;;  %v4294_v8 = vmin.u32 %v2521_v58, %v6731_v11  ;;  %v2597_v62 = vsel %vm2593_vm1, %v2581_v48, %v2596_v52  ;;  %v2605_v28 = vsel %vm2593_vm1, %v2587_v14, %v2604_v1  ;;  %v250_v14 = vpop.f32.mrf.mxu0 }
 0x2ac   :  { %v2602_v17 = vsel %vm2592_vm0, %v2599_v45, %v2601_v18  ;;  %v2426_v23 = vor.u32 %v2425_v19, %v2424_v4  ;;  %v2606_v61 = vsel %vm2592_vm0, %v2603_v3, %v2605_v28  ;;  %v2336_v29 = vsel %vm6717_vm6, 0, %v6687_v39 }
 0x2ad   :  { %v6738_v0 = vmul.u32.u64.low %v2607_v47, %v2602_v17  ;;  %v6739_v16 = vmul.u32.u64.high %v2607_v47, %v2602_v17, %v6738_v0  ;;  %v2523_v43 = vclz %v4294_v8  ;;  %v2431_v12 = vand.u32 2147483647, %v2430_v54  ;;  %v254_v3 = vpop.f32.mrf.mxu0 }
 0x2ae   :  { %v6745_v10 = vmul.u32.u64.low %v2607_v47, %v2606_v61  ;;  %v6746_v13 = vmul.u32.u64.high %v2607_v47, %v2606_v61, %v6745_v10  ;;  %vm8288_vm4 = vcmp.lt.s32.totalorder %v6483_v36, 0  ;;  %v2598_v48 = vsel %vm2592_vm0, %v2595_v55, %v2597_v62 }
 0x2af   :  { %v4301_v19 = vadd.s32 4294967169, %v2667_v34  ;;  %4632 = vcosq.f32 %v6695_v37  ;;  %v6754_v4 = vsel %vm6717_vm6, %v6266_v60, %v2332_v20  ;;  %v4295_v52 = vadd.s32 4294967294, %v2523_v43 }
 0x2b0   :  { %v8497_v39 = vand.u32 2147483647, %v6682_v32  ;;  %v2433_v58 = vcvt.s32.f32 %v2426_v23  ;;  %v2617_v54 = vadd.s32 1, %v6739_v16  ;;  %v2770_v63 = vand.u32 2139095040, %v6701_v6 }
 0x2b1   :  { %v2673_v7 = vadd.s32 1, %v4301_v19  ;;  %vm4296_vm2 = vcmp.lt.s32.totalorder %v4295_v52, 0  ;;  %v2541_v55 = vsub.s32 4, %v6712_v41  ;;  %v2614_v34 = vmul.u32 %v2607_v47, %v2598_v48 }
 0x2b2   :  { %v2670_v45 = vand.u32 8388607, %v8497_v39  ;;  %vm2616_vm0 = vc.u32 %v6746_v13, %v6738_v0  ;;  %v6763_v38 = vmul.f32 %v2433_v58, %v2431_v12  ;;  %v6765_v20 = vsel %vm4296_vm2, 0, %v4295_v52 }
 0x2b3   :  { %v2618_v18 = vsel %vm2616_vm0, %v2617_v54, %v6739_v16  ;;  %vm2674_vm6 = vcmp.gt.s32.totalorder %v2673_v7, 0  ;;  %v2531_v1 = vsub.s32 4294967266, %v6765_v20  ;;  %v8280_v17 = vand.u32 2147483647, %v6701_v6 }
 0x2b4   :  { %v2619_v8 = vadd.s32 %v2618_v18, %v2614_v34  ;;  %v2671_v62 = vor.u32 8388608, %v2670_v45  ;;  %4634 = vsinq.f32 %v6695_v37  ;;  %v6771_v47 = vadd.s32 3, %v2336_v29 }
 0x2b5   :  { %v2675_v28 = vsel %vm2674_vm6, %v2673_v7, 0  ;;  %v2771_v23 = vshrl.u32 %v2770_v63, 23  ;;  %v2532_v61 = vadd.s32 127, %v2531_v1  ;;  %v6774_v10 = vadd.f32 %v250_v14, %v4878_v25 }
 0x2b6   :  { %8498 = vst [vmem:[#allocation80_spill] sm:$0xff] %v6771_v47  ;;  %v2620_v43 = vadd.s32 536870912, %v2619_v8  ;;  %v6777_v16 = vadd.f32 %v254_v3, %v4876_v24  ;;  %4636 = vcosq.f32 %v6754_v4  ;;  %v2511_v12 = vadd.s32 %v6656_v57, %v6666_v50 }
 0x2b7   :  { %8499 = vst [vmem:[#allocation81_spill] sm:$0xff] %v6774_v10  ;;  %v6785_v37 = vsel %vm8288_vm4, %v2541_v55, %v6712_v41  ;;  %v2677_v29 = vand.u32 31, %v2675_v28  ;;  %v6790_v14 = vshll.u32 %v2671_v62, 8  ;;  %v6794_v52 = vand.u32 8388607, %v8280_v17 }
 0x2b8   :  { %v6788_v19 = vshrl.u32 %v2620_v43, 30  ;;  %v2527_v39 = vsub.s32 32, %v6765_v20  ;;  %v6797_v45 = vshrl.u32 %v2675_v28, 5  ;;  %v4305_v50 = vadd.s32 4294967169, %v2771_v23 }
 0x2b9   :  { %v2678_v57 = vsub.s32 32, %v2677_v29  ;;  %v2533_v58 = vshll.u32 %v2532_v61, 23  ;;  %v2680_v54 = vshll.u32 %v8353_v2, %v2677_v29  ;;  %v2683_v7 = vshll.u32 %v8356_v22, %v2677_v29 }
 0x2ba   :  { %8500 = vst [vmem:[#allocation82_spill] sm:$0xff] %v6788_v19  ;;  %v2622_v41 = vshll.u32 %v6788_v19, 30  ;;  %v2686_v34 = vshll.u32 %v8358_v59, %v2677_v29  ;;  %v2689_v1 = vshll.u32 %v8351_v35, %v2677_v29  ;;  %v2692_v28 = vshll.u32 %v8359_v9, %v2677_v29 }
 0x2bb   :  { %v2681_v63 = vshrl.u32 %v8356_v22, %v2678_v57  ;;  %v2684_v55 = vshrl.u32 %v8358_v59, %v2678_v57  ;;  %v2687_v18 = vshrl.u32 %v8351_v35, %v2678_v57  ;;  %v2690_v62 = vshrl.u32 %v8359_v9, %v2678_v57 }
 0x2bc   :  { %v6806_v3 = vsub.s32 %v2619_v8, %v2622_v41  ;;  %v6811_v23 = vpop.eup %4632  ;;  %v8502_v61 = vand.u32 2147483647, %v6483_v36  ;;  %v2693_v8 = vshrl.u32 %v8352_v46, %v2678_v57  ;;  %v2528_v41 = vshll.u32 %v6731_v11, %v6765_v20 }
 0x2bd   :  { %8501 = vst [vmem:[#allocation83_spill] sm:$0xff] %v6811_v23  ;;  %v2682_v17 = vor.u32 %v2681_v63, %v2680_v54  ;;  %v2685_v48 = vor.u32 %v2684_v55, %v2683_v7  ;;  %v2688_v19 = vor.u32 %v2687_v18, %v2686_v34  ;;  %v2529_v60 = vshrl.u32 %v2511_v12, %v2527_v39 }
 0x2be   :  { %vm6815_vm1 = vcmp.le.f32.partialorder %v8502_v61, 0.7853982  ;;  %v2625_v47 = vsub.s32 0, %v6806_v3  ;;  %v2691_v29 = vor.u32 %v2690_v62, %v2689_v1  ;;  %v2534_v5 = vor.u32 4788187, %v2533_v58 }
 0x2bf   :  { %v2694_v23 = vor.u32 %v2693_v8, %v2692_v28  ;;  %vm2695_vm2 = vcmp.lt.s32.totalorder %v6797_v45, 1  ;;  %v2777_v61 = vadd.s32 1, %v4305_v50  ;;  %v2679_v54 = vshrl.u32 %v8353_v2, %v2678_v57 }
 0x2c0   :  { %v4298_v56 = vmin.u32 %v2625_v47, %v6806_v3  ;;  %vm2698_vm0 = vcmp.lt.s32.totalorder %v6797_v45, 4  ;;  %v2703_v7 = vsel %vm2695_vm2, %v2682_v17, %v2685_v48  ;;  %vm2697_vm6 = vcmp.lt.s32.totalorder %v6797_v45, 3 }
 0x2c1   :  { %v2704_v11 = vsel %vm2698_vm0, %v2691_v29, 920167782  ;;  %v2707_v20 = vsel %vm2695_vm2, %v2685_v48, %v2688_v19  ;;  %v2708_v12 = vsel %vm2698_vm0, %v2694_v23, 1326507024  ;;  %v6832_v39 = vpop.eup %4634  ;;  %vm2696_vm5 = vcmp.lt.s32.totalorder %v6797_v45, 2 }
 0x2c2   :  { %8505 = vst [vmem:[#allocation84_spill] sm:$0xff] %v6832_v39  ;;  %v2627_v58 = vclz %v4298_v56  ;;  %v2700_v47 = vsel %vm2698_vm0, %v2688_v19, 2102212464  ;;  %v2705_v57 = vsel %vm2697_vm6, %v2688_v19, %v2704_v11  ;;  %v2530_v50 = vor.u32 %v2529_v60, %v2528_v41 }
 0x2c3   :  { %v2535_v63 = vand.u32 2147483647, %v2534_v5  ;;  %v2706_v55 = vsel %vm2696_vm5, %v2703_v7, %v2705_v57  ;;  %v2709_v34 = vsel %vm2697_vm6, %v2691_v29, %v2708_v12  ;;  %v6841_v18 = vpop.eup %4636  ;;  %v2699_v56 = vsel %vm2695_vm2, %v2679_v54, %v2682_v17 }
 0x2c4   :  { %8506 = vst [vmem:[#allocation85_spill] sm:$0xff] %v6841_v18  ;;  %v4299_v1 = vadd.s32 4294967294, %v2627_v58  ;;  %v2710_v62 = vsel %vm2696_vm5, %v2707_v20, %v2709_v34  ;;  %vm2778_vm0 = vcmp.gt.s32.totalorder %v2777_v61, 0  ;;  %v2701_v60 = vsel %vm2697_vm6, %v2685_v48, %v2700_v47 }
 0x2c5   :  { %v6851_v5 = vmul.u32.u64.low %v6790_v14, %v2710_v62  ;;  %v6852_v19 = vmul.u32.u64.high %v6790_v14, %v2710_v62, %v6851_v5  ;;  %v2779_v28 = vsel %vm2778_vm0, %v2777_v61, 0  ;;  %v2775_v29 = vor.u32 8388608, %v6794_v52 }
 0x2c6   :  { %vm4300_vm4 = vcmp.lt.s32.totalorder %v4299_v1, 0  ;;  %v6858_v8 = vmul.u32.u64.low %v6790_v14, %v2706_v55  ;;  %v6859_v17 = vmul.u32.u64.high %v6790_v14, %v2706_v55, %v6858_v8  ;;  %v2781_v54 = vand.u32 31, %v2779_v28 }
 0x2c7   :  { %v2630_v41 = vsel %vm4300_vm4, 0, %v4299_v1  ;;  %v8289_v48 = vand.u32 2147483647, %v6774_v10  ;;  %v2537_v7 = vcvt.s32.f32 %v2530_v50  ;;  %v2702_v61 = vsel %vm2696_vm5, %v2699_v56, %v2701_v60 }
 0x2c8   :  { %v2635_v11 = vsub.s32 4294967266, %v2630_v41  ;;  %v6866_v20 = vshrl.u32 %v2779_v28, 5  ;;  %4638 = vsinq.f32 %v6754_v4  ;;  %v2631_v12 = vsub.s32 32, %v2630_v41 }
 0x2c9   :  { %vm2720_vm2 = vc.u32 %v6852_v19, %v6858_v8  ;;  %v2782_v58 = vsub.s32 32, %v2781_v54  ;;  %v2538_v47 = vmul.f32 %v2537_v7, %v2535_v63  ;;  %v2615_v52 = vadd.s32 %v6738_v0, %v6746_v13 }
 0x2ca   :  { %v2636_v57 = vadd.s32 127, %v2635_v11  ;;  %v2721_v50 = vadd.s32 1, %v6859_v17  ;;  %v2718_v55 = vmul.u32 %v6790_v14, %v2702_v61  ;;  %v2784_v45 = vshll.u32 %v8353_v2, %v2781_v54 }
 0x2cb   :  { %v2785_v34 = vshrl.u32 %v8356_v22, %v2782_v58  ;;  %v2788_v4 = vshrl.u32 %v8358_v59, %v2782_v58  ;;  %v2787_v62 = vshll.u32 %v8356_v22, %v2781_v54  ;;  %v2791_v63 = vshrl.u32 %v8351_v35, %v2782_v58 }
 0x2cc   :  { %v2637_v1 = vshll.u32 %v2636_v57, 23  ;;  %v2722_v56 = vsel %vm2720_vm2, %v2721_v50, %v6859_v17  ;;  %v8507_v0 = vxor.u32 2147483648, %v6763_v38  ;;  %vm8508_vm5 = vcmp.lt.s32.totalorder %v6329_v26, 0 }
 0x2cd   :  { %v2633_v14 = vshrl.u32 %v2615_v52, %v2631_v12  ;;  %v2723_v60 = vadd.s32 %v2722_v56, %v2718_v55  ;;  %v2790_v5 = vshll.u32 %v8358_v59, %v2781_v54  ;;  %v8509_v28 = vand.u32 2147483647, %v6329_v26 }
 0x2ce   :  { %v2436_v13 = vsel %vm8508_vm5, %v8507_v0, %v6763_v38  ;;  %v8510_v7 = vmov 0  ;;  %v2786_v17 = vor.u32 %v2785_v34, %v2784_v45  ;;  %v2789_v11 = vor.u32 %v2788_v4, %v2787_v62 }
 0x2cf   :  { %vm6889_vm4 = vcmp.le.f32.partialorder %v8509_v28, 0.7853982  ;;  %v2793_v61 = vshll.u32 %v8351_v35, %v2781_v54  ;;  %v2794_v57 = vshrl.u32 %v8359_v9, %v2782_v58  ;;  %v2724_v50 = vadd.s32 536870912, %v2723_v60 }
 0x2d0   :  { %v8511_v7 = vsel %vm6889_vm4, 4294967295, %v8510_v7  ;;  %v2792_v23 = vor.u32 %v2791_v63, %v2790_v5  ;;  %v2796_v38 = vshll.u32 %v8359_v9, %v2781_v54  ;;  %v2797_v12 = vshrl.u32 %v8352_v46, %v2782_v58 }
 0x2d1   :  { %8512 = vst [vmem:[#allocation86_spill] sm:$0xff] %v8511_v7  ;;  %v2539_v52 = vxor.u32 2147483648, %v2538_v47  ;;  %v2795_v55 = vor.u32 %v2794_v57, %v2793_v61  ;;  %v6897_v56 = vshll.u32 %v2775_v29, 8  ;;  %v2874_v0 = vand.u32 2139095040, %v6774_v10 }
 0x2d2   :  { %v2632_v28 = vshll.u32 %v6806_v3, %v2630_v41  ;;  %v6901_v45 = vshrl.u32 %v2724_v50, 30  ;;  %v2798_v34 = vor.u32 %v2797_v12, %v2796_v38  ;;  %vm2802_vm6 = vcmp.lt.s32.totalorder %v6866_v20, 4 }
 0x2d3   :  { %v2638_v4 = vor.u32 4788187, %v2637_v1  ;;  %vm2799_vm0 = vcmp.lt.s32.totalorder %v6866_v20, 1  ;;  %vm2801_vm2 = vcmp.lt.s32.totalorder %v6866_v20, 3  ;;  %v2808_v54 = vsel %vm2802_vm6, %v2795_v55, 920167782 }
 0x2d4   :  { %v2634_v62 = vor.u32 %v2633_v14, %v2632_v28  ;;  %v2726_v63 = vshll.u32 %v6901_v45, 30  ;;  %v2807_v29 = vsel %vm2799_vm0, %v2786_v17, %v2789_v11  ;;  %v2809_v3 = vsel %vm2801_vm2, %v2792_v23, %v2808_v54 }
 0x2d5   :  { %v2783_v41 = vshrl.u32 %v8353_v2, %v2782_v58  ;;  %v2811_v5 = vsel %vm2799_vm0, %v2789_v11, %v2792_v23  ;;  %v2812_v1 = vsel %vm2802_vm6, %v2798_v34, 1326507024  ;;  %v2878_v61 = vand.u32 8388607, %v8289_v48  ;;  %v6921_v38 = vpop.eup %4638 }
 0x2d6   :  { %v6916_v57 = vsub.s32 %v2723_v60, %v2726_v63  ;;  %vm2800_vm5 = vcmp.lt.s32.totalorder %v6866_v20, 2  ;;  %v2804_v14 = vsel %vm2802_vm6, %v2792_v23, 2102212464  ;;  %v2813_v50 = vsel %vm2801_vm2, %v2795_v55, %v2812_v1  ;;  %8513 = vst [vmem:[#allocation87_spill] sm:$0xff] %v6921_v38 }
 0x2d7   :  { %v2639_v12 = vand.u32 2147483647, %v2638_v4  ;;  %v2810_v58 = vsel %vm2800_vm5, %v2807_v29, %v2809_v3  ;;  %v2814_v28 = vsel %vm2800_vm5, %v2811_v5, %v2813_v50  ;;  %v2875_v34 = vshrl.u32 %v2874_v0, 23 }
 0x2d8   :  { %v2439_v60 = vsel %vm6889_vm4, %v6329_v26, %v2436_v13  ;;  %v2641_v54 = vcvt.s32.f32 %v2634_v62  ;;  %v2729_v23 = vsub.s32 0, %v6916_v57  ;;  %v2803_v55 = vsel %vm2799_vm0, %v2783_v41, %v2786_v17 }
 0x2d9   :  { %v2805_v4 = vsel %vm2801_vm2, %v2789_v11, %v2804_v14  ;;  %v6936_v63 = vmul.u32.u64.low %v6897_v56, %v2814_v28  ;;  %v6937_v29 = vmul.u32.u64.high %v6897_v56, %v2814_v28, %v6936_v63  ;;  %v4309_v3 = vadd.s32 4294967169, %v2875_v34 }
 0x2da   :  { %vm8514_vm6 = vcmp.lt.s32.totalorder %v6483_v36, 0  ;;  %v4302_v5 = vmin.u32 %v2729_v23, %v6916_v57  ;;  %v6943_v13 = vmul.u32.u64.low %v6897_v56, %v2810_v58  ;;  %v6944_v62 = vmul.u32.u64.high %v6897_v56, %v2810_v58, %v6943_v13 }
 0x2db   :  { %v2540_v0 = vsel %vm8514_vm6, %v2539_v52, %v2538_v47  ;;  %4640 = vcosq.f32 %v2439_v60  ;;  %v6947_v17 = vmul.f32 %v2641_v54, %v2639_v12  ;;  %v2879_v41 = vor.u32 8388608, %v2878_v61  ;;  %v256_v61 = vpop.f32.mrf.mxu0 }
 0x2dc   :  { %v2881_v11 = vadd.s32 1, %v4309_v3  ;;  %4642 = vsinq.f32 %v2439_v60  ;;  %v2731_v1 = vclz %v4302_v5  ;;  %v2806_v14 = vsel %vm2800_vm5, %v2803_v55, %v2805_v4 }
 0x2dd   :  { %v2978_v50 = vand.u32 2139095040, %v6777_v16  ;;  %v6955_v47 = vsel %vm6815_vm1, %v6483_v36, %v2540_v0  ;;  %v2719_v52 = vadd.s32 %v6858_v8, %v6852_v19  ;;  %vm2824_vm0 = vc.u32 %v6937_v29, %v6943_v13 }
 0x2de   :  { %vm2882_vm2 = vcmp.gt.s32.totalorder %v2881_v11, 0  ;;  %v4303_v12 = vadd.s32 4294967294, %v2731_v1  ;;  %v2825_v20 = vadd.s32 1, %v6944_v62  ;;  %v2822_v60 = vmul.u32 %v6897_v56, %v2806_v14 }
 0x2df   :  { %v2883_v28 = vsel %vm2882_vm2, %v2881_v11, 0  ;;  %v6965_v23 = vshll.u32 %v2879_v41, 8  ;;  %v2979_v8 = vshrl.u32 %v2978_v50, 23  ;;  %v6969_v55 = vadd.f32 %v256_v61, %v4878_v25 }
 0x2e0   :  { %v2885_v54 = vand.u32 31, %v2883_v28  ;;  %vm4304_vm5 = vcmp.lt.s32.totalorder %v4303_v12, 0  ;;  %v2826_v19 = vsel %vm2824_vm0, %v2825_v20, %v6944_v62  ;;  %v6971_v3 = vshrl.u32 %v2883_v28, 5 }
 0x2e1   :  { %v2734_v4 = vsel %vm4304_vm5, 0, %v4303_v12  ;;  %v2827_v63 = vadd.s32 %v2826_v19, %v2822_v60  ;;  %v4313_v26 = vadd.s32 4294967169, %v2979_v8  ;;  %4644 = vcosq.f32 %v6955_v47 }
 0x2e2   :  { %v2886_v0 = vsub.s32 32, %v2885_v54  ;;  %v2735_v5 = vsub.s32 32, %v2734_v4  ;;  %v2736_v11 = vshll.u32 %v6916_v57, %v2734_v4  ;;  %v2739_v1 = vsub.s32 4294967266, %v2734_v4 }
 0x2e3   :  { %v2888_v56 = vshll.u32 %v8353_v2, %v2885_v54  ;;  %v2828_v41 = vadd.s32 536870912, %v2827_v63  ;;  %v2891_v62 = vshll.u32 %v8356_v22, %v2885_v54  ;;  %v2894_v12 = vshll.u32 %v8358_v59, %v2885_v54 }
 0x2e4   :  { %v2889_v14 = vshrl.u32 %v8356_v22, %v2886_v0  ;;  %v2892_v50 = vshrl.u32 %v8358_v59, %v2886_v0  ;;  %v2737_v61 = vshrl.u32 %v2719_v52, %v2735_v5  ;;  %v2740_v20 = vadd.s32 127, %v2739_v1 }
 0x2e5   :  { %v2895_v28 = vshrl.u32 %v8351_v35, %v2886_v0  ;;  %v6981_v60 = vshrl.u32 %v2828_v41, 30  ;;  %v2897_v4 = vshll.u32 %v8351_v35, %v2885_v54  ;;  %v2898_v7 = vshrl.u32 %v8359_v9, %v2886_v0 }
 0x2e6   :  { %v2890_v57 = vor.u32 %v2889_v14, %v2888_v56  ;;  %v2893_v19 = vor.u32 %v2892_v50, %v2891_v62  ;;  %v2738_v48 = vor.u32 %v2737_v61, %v2736_v11  ;;  %v2741_v58 = vshll.u32 %v2740_v20, 23 }
 0x2e7   :  { %8515 = vst [vmem:[#allocation88_spill] sm:$0xff] %v6981_v60  ;;  %v2896_v34 = vor.u32 %v2895_v28, %v2894_v12  ;;  %v2830_v52 = vshll.u32 %v6981_v60, 30  ;;  %v2900_v5 = vshll.u32 %v8359_v9, %v2885_v54  ;;  %v2901_v1 = vshrl.u32 %v8352_v46, %v2886_v0 }
 0x2e8   :  { %v6988_v36 = vpop.eup %4640  ;;  %v2742_v56 = vor.u32 4788187, %v2741_v58  ;;  %v2887_v41 = vshrl.u32 %v8353_v2, %v2886_v0  ;;  %v2899_v14 = vor.u32 %v2898_v7, %v2897_v4  ;;  %vm2903_vm2 = vcmp.lt.s32.totalorder %v6971_v3, 1 }
 0x2e9   :  { %8516 = vst [vmem:[#allocation89_spill] sm:$0xff] %v6988_v36  ;;  %v6993_v11 = vpop.eup %4642  ;;  %v8518_v62 = vand.u32 2147483647, %v6583_v15  ;;  %v8519_v50 = vmov 0  ;;  %v2745_v54 = vcvt.s32.f32 %v2738_v48  ;;  %v7001_v8 = vsub.s32 %v2827_v63, %v2830_v52 }
 0x2ea   :  { %8517 = vst [vmem:[#allocation90_spill] sm:$0xff] %v6993_v11  ;;  %v2902_v61 = vor.u32 %v2901_v1, %v2900_v5  ;;  %vm2906_vm0 = vcmp.lt.s32.totalorder %v6971_v3, 4  ;;  %v2743_v58 = vand.u32 2147483647, %v2742_v56  ;;  %v2911_v0 = vsel %vm2903_vm2, %v2890_v57, %v2893_v19 }
 0x2eb   :  { %vm6997_vm5 = vcmp.le.f32.partialorder %v8518_v62, 0.7853982  ;;  %v2908_v7 = vsel %vm2906_vm0, %v2896_v34, 2102212464  ;;  %v2833_v20 = vsub.s32 0, %v7001_v8  ;;  %vm2905_vm4 = vcmp.lt.s32.totalorder %v6971_v3, 3 }
 0x2ec   :  { %v8520_v50 = vsel %vm6997_vm5, 4294967295, %v8519_v50  ;;  %v2912_v12 = vsel %vm2906_vm0, %v2899_v14, 920167782  ;;  %v2915_v48 = vsel %vm2903_vm2, %v2893_v19, %v2896_v34  ;;  %v2746_v63 = vmul.f32 %v2745_v54, %v2743_v58 }
 0x2ed   :  { %8521 = vst [vmem:[#allocation91_spill] sm:$0xff] %v8520_v50  ;;  %v2907_v28 = vsel %vm2903_vm2, %v2887_v41, %v2890_v57  ;;  %v2913_v4 = vsel %vm2905_vm4, %v2896_v34, %v2912_v12  ;;  %v2916_v52 = vsel %vm2906_vm0, %v2902_v61, 1326507024  ;;  %v8522_v5 = vand.u32 2147483647, %v6682_v32 }
 0x2ee   :  { %v4306_v56 = vmin.u32 %v2833_v20, %v7001_v8  ;;  %v2909_v62 = vsel %vm2905_vm4, %v2893_v19, %v2908_v7  ;;  %vm8525_vm13 = vcmp.lt.s32.totalorder %v6971_v3, 2  ;;  %v2917_v36 = vsel %vm2905_vm4, %v2899_v14, %v2916_v52 }
 0x2ef   :  { %vm7015_vm6 = vcmp.le.f32.partialorder %v8522_v5, 0.7853982  ;;  %v2914_v60 = vsel %vm8525_vm13, %v2911_v0, %v2913_v4  ;;  %v8526_v54 = vxor.u32 2147483648, %v6947_v17  ;;  %vm8527_vm2 = vcmp.lt.s32.totalorder %v6583_v15, 0  ;;  %vm8528_vm0 = vmmov %vm8525_vm13 }
 0x2f0   :  { %v2918_v57 = vsel %vm8528_vm0, %v2915_v48, %v2917_v36  ;;  %v7030_v41 = vmul.u32.u64.low %v6965_v23, %v2914_v60  ;;  %v7031_v61 = vmul.u32.u64.high %v6965_v23, %v2914_v60, %v7030_v41  ;;  %v2835_v58 = vclz %v4306_v56  ;;  %vm8529_vm13 = vmmov %vm8528_vm0 }
 0x2f1   :  { %v2644_v34 = vsel %vm8527_vm2, %v8526_v54, %v6947_v17  ;;  %v7035_v19 = vmul.u32.u64.low %v6965_v23, %v2918_v57  ;;  %v7036_v7 = vmul.u32.u64.high %v6965_v23, %v2918_v57, %v7035_v19  ;;  %v8299_v14 = vand.u32 2147483647, %v6777_v16 }
 0x2f2   :  { %v2747_v0 = vxor.u32 2147483648, %v2746_v63  ;;  %v2910_v17 = vsel %vm8529_vm13, %v2907_v28, %v2909_v62  ;;  %v2985_v20 = vadd.s32 1, %v4313_v26  ;;  %4646 = vsinq.f32 %v6955_v47 }
 0x2f3   :  { %v8530_v36 = vsub.s32 4, %v6901_v45  ;;  %vm8531_vm4 = vcmp.lt.s32.totalorder %v6682_v32, 0  ;;  %v4307_v12 = vadd.s32 4294967294, %v2835_v58  ;;  %v3082_v48 = vand.u32 2139095040, %v6969_v55 }
 0x2f4   :  { %v7054_v4 = vsel %vm6997_vm5, %v6583_v15, %v2644_v34  ;;  %v2823_v26 = vadd.s32 %v6943_v13, %v6937_v29  ;;  %v2929_v47 = vadd.s32 1, %v7031_v61  ;;  %vm2986_vm2 = vcmp.gt.s32.totalorder %v2985_v20, 0  ;;  %v260_v13 = vpop.f32.mrf.mxu0 }
 0x2f5   :  { %v7048_v60 = vsel %vm8531_vm4, %v8530_v36, %v6901_v45  ;;  %vm4308_vm0 = vcmp.lt.s32.totalorder %v4307_v12, 0  ;;  %v2926_v3 = vmul.u32 %v6965_v23, %v2910_v17  ;;  %vm2928_vm13 = vc.u32 %v7036_v7, %v7030_v41 }
 0x2f6   :  { %v7064_v45 = vand.u32 8388607, %v8299_v14  ;;  %v2748_v28 = vsel %vm8531_vm4, %v2747_v0, %v2746_v63  ;;  %v2838_v52 = vsel %vm4308_vm0, 0, %v4307_v12  ;;  %v2930_v5 = vsel %vm2928_vm13, %v2929_v47, %v7031_v61 }
 0x2f7   :  { %v2987_v29 = vsel %vm2986_vm2, %v2985_v20, 0  ;;  %v2839_v56 = vsub.s32 32, %v2838_v52  ;;  %v2843_v62 = vsub.s32 4294967266, %v2838_v52  ;;  %v2931_v54 = vadd.s32 %v2930_v5, %v2926_v3 }
 0x2f8   :  { %v3083_v34 = vshrl.u32 %v3082_v48, 23  ;;  %v8532_v23 = vsel %vm6815_vm1, 0, %v6785_v37  ;;  %4648 = vcosq.f32 %v7054_v4  ;;  %v2989_v58 = vand.u32 31, %v2987_v29 }
 0x2f9   :  { %v7073_v57 = vadd.s32 3, %v8532_v23  ;;  %v2841_v61 = vshrl.u32 %v2823_v26, %v2839_v56  ;;  %v2844_v19 = vadd.s32 127, %v2843_v62  ;;  %v2932_v0 = vadd.s32 536870912, %v2931_v54 }
 0x2fa   :  { %v7080_v17 = vadd.f32 %v260_v13, %v4876_v24  ;;  %v7085_v43 = vsel %vm7015_vm6, %v6682_v32, %v2748_v28  ;;  %v2983_v37 = vor.u32 8388608, %v7064_v45  ;;  %v2990_v20 = vsub.s32 32, %v2989_v58 }
 0x2fb   :  { %8533 = vst [vmem:[#allocation92_spill] sm:$0xff] %v7073_v57  ;;  %v2840_v12 = vshll.u32 %v7001_v8, %v2838_v52  ;;  %v2845_v48 = vshll.u32 %v2844_v19, 23  ;;  %v7090_v47 = vshrl.u32 %v2932_v0, 30  ;;  %v4317_v26 = vadd.s32 4294967169, %v3083_v34  ;;  %v7101_v0 = vpop.eup %4644 }
 0x2fc   :  { %v2992_v3 = vshll.u32 %v8353_v2, %v2989_v58  ;;  %v2993_v5 = vshrl.u32 %v8356_v22, %v2990_v20  ;;  %v2996_v13 = vshrl.u32 %v8358_v59, %v2990_v20  ;;  %v2999_v28 = vshrl.u32 %v8351_v35, %v2990_v20  ;;  %8534 = vst [vmem:[#allocation93_spill] sm:$0xff] %v7101_v0 }
 0x2fd   :  { %v2842_v56 = vor.u32 %v2841_v61, %v2840_v12  ;;  %v2934_v45 = vshll.u32 %v7090_v47, 30  ;;  %v2995_v62 = vshll.u32 %v8356_v22, %v2989_v58  ;;  %v2998_v23 = vshll.u32 %v8358_v59, %v2989_v58 }
 0x2fe   :  { %v2846_v8 = vor.u32 4788187, %v2845_v48  ;;  %v2988_v52 = vshrl.u32 %v2987_v29, 5  ;;  %v3001_v19 = vshll.u32 %v8351_v35, %v2989_v58  ;;  %v3002_v34 = vshrl.u32 %v8359_v9, %v2990_v20 }
 0x2ff   :  { %v7103_v14 = vsub.s32 %v2931_v54, %v2934_v45  ;;  %v2994_v63 = vor.u32 %v2993_v5, %v2992_v3  ;;  %v2997_v36 = vor.u32 %v2996_v13, %v2995_v62  ;;  %v3000_v50 = vor.u32 %v2999_v28, %v2998_v23  ;;  %v7105_v61 = vpop.eup %4646 }
 0x300   :  { %8535 = vst [vmem:[#allocation94_spill] sm:$0xff] %v7105_v61  ;;  %v3003_v12 = vor.u32 %v3002_v34, %v3001_v19  ;;  %v3004_v15 = vshll.u32 %v8359_v9, %v2989_v58  ;;  %v3005_v11 = vshrl.u32 %v8352_v46, %v2990_v20  ;;  %v8536_v29 = vand.u32 2147483647, %v6969_v55 }
 0x301   :  { %v2849_v32 = vcvt.s32.f32 %v2842_v56  ;;  %v2937_v39 = vsub.s32 0, %v7103_v14  ;;  %v2991_v0 = vshrl.u32 %v8353_v2, %v2990_v20  ;;  %v3089_v54 = vadd.s32 1, %v4317_v26 }
 0x302   :  { %v3086_v48 = vand.u32 8388607, %v8536_v29  ;;  %v2847_v45 = vand.u32 2147483647, %v2846_v8  ;;  %v3006_v3 = vor.u32 %v3005_v11, %v3004_v15  ;;  %vm3007_vm1 = vcmp.lt.s32.totalorder %v2988_v52, 1 }
 0x303   :  { %vm3010_vm2 = vcmp.lt.s32.totalorder %v2988_v52, 4  ;;  %v4310_v5 = vmin.u32 %v2937_v39, %v7103_v14  ;;  %vm3008_vm0 = vcmp.lt.s32.totalorder %v2988_v52, 2  ;;  %v3015_v58 = vsel %vm3007_vm1, %v2994_v63, %v2997_v36 }
 0x304   :  { %v3012_v13 = vsel %vm3010_vm2, %v3000_v50, 2102212464  ;;  %vm3009_vm13 = vcmp.lt.s32.totalorder %v2988_v52, 3  ;;  %v3016_v28 = vsel %vm3010_vm2, %v3003_v12, 920167782  ;;  %v3019_v62 = vsel %vm3007_vm1, %v2997_v36, %v3000_v50 }
 0x305   :  { %v3020_v23 = vsel %vm3010_vm2, %v3006_v3, 1326507024  ;;  %v7114_v19 = vpop.eup %4648  ;;  %v2939_v56 = vclz %v4310_v5  ;;  %v3011_v34 = vsel %vm3007_vm1, %v2991_v0, %v2994_v63  ;;  %v3013_v29 = vsel %vm3009_vm13, %v2997_v36, %v3012_v13 }
 0x306   :  { %8537 = vst [vmem:[#allocation95_spill] sm:$0xff] %v7114_v19  ;;  %v3017_v20 = vsel %vm3009_vm13, %v3000_v50, %v3016_v28  ;;  %v7116_v26 = vmul.f32 %v2849_v32, %v2847_v45  ;;  %v3021_v11 = vsel %vm3009_vm13, %v3003_v12, %v3020_v23  ;;  %v3023_v8 = vshll.u32 %v2983_v37, 8 }
 0x307   :  { %v3018_v15 = vsel %vm3008_vm0, %v3015_v58, %v3017_v20  ;;  %v4311_v39 = vadd.s32 4294967294, %v2939_v56  ;;  %v3022_v61 = vsel %vm3008_vm0, %v3019_v62, %v3021_v11  ;;  %v3087_v57 = vor.u32 8388608, %v3086_v48 }
 0x308   :  { %vm3090_vm4 = vcmp.gt.s32.totalorder %v3089_v54, 0  ;;  %v3014_v18 = vsel %vm3008_vm0, %v3011_v34, %v3013_v29  ;;  %v7121_v3 = vmul.u32.u64.low %v3023_v8, %v3022_v61  ;;  %v7122_v38 = vmul.u32.u64.high %v3023_v8, %v3022_v61, %v7121_v3 }
 0x309   :  { %v3091_v5 = vsel %vm3090_vm4, %v3089_v54, 0  ;;  %vm4312_vm1 = vcmp.lt.s32.totalorder %v4311_v39, 0  ;;  %v7124_v63 = vmul.u32.u64.low %v3023_v8, %v3018_v15  ;;  %v7125_v50 = vmul.u32.u64.high %v3023_v8, %v3018_v15, %v7124_v63 }
 0x30a   :  { %v7128_v32 = vshrl.u32 %v3091_v5, 5  ;;  %v2851_v37 = vxor.u32 2147483648, %v7116_v26  ;;  %v2927_v36 = vadd.s32 %v7030_v41, %v7036_v7  ;;  %v2942_v0 = vsel %vm4312_vm1, 0, %v4311_v39 }
 0x30b   :  { %v3093_v12 = vand.u32 31, %v3091_v5  ;;  %v2943_v52 = vsub.s32 32, %v2942_v0  ;;  %v2947_v48 = vsub.s32 4294967266, %v2942_v0  ;;  %v3030_v45 = vmul.u32 %v3023_v8, %v3014_v18 }
 0x30c   :  { %v7133_v61 = vshll.u32 %v3087_v57, 8  ;;  %v2944_v54 = vshll.u32 %v7103_v14, %v2942_v0  ;;  %vm3032_vm2 = vc.u32 %v7122_v38, %v7124_v63  ;;  %v3033_v62 = vadd.s32 1, %v7125_v50 }
 0x30d   :  { %v3094_v13 = vsub.s32 32, %v3093_v12  ;;  %v2945_v58 = vshrl.u32 %v2927_v36, %v2943_v52  ;;  %v2948_v28 = vadd.s32 127, %v2947_v48  ;;  %v3096_v41 = vshll.u32 %v8353_v2, %v3093_v12 }
 0x30e   :  { %v3099_v18 = vshll.u32 %v8356_v22, %v3093_v12  ;;  %v3102_v14 = vshll.u32 %v8358_v59, %v3093_v12  ;;  %v3034_v34 = vsel %vm3032_vm2, %v3033_v62, %v7125_v50  ;;  %v3105_v5 = vshll.u32 %v8351_v35, %v3093_v12 }
 0x30f   :  { %v3097_v7 = vshrl.u32 %v8356_v22, %v3094_v13  ;;  %v3100_v57 = vshrl.u32 %v8358_v59, %v3094_v13  ;;  %v2946_v23 = vor.u32 %v2945_v58, %v2944_v54  ;;  %v2949_v56 = vshll.u32 %v2948_v28, 23 }
 0x310   :  { %v3103_v29 = vshrl.u32 %v8351_v35, %v3094_v13  ;;  %v3035_v20 = vadd.s32 %v3034_v34, %v3030_v45  ;;  %v3095_v15 = vshrl.u32 %v8353_v2, %v3094_v13  ;;  %v3106_v36 = vshrl.u32 %v8359_v9, %v3094_v13 }
 0x311   :  { %v3098_v11 = vor.u32 %v3097_v7, %v3096_v41  ;;  %v3101_v8 = vor.u32 %v3100_v57, %v3099_v18  ;;  %v2950_v39 = vor.u32 4788187, %v2949_v56  ;;  %v2953_v0 = vcvt.s32.f32 %v2946_v23 }
 0x312   :  { %v3104_v3 = vor.u32 %v3103_v29, %v3102_v14  ;;  %v3036_v52 = vadd.s32 536870912, %v3035_v20  ;;  %v3108_v48 = vshll.u32 %v8359_v9, %v3093_v12  ;;  %v3109_v50 = vshrl.u32 %v8352_v46, %v3094_v13 }
 0x313   :  { %v2951_v54 = vand.u32 2147483647, %v2950_v39  ;;  %v3107_v58 = vor.u32 %v3106_v36, %v3105_v5  ;;  %vm3114_vm1 = vcmp.lt.s32.totalorder %v7128_v32, 4  ;;  %v8538_v45 = vand.u32 2147483647, %v6701_v6 }
 0x314   :  { %v8539_v28 = vmov 0  ;;  %v7162_v62 = vshrl.u32 %v3036_v52, 30  ;;  %v3110_v41 = vor.u32 %v3109_v50, %v3108_v48  ;;  %vm3113_vm0 = vcmp.lt.s32.totalorder %v7128_v32, 3  ;;  %v262_v48 = vpop.f32.mrf.mxu0 }
 0x315   :  { %vm7157_vm2 = vcmp.le.f32.partialorder %v8538_v45, 0.7853982  ;;  %v3116_v12 = vsel %vm3114_vm1, %v3104_v3, 2102212464  ;;  %v2954_v13 = vmul.f32 %v2953_v0, %v2951_v54  ;;  %vm8543_vm4 = vcmp.lt.s32.totalorder %v7128_v32, 1 }
 0x316   :  { %v8540_v28 = vsel %vm7157_vm2, 4294967295, %v8539_v28  ;;  %8542 = vst [vmem:[#allocation97_spill] sm:$0xff] %v7162_v62  ;;  %v3115_v7 = vsel %vm8543_vm4, %v3095_v15, %v3098_v11  ;;  %vm8544_vm5 = vmmov %vm8543_vm4  ;;  %v3120_v57 = vsel %vm3114_vm1, %v3107_v58, 920167782  ;;  %v3038_v14 = vshll.u32 %v7162_v62, 30 }
 0x317   :  { %8541 = vst [vmem:[#allocation96_spill] sm:$0xff] %v8540_v28  ;;  %v3119_v18 = vsel %vm8544_vm5, %v3098_v11, %v3101_v8  ;;  %v3117_v23 = vsel %vm3113_vm0, %v3101_v8, %v3116_v12  ;;  %v3121_v56 = vsel %vm3113_vm0, %v3104_v3, %v3120_v57  ;;  %vm8545_vm13 = vmmov %vm8543_vm4  ;;  %v8546_v29 = vand.u32 2147483647, %v6774_v10  ;;  %v4555_v57 = vld [vmem:[%s8148_s3 + $0x38] sm:$0xff]  }
 0x318   :  { %v3123_v34 = vsel %vm8545_vm13, %v3101_v8, %v3104_v3  ;;  %v2957_v11 = vsub.s32 4, %v7090_v47  ;;  %vm8549_vm5 = vcmp.lt.s32.totalorder %v7128_v32, 2  ;;  %v3124_v5 = vsel %vm3114_vm1, %v3110_v41, 1326507024 }
 0x319   :  { %vm7182_vm4 = vcmp.le.f32.partialorder %v8546_v29, 0.7853982  ;;  %v3122_v39 = vsel %vm8549_vm5, %v3119_v18, %v3121_v56  ;;  %v8311_v36 = vand.u32 2147483647, %v7080_v17  ;;  %v7192_v0 = vsub.s32 %v3035_v20, %v3038_v14  ;;  %vm8551_vm1 = vmmov %vm8549_vm5 }
 0x31a   :  { %v3125_v8 = vsel %vm3113_vm0, %v3107_v58, %v3124_v5  ;;  %v7197_v3 = vmul.u32.u64.low %v7133_v61, %v3122_v39  ;;  %v7198_v52 = vmul.u32.u64.high %v7133_v61, %v3122_v39, %v7197_v3  ;;  %vm8550_vm13 = vcmp.lt.s32.totalorder %v6701_v6, 0  ;;  %vm8552_vm5 = vmmov %vm8551_vm1 }
 0x31b   :  { %v2852_v50 = vsel %vm8550_vm13, %v2851_v37, %v7116_v26  ;;  %v3118_v54 = vsel %vm8551_vm1, %v3115_v7, %v3117_v23  ;;  %v3126_v20 = vsel %vm8552_vm5, %v3123_v34, %v3125_v8  ;;  %v3186_v45 = vand.u32 2139095040, %v7080_v17 }
 0x31c   :  { %v2955_v58 = vxor.u32 2147483648, %v2954_v13  ;;  %v3041_v41 = vsub.s32 0, %v7192_v0  ;;  %v7212_v12 = vmul.u32.u64.low %v7133_v61, %v3126_v20  ;;  %v7213_v18 = vmul.u32.u64.high %v7133_v61, %v3126_v20, %v7212_v12 }
 0x31d   :  { %4650 = vsinq.f32 %v7054_v4  ;;  %v8553_v26 = vsel %vm7015_vm6, 0, %v7048_v60  ;;  %v3187_v37 = vshrl.u32 %v3186_v45, 23  ;;  %v7226_v7 = vadd.f32 %v262_v48, %v4878_v25 }
 0x31e   :  { %v7223_v32 = vadd.s32 3, %v8553_v26  ;;  %4652 = vcosq.f32 %v7085_v43  ;;  %v4314_v14 = vmin.u32 %v3041_v41, %v7192_v0  ;;  %v3137_v23 = vadd.s32 1, %v7198_v52 }
 0x31f   :  { %v2855_v4 = vsel %vm7157_vm2, %v6701_v6, %v2852_v50  ;;  %vm8554_vm0 = vcmp.lt.s32.totalorder %v6774_v10, 0  ;;  %v3134_v60 = vmul.u32 %v7133_v61, %v3118_v54  ;;  %v4321_v56 = vadd.s32 4294967169, %v3187_v37 }
 0x320   :  { %v7237_v1 = vsel %vm8554_vm0, %v2957_v11, %v7090_v47  ;;  %v8316_v34 = vmov 0   ;;  %vm8555_vm6 = vmmov %vm8554_vm0  ;;  %v3043_v39 = vclz %v4314_v14  ;;  %vm3136_vm13 = vc.u32 %v7213_v18, %v7197_v3  ;;  %v4556_v47 = vld [vmem:[%s8148_s3 + $0x30] sm:$0xff]  }
 0x321   :  { %3712 = vmatprep.subr.bf16.mxu1 %v8316_v34  ;;  %v2956_v29 = vsel %vm8555_vm6, %v2955_v58, %v2954_v13  ;;  %v3190_v5 = vand.u32 8388607, %v8311_v36  ;;  %4654 = vsinq.f32 %v7085_v43  ;;  %v3138_v61 = vsel %vm3136_vm13, %v3137_v23, %v7198_v52  ;;  %v4557_v58 = vld [vmem:[%s8148_s3 + $0x28] sm:$0xff]  }
 0x322   :  { %3713 = vmatpush1.bf16.msra.mxu1 %v4555_v57  ;;  %v3193_v11 = vadd.s32 1, %v4321_v56  ;;  %v3290_v8 = vand.u32 2139095040, %v7226_v7  ;;  %4656 = vcosq.f32 %v2855_v4  ;;  %v4315_v48 = vadd.s32 4294967294, %v3043_v39 }
 0x323   :  { %3714 = vmatprep.subr.bf16.mxu1 %v8316_v34  ;;  %v3139_v50 = vadd.s32 %v3138_v61, %v3134_v60  ;;  %4658 = vsinq.f32 %v2855_v4  ;;  %v2959_v54 = vsel %vm7182_vm4, %v6774_v10, %v2956_v29  ;;  %v8312_v43 = vand.u32 2147483647, %v7226_v7 }
 0x324   :  { %vm3194_vm1 = vcmp.gt.s32.totalorder %v3193_v11, 0  ;;  %vm4316_vm5 = vcmp.lt.s32.totalorder %v4315_v48, 0  ;;  %v3191_v20 = vor.u32 8388608, %v3190_v5  ;;  %v3031_v41 = vadd.s32 %v7124_v63, %v7122_v38  ;;  %v4558_v5 = vld [vmem:[%s8148_s3 + $0x20] sm:$0xff]  }
 0x325   :  { %v3140_v52 = vadd.s32 536870912, %v3139_v50  ;;  %v3195_v45 = vsel %vm3194_vm1, %v3193_v11, 0  ;;  %v3046_v12 = vsel %vm4316_vm5, 0, %v4315_v48  ;;  %v3291_v26 = vshrl.u32 %v3290_v8, 23 }
 0x326   :  { %3715 = vmatpush1.bf16.msra.mxu1 %v4556_v47  ;;  %v3197_v57 = vand.u32 31, %v3195_v45  ;;  %4660 = vcosq.f32 %v2959_v54  ;;  %v3047_v37 = vsub.s32 32, %v3046_v12  ;;  %v3051_v14 = vsub.s32 4294967266, %v3046_v12 }
 0x327   :  { %3716 = vmatprep.subr.bf16.mxu1 %v8316_v34  ;;  %v7266_v23 = vshrl.u32 %v3140_v52, 30  ;;  %4662 = vsinq.f32 %v2959_v54  ;;  %v7269_v4 = vadd.s32 %v7197_v3, %v7213_v18  ;;  %v7273_v56 = vand.u32 8388607, %v8312_v43 }
 0x328   :  { %v3198_v60 = vsub.s32 32, %v3197_v57  ;;  %v3049_v38 = vshrl.u32 %v3031_v41, %v3047_v37  ;;  %v3052_v63 = vadd.s32 127, %v3051_v14  ;;  %v7276_v39 = vshll.u32 %v3191_v20, 8 }
 0x329   :  { %v3142_v29 = vshll.u32 %v7266_v23, 30  ;;  %v3048_v47 = vshll.u32 %v7192_v0, %v3046_v12  ;;  %v3206_v3 = vshll.u32 %v8358_v59, %v3197_v57  ;;  %v4325_v61 = vadd.s32 4294967169, %v3291_v26 }
 0x32a   :  { %3717 = vmatpush1.bf16.msra.mxu1 %v4557_v58  ;;  %v3207_v18 = vshrl.u32 %v8351_v35, %v3198_v60  ;;  %v7285_v11 = vpop.eup %4650  ;;  %v3053_v8 = vshll.u32 %v3052_v63, 23  ;;  %v3201_v54 = vshrl.u32 %v8356_v22, %v3198_v60  ;;  %v3204_v52 = vshrl.u32 %v8358_v59, %v3198_v60  ;;  %v4559_v63 = vld [vmem:[%s8148_s3 + $0x18] sm:$0xff]  }
 0x32b   :  { %3718 = vmatprep.subr.bf16.mxu1 %v8316_v34  ;;  %8556 = vst [vmem:[#allocation98_spill] sm:$0xff] %v7285_v11  ;;  %v7287_v48 = vsub.s32 %v3139_v50, %v3142_v29  ;;  %v7291_v20 = vpop.eup %4652  ;;  %v3050_v58 = vor.u32 %v3049_v38, %v3048_v47  ;;  %v7294_v0 = vshrl.u32 %v3195_v45, 5  ;;  %v3200_v41 = vshll.u32 %v8353_v2, %v3197_v57 }
 0x32c   :  { %v3054_v26 = vor.u32 4788187, %v3053_v8  ;;  %v3203_v50 = vshll.u32 %v8356_v22, %v3197_v57  ;;  %v3208_v14 = vor.u32 %v3207_v18, %v3206_v3  ;;  %v3209_v38 = vshll.u32 %v8351_v35, %v3197_v57 }
 0x32d   :  { %v3145_v37 = vsub.s32 0, %v7287_v48  ;;  %v3210_v45 = vshrl.u32 %v8359_v9, %v3198_v60  ;;  %v3212_v29 = vshll.u32 %v8359_v9, %v3197_v57  ;;  %v3213_v47 = vshrl.u32 %v8352_v46, %v3198_v60 }
 0x32e   :  { %3719 = vmatpush1.bf16.msra.mxu1 %v4558_v5  ;;  %v7308_v8 = vpop.eup %4654  ;;  %v3055_v36 = vand.u32 2147483647, %v3054_v26  ;;  %v3202_v5 = vor.u32 %v3201_v54, %v3200_v41  ;;  %v3205_v18 = vor.u32 %v3204_v52, %v3203_v50  ;;  %v3057_v13 = vcvt.s32.f32 %v3050_v58  ;;  %v4560_v58 = vld [vmem:[%s8148_s3 + $0x10] sm:$0xff]  }
 0x32f   :  { %3720 = vmatprep.subr.bf16.mxu1 %v8316_v34  ;;  %v4318_v3 = vmin.u32 %v3145_v37, %v7287_v48  ;;  %v7311_v43 = vpop.eup %4656  ;;  %v3211_v12 = vor.u32 %v3210_v45, %v3209_v38  ;;  %v3214_v28 = vor.u32 %v3213_v47, %v3212_v29  ;;  %vm3218_vm6 = vcmp.lt.s32.totalorder %v7294_v0, 4  ;;  %v266_v47 = vpop.f32.mrf.mxu0 }
 0x330   :  { %8557 = vst [vmem:[#allocation99_spill] sm:$0xff] %v7311_v43  ;;  %v7314_v6 = vpop.eup %4658  ;;  %v8559_v57 = vand.u32 2147483647, %v6969_v55  ;;  %v3165_v37 = vsub.s32 4, %v7266_v23  ;;  %v3199_v54 = vshrl.u32 %v8353_v2, %v3198_v60  ;;  %v3220_v52 = vsel %vm3218_vm6, %v3208_v14, 2102212464 }
 0x331   :  { %8558 = vst [vmem:[#allocation100_spill] sm:$0xff] %v7314_v6  ;;  %v3147_v26 = vclz %v4318_v3  ;;  %v3058_v41 = vmul.f32 %v3057_v13, %v3055_v36  ;;  %vm3215_vm5 = vcmp.lt.s32.totalorder %v7294_v0, 1  ;;  %vm3217_vm0 = vcmp.lt.s32.totalorder %v7294_v0, 3 }
 0x332   :  { %vm7318_vm13 = vcmp.le.f32.partialorder %v8559_v57, 0.7853982  ;;  %3721 = vmatpush1.bf16.msra.mxu1 %v4559_v63  ;;  %v3224_v50 = vsel %vm3218_vm6, %v3211_v12, 920167782  ;;  %v8562_v38 = vmov 0   ;;  %v3223_v45 = vsel %vm3215_vm5, %v3202_v5, %v3205_v18 }
 0x333   :  { %3722 = vmatprep.subr.bf16.mxu1 %v8562_v38  ;;  %v4319_v60 = vadd.s32 4294967294, %v3147_v26  ;;  %v3225_v63 = vsel %vm3217_vm0, %v3208_v14, %v3224_v50  ;;  %v3227_v29 = vsel %vm3215_vm5, %v3205_v18, %v3208_v14  ;;  %v7337_v3 = vpop.eup %4660  ;;  %v3219_v57 = vsel %vm3215_vm5, %v3199_v54, %v3202_v5  ;;  %v4561_v5 = vld [vmem:[%s8148_s3 + $0x8] sm:$0xff]   ;;  %v268_v50 = vpop.f32.mrf.mxu0 }
 0x334   :  { %v3221_v36 = vsel %vm3217_vm0, %v3205_v18, %v3220_v52  ;;  %v3228_v13 = vsel %vm3218_vm6, %v3214_v28, 1326507024  ;;  %v3297_v43 = vadd.s32 1, %v4325_v61  ;;  %v7343_v6 = vpop.eup %4662  ;;  %vm8563_vm2 = vcmp.lt.s32.totalorder %v6969_v55, 0 }
 0x335   :  { %vm4320_vm1 = vcmp.lt.s32.totalorder %v4319_v60, 0  ;;  %v7348_v26 = vsel %vm8563_vm2, %v3165_v37, %v7266_v23  ;;  %vm3216_vm10 = vcmp.lt.s32.totalorder %v7294_v0, 2  ;;  %v3229_v14 = vsel %vm3217_vm0, %v3211_v12, %v3228_v13 }
 0x336   :  { %3723 = vmatpush1.bf16.msra.mxu1 %v4560_v58  ;;  %v3150_v28 = vsel %vm4320_vm1, 0, %v4319_v60  ;;  %v3226_v61 = vsel %vm3216_vm10, %v3223_v45, %v3225_v63  ;;  %v3230_v18 = vsel %vm3216_vm10, %v3227_v29, %v3229_v14  ;;  %vm3298_vm6 = vcmp.gt.s32.totalorder %v3297_v43, 0 }
 0x337   :  { %3724 = vmatprep.subr.bf16.mxu1 %v8562_v38  ;;  %v3059_v54 = vxor.u32 2147483648, %v3058_v41  ;;  %v3151_v52 = vsub.s32 32, %v3150_v28  ;;  %v3155_v23 = vsub.s32 4294967266, %v3150_v28  ;;  %v3222_v37 = vsel %vm3216_vm10, %v3219_v57, %v3221_v36 }
 0x338   :  { %v3152_v10 = vshll.u32 %v7287_v48, %v3150_v28  ;;  %v7359_v0 = vmul.u32.u64.low %v7276_v39, %v3230_v18  ;;  %v7360_v12 = vmul.u32.u64.high %v7276_v39, %v3230_v18, %v7359_v0  ;;  %v3299_v58 = vsel %vm3298_vm6, %v3297_v43, 0  ;;  %v4562_v48 = vld [vmem:[%s8148_s3] sm:$0xff]  }
 0x339   :  { %v8564_v13 = vand.u32 2147483647, %v6777_v16  ;;  %v8565_v60 = vmov 0  ;;  %v3153_v45 = vshrl.u32 %v7269_v4, %v3151_v52  ;;  %v3156_v63 = vadd.s32 127, %v3155_v23 }
 0x33a   :  { %v7370_v29 = vmul.u32.u64.low %v7276_v39, %v3226_v61  ;;  %v7371_v57 = vmul.u32.u64.high %v7276_v39, %v3226_v61, %v7370_v29  ;;  %3725 = vmatpush1.bf16.msra.mxu1 %v4561_v5  ;;  %v3301_v36 = vand.u32 31, %v3299_v58  ;;  %v7381_v14 = vadd.f32 %v266_v47, %v4876_v24 }
 0x33b   :  { %vm7364_vm2 = vcmp.le.f32.partialorder %v8564_v13, 0.7853982  ;;  %v7384_v4 = vadd.f32 %v268_v50, %v4878_v25  ;;  %3726 = vmatprep.subr.bf16.mxu1 %v8562_v38  ;;  %vm8568_vm10 = vcmp.lt.s32.totalorder %v6777_v16, 0  ;;  %v3154_v28 = vor.u32 %v3153_v45, %v3152_v10  ;;  %v4563_v10 = vld [vmem:[%s8148_s3 + $0x40] sm:$0xff]  }
 0x33c   :  { %v8566_v60 = vsel %vm7364_vm2, 4294967295, %v8565_v60  ;;  %v3060_v5 = vsel %vm8568_vm10, %v3059_v54, %v3058_v41  ;;  %v3157_v61 = vshll.u32 %v3156_v63, 23  ;;  %v3238_v18 = vmul.u32 %v7276_v39, %v3222_v37 }
 0x33d   :  { %8567 = vst [vmem:[#allocation101_spill] sm:$0xff] %v8566_v60  ;;  %vm3240_vm0 = vc.u32 %v7360_v12, %v7370_v29  ;;  %v7392_v52 = vshrl.u32 %v3299_v58, 5  ;;  %v3302_v23 = vsub.s32 32, %v3301_v36  ;;  %v8569_v24 = vor.u32 8388608, %v7273_v56 }
 0x33e   :  { %v3158_v25 = vor.u32 4788187, %v3157_v61  ;;  %v3161_v50 = vcvt.s32.f32 %v3154_v28  ;;  %v3241_v0 = vadd.s32 1, %v7371_v57  ;;  %v3304_v41 = vshll.u32 %v8353_v2, %v3301_v36  ;;  %3727 = vmatpush1.bf16.msra.mxu1 %v4562_v48 }
 0x33f   :  { %v7396_v47 = vshll.u32 %v8569_v24, 8  ;;  %v3305_v39 = vshrl.u32 %v8356_v22, %v3302_v23  ;;  %v3307_v54 = vshll.u32 %v8356_v22, %v3301_v36  ;;  %v3308_v37 = vshrl.u32 %v8358_v59, %v3302_v23  ;;  %3742 = vmatprep.subr.bf16.mxu1 %v8562_v38 }
 0x340   :  { %v3310_v56 = vshll.u32 %v8358_v59, %v3301_v36  ;;  %v3159_v58 = vand.u32 2147483647, %v3158_v25  ;;  %v3242_v13 = vsel %vm3240_vm0, %v3241_v0, %v7371_v57  ;;  %v3311_v45 = vshrl.u32 %v8351_v35, %v3302_v23 }
 0x341   :  { %v3313_v63 = vshll.u32 %v8351_v35, %v3301_v36  ;;  %v3243_v48 = vadd.s32 %v3242_v13, %v3238_v18  ;;  %v3306_v28 = vor.u32 %v3305_v39, %v3304_v41  ;;  %v3309_v61 = vor.u32 %v3308_v37, %v3307_v54 }
 0x342   :  { %v3314_v24 = vshrl.u32 %v8359_v9, %v3302_v23  ;;  %v3162_v43 = vmul.f32 %v3161_v50, %v3159_v58  ;;  %v3312_v62 = vor.u32 %v3311_v45, %v3310_v56  ;;  %v3316_v19 = vshll.u32 %v8359_v9, %v3301_v36  ;;  %3743 = vmatpush2.bf16.msra.mxu1 %v4563_v10 }
 0x343   :  { %v3317_v38 = vshrl.u32 %v8352_v46, %v3302_v23  ;;  %v3063_v57 = vsel %vm7364_vm2, %v6777_v16, %v3060_v5  ;;  %v3244_v25 = vadd.s32 536870912, %v3243_v48  ;;  %v8327_v11 = vand.u32 2147483647, %v7381_v14 }
 0x344   :  { %v3315_v0 = vor.u32 %v3314_v24, %v3313_v63  ;;  %v3163_v18 = vxor.u32 2147483648, %v3162_v43  ;;  %vm3319_vm1 = vcmp.lt.s32.totalorder %v7392_v52, 1  ;;  %v3394_v50 = vand.u32 2139095040, %v7381_v14 }
 0x345   :  { %v3318_v41 = vor.u32 %v3317_v38, %v3316_v19  ;;  %v7423_v39 = vshrl.u32 %v3244_v25, 30  ;;  %v3303_v36 = vshrl.u32 %v8353_v2, %v3302_v23  ;;  %vm3322_vm5 = vcmp.lt.s32.totalorder %v7392_v52, 4 }
 0x346   :  { %v3327_v10 = vsel %vm3319_vm1, %v3306_v28, %v3309_v61  ;;  %vm8571_vm6 = vcmp.lt.s32.totalorder %v6969_v55, 0  ;;  %vm3321_vm10 = vcmp.lt.s32.totalorder %v7392_v52, 3  ;;  %v3324_v54 = vsel %vm3322_vm5, %v3312_v62, 2102212464 }
 0x347   :  { %8570 = vst [vmem:[#allocation102_spill] sm:$0xff] %v7423_v39  ;;  %v3164_v5 = vsel %vm8571_vm6, %v3163_v18, %v3162_v43  ;;  %v3328_v37 = vsel %vm3322_vm5, %v3315_v0, 920167782  ;;  %v3246_v19 = vshll.u32 %v7423_v39, 30  ;;  %vm3320_vm0 = vcmp.lt.s32.totalorder %v7392_v52, 2 }
 0x348   :  { %v3329_v56 = vsel %vm3321_vm10, %v3312_v62, %v3328_v37  ;;  %v3331_v58 = vsel %vm3319_vm1, %v3309_v61, %v3312_v62  ;;  %4664 = vcosq.f32 %v3063_v57  ;;  %v3323_v13 = vsel %vm3319_vm1, %v3303_v36, %v3306_v28 }
 0x349   :  { %v3330_v23 = vsel %vm3320_vm0, %v3327_v10, %v3329_v56  ;;  %v3332_v45 = vsel %vm3322_vm5, %v3318_v41, 1326507024  ;;  %v3167_v43 = vsel %vm7318_vm13, %v6969_v55, %v3164_v5  ;;  %v7437_v63 = vsub.s32 %v3243_v48, %v3246_v19 }
 0x34a   :  { %v3325_v24 = vsel %vm3321_vm10, %v3309_v61, %v3324_v54  ;;  %v3333_v38 = vsel %vm3321_vm10, %v3315_v0, %v3332_v45  ;;  %v7442_v18 = vmul.u32.u64.low %v7396_v47, %v3330_v23  ;;  %v7443_v62 = vmul.u32.u64.high %v7396_v47, %v3330_v23, %v7442_v18 }
 0x34b   :  { %v3334_v25 = vsel %vm3320_vm0, %v3331_v58, %v3333_v38  ;;  %v3395_v28 = vshrl.u32 %v3394_v50, 23  ;;  %v3249_v36 = vsub.s32 0, %v7437_v63  ;;  %v3398_v48 = vand.u32 8388607, %v8327_v11 }
 0x34c   :  { %v7447_v41 = vmul.u32.u64.low %v7396_v47, %v3334_v25  ;;  %v7448_v10 = vmul.u32.u64.high %v7396_v47, %v3334_v25, %v7447_v41  ;;  %v3326_v61 = vsel %vm3320_vm0, %v3323_v13, %v3325_v24  ;;  %v8328_v5 = vand.u32 2147483647, %v7384_v4 }
 0x34d   :  { %v4329_v0 = vadd.s32 4294967169, %v3395_v28  ;;  %v3498_v54 = vand.u32 2139095040, %v7384_v4  ;;  %v8572_v50 = vsel %vm7182_vm4, 0, %v7237_v1  ;;  %4666 = vsinq.f32 %v3063_v57 }
 0x34e   :  { %v7460_v37 = vadd.s32 3, %v8572_v50  ;;  %v4322_v19 = vmin.u32 %v3249_v36, %v7437_v63  ;;  %v8573_v56 = vand.u32 2147483647, %v4886_v31  ;;  %4668 = vcosq.f32 %v3167_v43 }
 0x34f   :  { %v8576_v52 = vsel %vm7318_vm13, 0, %v7348_v26  ;;  %v3345_v15 = vadd.s32 1, %v7443_v62  ;;  %v3401_v1 = vadd.s32 1, %v4329_v0  ;;  %v3342_v57 = vmul.u32 %v7396_v47, %v3326_v61 }
 0x350   :  { %vm7465_vm1 = vcmp.le.f32.partialorder %v8573_v56, 0.7853982  ;;  %v7473_v13 = vadd.s32 3, %v8576_v52  ;;  %v3251_v23 = vclz %v4322_v19  ;;  %vm3344_vm4 = vc.u32 %v7448_v10, %v7442_v18 }
 0x351   :  { %v3399_v45 = vor.u32 8388608, %v3398_v48  ;;  %v3346_v24 = vsel %vm3344_vm4, %v3345_v15, %v7443_v62  ;;  %vm3402_vm5 = vcmp.gt.s32.totalorder %v3401_v1, 0  ;;  %v3499_v38 = vshrl.u32 %v3498_v54, 23 }
 0x352   :  { %v7481_v34 = vand.u32 8388607, %v8328_v5  ;;  %v4323_v26 = vadd.s32 4294967294, %v3251_v23  ;;  %v3347_v25 = vadd.s32 %v3346_v24, %v3342_v57  ;;  %v3403_v28 = vsel %vm3402_vm5, %v3401_v1, 0 }
 0x353   :  { %v461_v36 = vsub.s32 4, %v5008_v49  ;;  %4670 = vsinq.f32 %v3167_v43  ;;  %v3239_v47 = vadd.s32 %v7370_v29, %v7360_v12  ;;  %v3405_v41 = vand.u32 31, %v3403_v28 }
 0x354   :  { %v7490_v62 = vsel %vm7465_vm1, %v4886_v31, %v5355_v40  ;;  %vm4324_vm13 = vcmp.lt.s32.totalorder %v4323_v26, 0  ;;  %v7493_v48 = vadd.s32 %v7442_v18, %v7448_v10  ;;  %v3348_v61 = vadd.s32 536870912, %v3347_v25 }
 0x355   :  { %v7495_v0 = vshll.u32 %v3399_v45, 8  ;;  %v3254_v54 = vsel %vm4324_vm13, 0, %v4323_v26  ;;  %v3406_v50 = vsub.s32 32, %v3405_v41  ;;  %v4333_v43 = vadd.s32 4294967169, %v3499_v38  ;;  %v7498_v12 = vpop.eup %4664 }
 0x356   :  { %8577 = vst [vmem:[#allocation103_spill] sm:$0xff] %v7498_v12  ;;  %v3255_v29 = vsub.s32 32, %v3254_v54  ;;  %v3259_v56 = vsub.s32 4294967266, %v3254_v54  ;;  %v7500_v52 = vshrl.u32 %v3348_v61, 30  ;;  %vm8578_vm6 = vcmp.lt.s32.totalorder %v4886_v31, 0 }
 0x357   :  { %v7505_v40 = vsel %vm8578_vm6, %v461_v36, %v5008_v49  ;;  %v3404_v18 = vshrl.u32 %v3403_v28, 5  ;;  %v3408_v10 = vshll.u32 %v8353_v2, %v3405_v41  ;;  %v3409_v15 = vshrl.u32 %v8356_v22, %v3406_v50 }
 0x358   :  { %v3412_v1 = vshrl.u32 %v8358_v59, %v3406_v50  ;;  %v3256_v23 = vshll.u32 %v7437_v63, %v3254_v54  ;;  %v3257_v57 = vshrl.u32 %v3239_v47, %v3255_v29  ;;  %v3260_v45 = vadd.s32 127, %v3259_v56 }
 0x359   :  { %v3350_v24 = vshll.u32 %v7500_v52, 30  ;;  %v3411_v38 = vshll.u32 %v8356_v22, %v3405_v41  ;;  %v3414_v26 = vshll.u32 %v8358_v59, %v3405_v41  ;;  %v3415_v49 = vshrl.u32 %v8351_v35, %v3406_v50 }
 0x35a   :  { %v7515_v36 = vadd.s32 1, %v4333_v43  ;;  %v3258_v28 = vor.u32 %v3257_v57, %v3256_v23  ;;  %v3261_v61 = vshll.u32 %v3260_v45, 23  ;;  %v3410_v5 = vor.u32 %v3409_v15, %v3408_v10  ;;  %v7519_v19 = vpop.eup %4666 }
 0x35b   :  { %v7517_v11 = vsub.s32 %v3347_v25, %v3350_v24  ;;  %8579 = vst [vmem:[#allocation104_spill] sm:$0xff] %v7519_v19  ;;  %v3413_v63 = vor.u32 %v3412_v1, %v3411_v38  ;;  %v3416_v47 = vor.u32 %v3415_v49, %v3414_v26  ;;  %v3417_v54 = vshll.u32 %v8351_v35, %v3405_v41  ;;  %v7523_v56 = vpop.eup %4668 }
 0x35c   :  { %v3418_v29 = vshrl.u32 %v8359_v9, %v3406_v50  ;;  %v3262_v39 = vor.u32 4788187, %v3261_v61  ;;  %v3407_v43 = vshrl.u32 %v8353_v2, %v3406_v50  ;;  %v3420_v23 = vshll.u32 %v8359_v9, %v3405_v41 }
 0x35d   :  { %v3353_v12 = vsub.s32 0, %v7517_v11  ;;  %v3265_v25 = vcvt.s32.f32 %v3258_v28  ;;  %v3421_v15 = vshrl.u32 %v8352_v46, %v3406_v50  ;;  %vm3423_vm0 = vcmp.lt.s32.totalorder %v3404_v18, 1 }
 0x35e   :  { %v3419_v10 = vor.u32 %v3418_v29, %v3417_v54  ;;  %v3263_v1 = vand.u32 2147483647, %v3262_v39  ;;  %vm3424_vm5 = vcmp.lt.s32.totalorder %v3404_v18, 2  ;;  %vm3426_vm13 = vcmp.lt.s32.totalorder %v3404_v18, 4 }
 0x35f   :  { %v4326_v57 = vmin.u32 %v3353_v12, %v7517_v11  ;;  %v3422_v45 = vor.u32 %v3421_v15, %v3420_v23  ;;  %vm3425_vm6 = vcmp.lt.s32.totalorder %v3404_v18, 3  ;;  %v3428_v24 = vsel %vm3426_vm13, %v3416_v47, 2102212464 }
 0x360   :  { %v3431_v38 = vsel %vm3423_vm0, %v3410_v5, %v3413_v63  ;;  %v7533_v41 = vpop.eup %4670  ;;  %v3266_v26 = vmul.f32 %v3265_v25, %v3263_v1  ;;  %v8580_v49 = vand.u32 2147483647, %v7226_v7  ;;  %v3427_v39 = vsel %vm3423_vm0, %v3407_v43, %v3410_v5 }
 0x361   :  { %v3355_v28 = vclz %v4326_v57  ;;  %v3432_v12 = vsel %vm3426_vm13, %v3419_v10, 920167782  ;;  %v8583_v61 = vand.u32 2147483647, %v7080_v17  ;;  %v8584_v54 = vmov 0 }
 0x362   :  { %vm7537_vm10 = vcmp.le.f32.partialorder %v8580_v49, 0.7853982  ;;  %v3429_v29 = vsel %vm3425_vm6, %v3413_v63, %v3428_v24  ;;  %v3433_v23 = vsel %vm3425_vm6, %v3416_v47, %v3432_v12  ;;  %v3435_v25 = vsel %vm3423_vm0, %v3413_v63, %v3416_v47 }
 0x363   :  { %vm7544_vm4 = vcmp.le.f32.partialorder %v8583_v61, 0.7853982  ;;  %v3436_v15 = vsel %vm3426_vm13, %v3422_v45, 1326507024  ;;  %v4327_v1 = vadd.s32 4294967294, %v3355_v28  ;;  %v3373_v49 = vsub.s32 4, %v7500_v52 }
 0x364   :  { %v8585_v54 = vsel %vm7544_vm4, 4294967295, %v8584_v54  ;;  %v3434_v57 = vsel %vm3424_vm5, %v3431_v38, %v3433_v23  ;;  %v3437_v5 = vsel %vm3425_vm6, %v3419_v10, %v3436_v15  ;;  %v3267_v43 = vxor.u32 2147483648, %v3266_v26 }
 0x365   :  { %v3438_v61 = vsel %vm3424_vm5, %v3435_v25, %v3437_v5  ;;  %v7556_v19 = vmul.u32.u64.low %v7495_v0, %v3434_v57  ;;  %v7557_v60 = vmul.u32.u64.high %v7495_v0, %v3434_v57, %v7556_v19  ;;  %vm4328_vm2 = vcmp.lt.s32.totalorder %v4327_v1, 0 }
 0x366   :  { %v3430_v24 = vsel %vm3424_vm5, %v3427_v39, %v3429_v29  ;;  %v7562_v63 = vmul.u32.u64.low %v7495_v0, %v3438_v61  ;;  %v7563_v47 = vmul.u32.u64.high %v7495_v0, %v3438_v61, %v7562_v63  ;;  %v3358_v45 = vsel %vm4328_vm2, 0, %v4327_v1 }
 0x367   :  { %vm3506_vm0 = vcmp.gt.s32.totalorder %v7515_v36, 0  ;;  %v8586_v10 = vor.u32 8388608, %v7481_v34  ;;  %v464_v28 = vsel %vm7465_vm1, 0, %v7505_v40  ;;  %v3359_v12 = vsub.s32 32, %v3358_v45 }
 0x368   :  { %v3363_v23 = vsub.s32 4294967266, %v3358_v45  ;;  %vm8587_vm5 = vcmp.lt.s32.totalorder %v7226_v7, 0  ;;  %4672 = vcosq.f32 %v7490_v62  ;;  %vm8588_vm2 = vcmp.lt.s32.totalorder %v7080_v17, 0 }
 0x369   :  { %v7568_v38 = vshll.u32 %v8586_v10, 8  ;;  %v3374_v18 = vsel %vm8587_vm5, %v3373_v49, %v7500_v52  ;;  %v3268_v39 = vsel %vm8588_vm2, %v3267_v43, %v3266_v26  ;;  %v3446_v29 = vmul.u32 %v7495_v0, %v3430_v24 }
 0x36a   :  { %v3449_v34 = vadd.s32 1, %v7557_v60  ;;  %v3507_v25 = vsel %vm3506_vm0, %v7515_v36, 0  ;;  %v3360_v58 = vshll.u32 %v7517_v11, %v3358_v45  ;;  %v3361_v40 = vshrl.u32 %v7493_v48, %v3359_v12 }
 0x36b   :  { %v3364_v15 = vadd.s32 127, %v3363_v23  ;;  %vm3448_vm1 = vc.u32 %v7563_v47, %v7556_v19  ;;  %v3376_v52 = vsel %vm7537_vm10, 0, %v3374_v18  ;;  %v3509_v26 = vand.u32 31, %v3507_v25 }
 0x36c   :  { %v3450_v1 = vsel %vm3448_vm1, %v3449_v34, %v7557_v60  ;;  %4674 = vsinq.f32 %v7490_v62  ;;  %v7593_v0 = vsel %vm7544_vm4, %v7080_v17, %v3268_v39  ;;  %v3362_v11 = vor.u32 %v3361_v40, %v3360_v58 }
 0x36d   :  { %v3365_v36 = vshll.u32 %v3364_v15, 23  ;;  %v3451_v48 = vadd.s32 %v3450_v1, %v3446_v29  ;;  %v3508_v49 = vshrl.u32 %v3507_v25, 5  ;;  %v3510_v57 = vsub.s32 32, %v3509_v26 }
 0x36e   :  { %v3512_v5 = vshll.u32 %v8353_v2, %v3509_v26  ;;  %v3515_v43 = vshll.u32 %v8356_v22, %v3509_v26  ;;  %v3369_v24 = vcvt.s32.f32 %v3362_v11  ;;  %v3518_v63 = vshll.u32 %v8358_v59, %v3509_v26 }
 0x36f   :  { %v3366_v61 = vor.u32 4788187, %v3365_v36  ;;  %v3452_v60 = vadd.s32 536870912, %v3451_v48  ;;  %v3513_v62 = vshrl.u32 %v8356_v22, %v3510_v57  ;;  %v3516_v45 = vshrl.u32 %v8358_v59, %v3510_v57 }
 0x370   :  { %v3519_v10 = vshrl.u32 %v8351_v35, %v3510_v57  ;;  %v3521_v12 = vshll.u32 %v8351_v35, %v3509_v26  ;;  %v3522_v39 = vshrl.u32 %v8359_v9, %v3510_v57  ;;  %v3524_v29 = vshll.u32 %v8359_v9, %v3509_v26 }
 0x371   :  { %v3367_v23 = vand.u32 2147483647, %v3366_v61  ;;  %v7602_v18 = vshrl.u32 %v3452_v60, 30  ;;  %v3514_v34 = vor.u32 %v3513_v62, %v3512_v5  ;;  %v3517_v25 = vor.u32 %v3516_v45, %v3515_v43 }
 0x372   :  { %v3520_v58 = vor.u32 %v3519_v10, %v3518_v63  ;;  %v3525_v40 = vshrl.u32 %v8352_v46, %v3510_v57  ;;  %v7607_v22 = vadd.s32 3, %v3376_v52  ;;  %v3523_v1 = vor.u32 %v3522_v39, %v3521_v12 }
 0x373   :  { %v3370_v15 = vmul.f32 %v3369_v24, %v3367_v23  ;;  %v3454_v59 = vshll.u32 %v7602_v18, 30  ;;  %4676 = vcosq.f32 %v7593_v0  ;;  %vm3530_vm13 = vcmp.lt.s32.totalorder %v3508_v49, 4 }
 0x374   :  { %v3526_v35 = vor.u32 %v3525_v40, %v3524_v29  ;;  %v468_v11 = vadd.s32 3, %v464_v28  ;;  %v3511_v9 = vshrl.u32 %v8353_v2, %v3510_v57  ;;  %vm3527_vm6 = vcmp.lt.s32.totalorder %v3508_v49, 1 }
 0x375   :  { %v7611_v36 = vsub.s32 %v3451_v48, %v3454_v59  ;;  %v3532_v26 = vsel %vm3530_vm13, %v3520_v58, 2102212464  ;;  %v4673_v5 = vpop.eup %4672  ;;  %v3371_v46 = vxor.u32 2147483648, %v3370_v15  ;;  %vm3529_vm0 = vcmp.lt.s32.totalorder %v3508_v49, 3 }
 0x376   :  { %v3535_v52 = vsel %vm3527_vm6, %v3514_v34, %v3517_v25  ;;  %v3536_v43 = vsel %vm3530_vm13, %v3523_v1, 920167782  ;;  %vm3528_vm5 = vcmp.lt.s32.totalorder %v3508_v49, 2  ;;  %v3539_v60 = vsel %vm3527_vm6, %v3517_v25, %v3520_v58 }
 0x377   :  { %v3457_v61 = vsub.s32 0, %v7611_v36  ;;  %v3537_v24 = vsel %vm3529_vm0, %v3520_v58, %v3536_v43  ;;  %v3531_v63 = vsel %vm3527_vm6, %v3511_v9, %v3514_v34  ;;  %v3533_v28 = vsel %vm3529_vm0, %v3517_v25, %v3532_v26 }
 0x378   :  { %v3538_v48 = vsel %vm3528_vm5, %v3535_v52, %v3537_v24  ;;  %v3540_v2 = vsel %vm3530_vm13, %v3526_v35, 1326507024  ;;  %v469_v10 = vand.u32 3, %v468_v11  ;;  %v475_v12 = vxor.u32 2147483648, %v4673_v5  ;;  %v4564_v52 = vld [vmem:[%s8149_s4 + $0x18] sm:$0xff]  }
 0x379   :  { %v4675_v57 = vpop.eup %4674  ;;  %v4330_v62 = vmin.u32 %v3457_v61, %v7611_v36  ;;  %v3541_v45 = vsel %vm3529_vm0, %v3523_v1, %v3540_v2  ;;  %vm8589_vm2 = vcmp.lt.s32.totalorder %v7226_v7, 0  ;;  %v3534_v25 = vsel %vm3528_vm5, %v3531_v63, %v3533_v28  ;;  %4395 = vmatprep.subr.bf16.mxu0 %v4564_v52 }
 0x37a   :  { %v3372_v23 = vsel %vm8589_vm2, %v3371_v46, %v3370_v15  ;;  %v3542_v39 = vsel %vm3528_vm5, %v3539_v60, %v3541_v45  ;;  %v7624_v29 = vmul.u32.u64.low %v7568_v38, %v3538_v48  ;;  %v7625_v58 = vmul.u32.u64.high %v7568_v38, %v3538_v48, %v7624_v29  ;;  %4396 = vmatpush3.bf16.msra.mxu0 %v4564_v52 }
 0x37b   :  { %v3459_v34 = vclz %v4330_v62  ;;  %v7629_v40 = vmul.u32.u64.low %v7568_v38, %v3542_v39  ;;  %v7630_v59 = vmul.u32.u64.high %v7568_v38, %v3542_v39, %v7629_v40  ;;  %vm471_vm13 = vcmp.eq.s32.totalorder %v469_v10, 0 }
 0x37c   :  { %v472_v1 = vxor.u32 2147483648, %v4675_v57  ;;  %v8590_v35 = vand.u32 2147483647, %v4905_v53  ;;  %vm474_vm0 = vcmp.eq.s32.totalorder %v469_v10, 2  ;;  %v669_v9 = vsub.s32 4, %v5089_v42 }
 0x37d   :  { %v4331_v11 = vadd.s32 4294967294, %v3459_v34  ;;  %v3447_v26 = vadd.s32 %v7556_v19, %v7563_v47  ;;  %v3553_v46 = vadd.s32 1, %v7625_v58  ;;  %v3375_v43 = vsel %vm7537_vm10, %v7226_v7, %v3372_v23 }
 0x37e   :  { %vm7634_vm6 = vcmp.le.f32.partialorder %v8590_v35, 0.7853982  ;;  %v3550_v61 = vmul.u32 %v7568_v38, %v3534_v25  ;;  %vm3552_vm2 = vc.u32 %v7630_v59, %v7624_v29  ;;  %v476_v24 = vsel %vm474_vm0, %v475_v12, %v4675_v57  ;;  %v8594_v57 = vld [vmem:[#allocation4_spill] sm:$0xff] }
 0x37f   :  { %v671_v49 = vsel %vm7634_vm6, %v4905_v53, %v5449_v27  ;;  %vm4332_vm5 = vcmp.lt.s32.totalorder %v4331_v11, 0  ;;  %v4565_v27 = vld [vmem:[%s8149_s4 + $0x10] sm:$0xff]   ;;  %v3554_v47 = vsel %vm3552_vm2, %v3553_v46, %v7625_v58  ;;  %vm8593_vm1 = vcmp.lt.s32.totalorder %v4905_v53, 0 }
 0x380   :  { %4678 = vcosq.f32 %v671_v49  ;;  %v3462_v19 = vsel %vm4332_vm5, 0, %v4331_v11  ;;  %v670_v60 = vsel %vm8593_vm1, %v669_v9, %v5089_v42  ;;  %v7661_v50 = vpop.eup %4676  ;;  %v3555_v38 = vadd.s32 %v3554_v47, %v3550_v61  ;;  %4397 = vmatprep.subr.bf16.mxu0 %v4565_v27  ;;  %v8602_v11 = vld [vmem:[#allocation6_spill] sm:$0xff] }
 0x381   :  { %v3463_v63 = vsub.s32 32, %v3462_v19  ;;  %v3467_v28 = vsub.s32 4294967266, %v3462_v19  ;;  %v473_v48 = vsel %vm471_vm13, %v4673_v5, %v472_v1  ;;  %v3464_v2 = vshll.u32 %v7611_v36, %v3462_v19  ;;  %v8596_v36 = vld [vmem:[#allocation2_spill] sm:$0xff]  ;;  %4398 = vmatpush3.bf16.msra.mxu0 %v4565_v27  ;;  %v8603_v27 = vld [vmem:[#allocation17_spill] sm:$0xff] }
 0x382   :  { %v672_v62 = vsel %vm7634_vm6, 0, %v670_v60  ;;  %4680 = vsinq.f32 %v671_v49  ;;  %v357_v45 = vsub.s32 4, %v8594_v57  ;;  %vm8335_vm10 = vcmp.lt.s32.totalorder %v7384_v4, 0 }
 0x383   :  { %v3465_v12 = vshrl.u32 %v3447_v26, %v3463_v63  ;;  %v3468_v42 = vadd.s32 127, %v3467_v28  ;;  %v3556_v23 = vadd.s32 536870912, %v3555_v38  ;;  %v676_v39 = vadd.s32 3, %v672_v62  ;;  %v8605_v63 = vld [vmem:[#allocation3_spill] sm:$0xff]  ;;  %v8608_v62 = vld [vmem:[#allocation22_spill] sm:$0xff] }
 0x384   :  { %4682 = vsinq.f32 %v7593_v0  ;;  %vm467_vm1 = vweird.f32 %v4886_v31  ;;  %vm8595_vm13 = vcmp.lt.s32.totalorder %v469_v10, 2  ;;  %vm8597_vm0 = vcmp.lt.s32.totalorder %v8596_v36, 0  ;;  %v8609_v10 = vld [vmem:[#allocation21_spill] sm:$0xff] }
 0x385   :  { %v477_v5 = vsel %vm8595_vm13, %v473_v48, %v476_v24  ;;  %v358_v58 = vsel %vm8597_vm0, %v357_v45, %v8594_v57  ;;  %4684 = vcosq.f32 %v3375_v43  ;;  %v3466_v34 = vor.u32 %v3465_v12, %v3464_v2 }
 0x386   :  { %v3469_v25 = vshll.u32 %v3468_v42, 23  ;;  %v3557_v40 = vshrl.u32 %v3556_v23, 30  ;;  %4686 = vsinq.f32 %v3375_v43  ;;  %v8598_v1 = vand.u32 2147483647, %v7384_v4 }
 0x387   :  { %v7682_v0 = vadd.s32 %v7624_v29, %v7630_v59  ;;  %v360_v15 = vsel %vm5197_vm12, 0, %v358_v58  ;;  %v565_v9 = vsub.s32 4, %v8602_v11  ;;  %vm8336_vm5 = vcmp.lt.s32.totalorder %v7381_v14, 0  ;;  %v8604_v29 = vld [vmem:[#allocation14_spill] sm:$0xff] }
 0x388   :  { %vm7677_vm6 = vcmp.le.f32.partialorder %v8598_v1, 0.7853982  ;;  %v3470_v49 = vor.u32 4788187, %v3469_v25  ;;  %v3558_v26 = vshll.u32 %v3557_v40, 30  ;;  %v7690_v46 = vsel %vm467_vm1, nan, %v477_v5 }
 0x389   :  { %v677_v52 = vand.u32 3, %v676_v39  ;;  %v3581_v43 = vsub.s32 4, %v3557_v40  ;;  %v364_v61 = vadd.s32 3, %v360_v15  ;;  %v368_v19 = vxor.u32 2147483648, %v8603_v27 }
 0x38a   :  { %v371_v59 = vxor.u32 2147483648, %v8604_v29  ;;  %v3471_v47 = vand.u32 2147483647, %v3470_v49  ;;  %v3473_v24 = vcvt.s32.f32 %v3466_v34  ;;  %v7694_v60 = vsub.s32 %v3555_v38, %v3558_v26 }
 0x38b   :  { %vm8606_vm12 = vcmp.lt.s32.totalorder %v8605_v63, 0  ;;  %v365_v31 = vand.u32 3, %v364_v61  ;;  %v576_v57 = vxor.u32 2147483648, %v8608_v62  ;;  %v7708_v23 = vsel %vm8335_vm10, %v3581_v43, %v3557_v40 }
 0x38c   :  { %v566_v28 = vsel %vm8606_vm12, %v565_v9, %v8602_v11  ;;  %v3474_v12 = vmul.f32 %v3473_v24, %v3471_v47  ;;  %v3561_v42 = vsub.s32 0, %v7694_v60  ;;  %vm679_vm1 = vcmp.eq.s32.totalorder %v677_v52, 0 }
 0x38d   :  { %v568_v2 = vsel %vm5347_vm15, 0, %v566_v28  ;;  %v4679_v45 = vpop.eup %4678  ;;  %vm367_vm2 = vcmp.eq.s32.totalorder %v365_v31, 0  ;;  %vm370_vm15 = vcmp.eq.s32.totalorder %v365_v31, 2  ;;  %vm366_vm13 = vcmp.lt.s32.totalorder %v365_v31, 2  ;;  %v8614_v28 = vld [vmem:[#allocation32_spill] sm:$0xff] }
 0x38e   :  { %v572_v38 = vadd.s32 3, %v568_v2  ;;  %v683_v39 = vxor.u32 2147483648, %v4679_v45  ;;  %v3475_v5 = vxor.u32 2147483648, %v3474_v12  ;;  %v4334_v58 = vmin.u32 %v3561_v42, %v7694_v60 }
 0x38f   :  { %v369_v34 = vsel %vm367_vm2, %v8604_v29, %v368_v19  ;;  %v372_v25 = vsel %vm370_vm15, %v371_v59, %v8603_v27  ;;  %v579_v15 = vxor.u32 2147483648, %v8609_v10  ;;  %v4681_v11 = vpop.eup %4680  ;;  %v3584_v40 = vsel %vm7677_vm6, 0, %v7708_v23  ;;  %v8610_v19 = vld [vmem:[#allocation27_spill] sm:$0xff] }
 0x390   :  { %v573_v1 = vand.u32 3, %v572_v38  ;;  %v3563_v9 = vclz %v4334_v58  ;;  %vm682_vm10 = vcmp.eq.s32.totalorder %v677_v52, 2  ;;  %v373_v49 = vsel %vm366_vm13, %v369_v34, %v372_v25 }
 0x391   :  { %v3476_v26 = vsel %vm8336_vm5, %v3475_v5, %v3474_v12  ;;  %v680_v43 = vxor.u32 2147483648, %v4681_v11  ;;  %v684_v61 = vsel %vm682_vm10, %v683_v39, %v4681_v11  ;;  %v885_v27 = vand.u32 3, %v8610_v19  ;;  %v7720_v29 = vpop.eup %4682  ;;  %v8623_v19 = vld [vmem:[#allocation38_spill] sm:$0xff] }
 0x392   :  { %v8611_v59 = vand.u32 2147483647, %v7381_v14  ;;  %v4335_v24 = vadd.s32 4294967294, %v3563_v9  ;;  %vm575_vm15 = vcmp.eq.s32.totalorder %v573_v1, 0  ;;  %vm578_vm12 = vcmp.eq.s32.totalorder %v573_v1, 2  ;;  %v7729_v48 = vpop.eup %4684 }
 0x393   :  { %v888_v31 = vxor.u32 2147483648, %v8614_v28  ;;  %v681_v2 = vsel %vm679_vm1, %v4679_v45, %v680_v43  ;;  %vm574_vm10 = vcmp.lt.s32.totalorder %v573_v1, 2  ;;  %v577_v12 = vsel %vm575_vm15, %v8609_v10, %v576_v57  ;;  %v7734_v38 = vpop.eup %4686 }
 0x394   :  { %vm7724_vm2 = vcmp.le.f32.partialorder %v8611_v59, 0.7853982  ;;  %v580_v42 = vsel %vm578_vm12, %v579_v15, %v8608_v62  ;;  %vm4336_vm13 = vcmp.lt.s32.totalorder %v4335_v24, 0  ;;  %vm8615_vm5 = vcmp.lt.s32.totalorder %v677_v52, 2  ;;  %v8619_v15 = vld [vmem:[#allocation31_spill] sm:$0xff]  ;;  %v8624_v59 = vld [vmem:[#allocation9_spill] sm:$0xff] }
 0x395   :  { %v685_v39 = vsel %vm8615_vm5, %v681_v2, %v684_v61  ;;  %vm8616_vm0 = vweird.f32 %v8596_v36  ;;  %v581_v58 = vsel %vm574_vm10, %v577_v12, %v580_v42  ;;  %v3566_v34 = vsel %vm4336_vm13, 0, %v4335_v24  ;;  %v8625_v12 = vld [vmem:[#allocation7_spill] sm:$0xff] }
 0x396   :  { %v374_v5 = vsel %vm8616_vm0, nan, %v373_v49  ;;  %vm8617_vm4 = vweird.f32 %v4905_v53  ;;  %vm8618_vm1 = vweird.f32 %v8605_v63  ;;  %vm886_vm8 = vcmp.lt.s32.totalorder %v885_v27, 2  ;;  %v8621_v63 = vld [vmem:[#allocation35_spill] sm:$0xff] }
 0x397   :  { %v686_v25 = vsel %vm8617_vm4, nan, %v685_v39  ;;  %v582_v45 = vsel %vm8618_vm1, nan, %v581_v58  ;;  %v3567_v57 = vsub.s32 32, %v3566_v34  ;;  %v3571_v1 = vsub.s32 4294967266, %v3566_v34 }
 0x398   :  { %v3600_v62 = vpack.c.bf16 %v686_v25, %v7690_v46  ;;  %vm887_vm12 = vcmp.eq.s32.totalorder %v885_v27, 0  ;;  %v3568_v52 = vshll.u32 %v7694_v60, %v3566_v34  ;;  %v3599_v10 = vpack.c.bf16 %v582_v45, %v374_v5  ;;  %v8622_v46 = vld [vmem:[#allocation40_spill] sm:$0xff]  ;;  %v8628_v45 = vld [vmem:[#allocation10_spill] sm:$0xff] }
 0x399   :  { %v889_v36 = vsel %vm887_vm12, %v8619_v15, %v888_v31  ;;  %v891_v11 = vxor.u32 2147483648, %v8619_v15  ;;  %v3569_v9 = vshrl.u32 %v7682_v0, %v3567_v57  ;;  %v3572_v53 = vadd.s32 127, %v3571_v1  ;;  %v8642_v57 = vld [vmem:[#allocation33_spill] sm:$0xff] }
 0x39a   :  { %vm8620_vm4 = vcmask 130048   ;;  %vm890_vm5 = vcmp.eq.s32.totalorder %v885_v27, 2  ;;  %v1093_v49 = vand.u32 3, %v8621_v63  ;;  %v1096_v61 = vxor.u32 2147483648, %v8622_v46  ;;  %v8632_v63 = vld [vmem:[#allocation13_spill] sm:$0xff] }
 0x39b   :  { %4346 = vmatprep.mubr.msk.bf16.mxu1 %vm8620_vm4, %v3600_v62  ;;  %v892_v43 = vsel %vm890_vm5, %v891_v11, %v8614_v28  ;;  %v1099_v60 = vxor.u32 2147483648, %v8623_v19  ;;  %v773_v24 = vsub.s32 4, %v8624_v59  ;;  %v3570_v31 = vor.u32 %v3569_v9, %v3568_v52  ;;  %v8626_v28 = vld [vmem:[#allocation5_spill] sm:$0xff]  ;;  %v8631_v9 = vld [vmem:[#allocation24_spill] sm:$0xff] }
 0x39c   :  { %3745 = vmatmul.mubr.bf16.vlgmr.msra.gmra.mxu1 %v3599_v10  ;;  %v3573_v2 = vshll.u32 %v3572_v53, 23  ;;  %vm883_vm0 = vweird.f32 %v8625_v12  ;;  %v893_v0 = vsel %vm886_vm8, %v889_v36, %v892_v43  ;;  %v3479_v42 = vsel %vm7724_vm2, %v7381_v14, %v3476_v26  ;;  %v8630_v36 = vld [vmem:[#allocation30_spill] sm:$0xff] }
 0x39d   :  { %vm1095_vm15 = vcmp.eq.s32.totalorder %v1093_v49, 0  ;;  %vm1098_vm10 = vcmp.eq.s32.totalorder %v1093_v49, 2  ;;  %vm8627_vm13 = vcmp.lt.s32.totalorder %v8626_v28, 0  ;;  %vm1094_vm1 = vcmp.lt.s32.totalorder %v1093_v49, 2 }
 0x39e   :  { %v774_v39 = vsel %vm8627_vm13, %v773_v24, %v8624_v59  ;;  %v3574_v5 = vor.u32 4788187, %v3573_v2  ;;  %v1097_v58 = vsel %vm1095_vm15, %v8623_v19, %v1096_v61  ;;  %v1100_v34 = vsel %vm1098_vm10, %v1099_v60, %v8622_v46  ;;  %v8634_v19 = vld [vmem:[#allocation8_spill] sm:$0xff]  ;;  %v8636_v59 = vld [vmem:[#allocation42_spill] sm:$0xff]  ;;  %v8637_v2 = vld [vmem:[#allocation49_spill] sm:$0xff] }
 0x39f   :  { %v894_v25 = vsel %vm883_vm0, nan, %v893_v0  ;;  %vm1091_vm12 = vweird.f32 %v8628_v45  ;;  %v1101_v27 = vsel %vm1094_vm1, %v1097_v58, %v1100_v34  ;;  %v776_v1 = vsel %vm5422_vm9, 0, %v774_v39  ;;  %vm8633_vm9 = vmmov %vm8620_vm4  ;;  %v8639_v39 = vld [vmem:[#allocation47_spill] sm:$0xff]  ;;  %v8640_v34 = vld [vmem:[#allocation34_spill] sm:$0xff] }
 0x3a0   :  { %v3575_v26 = vand.u32 2147483647, %v3574_v5  ;;  %v3577_v62 = vcvt.s32.f32 %v3570_v31  ;;  %v1102_v52 = vsel %vm1091_vm12, nan, %v1101_v27  ;;  %v780_v10 = vadd.s32 3, %v776_v1 }
 0x3a1   :  { %v3602_v15 = vpack.c.bf16 %v1102_v52, %v894_v25  ;;  %v784_v11 = vxor.u32 2147483648, %v8630_v36  ;;  %v787_v53 = vxor.u32 2147483648, %v8631_v9  ;;  %v981_v49 = vsub.s32 4, %v8632_v63 }
 0x3a2   :  { %4688 = vcosq.f32 %v3479_v42  ;;  %v3578_v43 = vmul.f32 %v3577_v62, %v3575_v26  ;;  %v7774_v46 = vadd.s32 3, %v3584_v40  ;;  %v781_v61 = vand.u32 3, %v780_v10  ;;  %v8643_v26 = vld [vmem:[#allocation16_spill] sm:$0xff] }
 0x3a3   :  { %4690 = vsinq.f32 %v3479_v42  ;;  %4347 = vmatprep.mubr.msk.bf16.mxu1 %vm8633_vm9, %v3602_v15  ;;  %vm779_vm8 = vweird.f32 %v8626_v28  ;;  %vm8635_vm4 = vcmp.lt.s32.totalorder %v8634_v19, 0  ;;  %v1301_v24 = vand.u32 3, %v8636_v59  ;;  %v8646_v59 = vld [vmem:[#allocation20_spill] sm:$0xff] }
 0x3a4   :  { %v982_v60 = vsel %vm8635_vm4, %v981_v49, %v8632_v63  ;;  %v3579_v31 = vxor.u32 2147483648, %v3578_v43  ;;  %vm783_vm5 = vcmp.eq.s32.totalorder %v781_v61, 0  ;;  %vm786_vm0 = vcmp.eq.s32.totalorder %v781_v61, 2 }
 0x3a5   :  { %v1304_v12 = vxor.u32 2147483648, %v8637_v2  ;;  %v785_v23 = vsel %vm783_vm5, %v8631_v9, %v784_v11  ;;  %v788_v40 = vsel %vm786_vm0, %v787_v53, %v8630_v36  ;;  %v984_v42 = vsel %vm5567_vm11, 0, %v982_v60  ;;  %v8644_v36 = vld [vmem:[#allocation56_spill] sm:$0xff] }
 0x3a6   :  { %v1307_v5 = vxor.u32 2147483648, %v8639_v39  ;;  %vm782_vm15 = vcmp.lt.s32.totalorder %v781_v61, 2  ;;  %vm987_vm10 = vweird.f32 %v8634_v19  ;;  %v988_v58 = vadd.s32 3, %v984_v42  ;;  %v8645_v61 = vld [vmem:[#allocation55_spill] sm:$0xff]  ;;  %v8649_v19 = vld [vmem:[#allocation12_spill] sm:$0xff] }
 0x3a7   :  { %v992_v25 = vxor.u32 2147483648, %v8640_v34  ;;  %vm8641_vm13 = vcmp.lt.s32.totalorder %v7384_v4, 0  ;;  %v789_v27 = vsel %vm782_vm15, %v785_v23, %v788_v40  ;;  %v995_v1 = vxor.u32 2147483648, %v8642_v57  ;;  %v8647_v23 = vld [vmem:[#allocation29_spill] sm:$0xff]  ;;  %v8648_v42 = vld [vmem:[#allocation23_spill] sm:$0xff] }
 0x3a8   :  { %v3580_v45 = vsel %vm8641_vm13, %v3579_v31, %v3578_v43  ;;  %vm1299_vm1 = vweird.f32 %v8643_v26  ;;  %v989_v62 = vand.u32 3, %v988_v58  ;;  %vm1302_vm12 = vcmp.lt.s32.totalorder %v1301_v24, 2 }
 0x3a9   :  { %vm1303_vm9 = vcmp.eq.s32.totalorder %v1301_v24, 0  ;;  %vm1306_vm11 = vcmp.eq.s32.totalorder %v1301_v24, 2  ;;  %v1509_v15 = vand.u32 3, %v6242_v21  ;;  %v1512_v11 = vxor.u32 2147483648, %v8644_v36 }
 0x3aa   :  { %v1305_v52 = vsel %vm1303_vm9, %v8639_v39, %v1304_v12  ;;  %v1308_v10 = vsel %vm1306_vm11, %v1307_v5, %v8637_v2  ;;  %v7801_v9 = vsel %vm7677_vm6, %v7384_v4, %v3580_v45  ;;  %v790_v53 = vsel %vm779_vm8, nan, %v789_v27  ;;  %v8652_v27 = vld [vmem:[#allocation18_spill] sm:$0xff] }
 0x3ab   :  { %vm991_vm4 = vcmp.eq.s32.totalorder %v989_v62, 0  ;;  %vm994_vm5 = vcmp.eq.s32.totalorder %v989_v62, 2  ;;  %vm990_vm0 = vcmp.lt.s32.totalorder %v989_v62, 2  ;;  %vm1511_vm15 = vcmp.eq.s32.totalorder %v1509_v15, 0  ;;  %v8654_v62 = vld [vmem:[#allocation46_spill] sm:$0xff] }
 0x3ac   :  { %v993_v63 = vsel %vm991_vm4, %v8642_v57, %v992_v25  ;;  %v996_v49 = vsel %vm994_vm5, %v995_v1, %v8640_v34  ;;  %v1309_v21 = vsel %vm1302_vm12, %v1305_v52, %v1308_v10  ;;  %v1513_v60 = vsel %vm1511_vm15, %v8645_v61, %v1512_v11  ;;  %v8664_v10 = vld [vmem:[#allocation41_spill] sm:$0xff] }
 0x3ad   :  { %v997_v43 = vsel %vm990_vm0, %v993_v63, %v996_v49  ;;  %v1515_v35 = vxor.u32 2147483648, %v8645_v61  ;;  %4692 = vcosq.f32 %v7801_v9  ;;  %vm1514_vm6 = vcmp.eq.s32.totalorder %v1509_v15, 2 }
 0x3ae   :  { %v998_v28 = vsel %vm987_vm10, nan, %v997_v43  ;;  %v1189_v31 = vsub.s32 4, %v8646_v59  ;;  %vm1510_vm8 = vcmp.lt.s32.totalorder %v1509_v15, 2  ;;  %v1397_v40 = vsub.s32 4, %v8647_v23 }
 0x3af   :  { %v3601_v2 = vpack.c.bf16 %v998_v28, %v790_v53  ;;  %v1516_v12 = vsel %vm1514_vm6, %v1515_v35, %v8644_v36  ;;  %v7816_v24 = vpop.eup %4688  ;;  %v1310_v0 = vsel %vm1299_vm1, nan, %v1309_v21  ;;  %vm1507_vm13 = vweird.f32 %v8648_v42  ;;  %v8656_v36 = vld [vmem:[#allocation45_spill] sm:$0xff]  ;;  %v8658_v21 = vld [vmem:[#allocation54_spill] sm:$0xff] }
 0x3b0   :  { %v1517_v39 = vsel %vm1510_vm8, %v1513_v60, %v1516_v12  ;;  %vm8650_vm10 = vcmp.lt.s32.totalorder %v8649_v19, 0  ;;  %v7824_v58 = vpop.eup %4690  ;;  %vm1195_vm12 = vweird.f32 %v8649_v19  ;;  %vm8653_vm9 = vcmp.lt.s32.totalorder %v8652_v27, 0  ;;  %v8659_v60 = vld [vmem:[#allocation52_spill] sm:$0xff] }
 0x3b1   :  { %v1190_v5 = vsel %vm8650_vm10, %v1189_v31, %v8646_v59  ;;  %3753 = vmatmul.mubr.bf16.gmra.mxu1 %v3601_v2  ;;  %v1518_v34 = vsel %vm1507_vm13, nan, %v1517_v39  ;;  %v1398_v57 = vsel %vm8653_vm9, %v1397_v40, %v8647_v23  ;;  %v1200_v52 = vxor.u32 2147483648, %v8654_v62  ;;  %v8660_v2 = vld [vmem:[#allocation72_spill] sm:$0xff] }
 0x3b2   :  { %v1192_v45 = vsel %vm5850_vm3, 0, %v1190_v5  ;;  %v3604_v1 = vpack.c.bf16 %v1518_v34, %v1310_v0  ;;  %v1400_v15 = vsel %vm5955_vm7, 0, %v1398_v57  ;;  %v1203_v11 = vxor.u32 2147483648, %v8656_v36  ;;  %v8661_v57 = vld [vmem:[#allocation68_spill] sm:$0xff] }
 0x3b3   :  { %v1196_v26 = vadd.s32 3, %v1192_v45  ;;  %v1404_v53 = vadd.s32 3, %v1400_v15  ;;  %v1717_v63 = vand.u32 3, %v6375_v51  ;;  %v1720_v49 = vxor.u32 2147483648, %v6431_v30  ;;  %v8665_v15 = vld [vmem:[#allocation26_spill] sm:$0xff] }
 0x3b4   :  { %vm8657_vm3 = vcmask 130048   ;;  %v1408_v61 = vxor.u32 2147483648, %v8658_v21  ;;  %v1411_v35 = vxor.u32 2147483648, %v8659_v60  ;;  %v1723_v28 = vxor.u32 2147483648, %v6426_v44 }
 0x3b5   :  { %4348 = vmatprep.mubr.msk.bf16.mxu1 %vm8657_vm3, %v3604_v1  ;;  %v1197_v43 = vand.u32 3, %v1196_v26  ;;  %v1405_v59 = vand.u32 3, %v1404_v53  ;;  %vm1719_vm1 = vcmp.eq.s32.totalorder %v1717_v63, 0  ;;  %v1925_v31 = vand.u32 3, %v6464_v33 }
 0x3b6   :  { %v1928_v12 = vxor.u32 2147483648, %v8660_v2  ;;  %vm1722_vm5 = vcmp.eq.s32.totalorder %v1717_v63, 2  ;;  %v1721_v40 = vsel %vm1719_vm1, %v6426_v44, %v1720_v49  ;;  %vm1403_vm6 = vweird.f32 %v8652_v27 }
 0x3b7   :  { %vm1198_vm7 = vcmp.lt.s32.totalorder %v1197_v43, 2  ;;  %vm1199_vm11 = vcmp.eq.s32.totalorder %v1197_v43, 0  ;;  %vm1202_vm4 = vcmp.eq.s32.totalorder %v1197_v43, 2  ;;  %vm1407_vm0 = vcmp.eq.s32.totalorder %v1405_v59, 0 }
 0x3b8   :  { %v1201_v51 = vsel %vm1199_vm11, %v8656_v36, %v1200_v52  ;;  %v1204_v23 = vsel %vm1202_vm4, %v1203_v11, %v8654_v62  ;;  %v1409_v42 = vsel %vm1407_vm0, %v8659_v60, %v1408_v61  ;;  %vm1410_vm15 = vcmp.eq.s32.totalorder %v1405_v59, 2  ;;  %v8663_v52 = vld [vmem:[#allocation28_spill] sm:$0xff]  ;;  %v8669_v61 = vld [vmem:[#allocation63_spill] sm:$0xff] }
 0x3b9   :  { %v1205_v0 = vsel %vm1198_vm7, %v1201_v51, %v1204_v23  ;;  %v1724_v39 = vsel %vm1722_vm5, %v1723_v28, %v6431_v30  ;;  %vm1406_vm8 = vcmp.lt.s32.totalorder %v1405_v59, 2  ;;  %v1412_v33 = vsel %vm1410_vm15, %v1411_v35, %v8658_v21  ;;  %v8662_v30 = vld [vmem:[#allocation37_spill] sm:$0xff]  ;;  %v8667_v11 = vld [vmem:[#allocation48_spill] sm:$0xff]  ;;  %v8670_v59 = vld [vmem:[#allocation59_spill] sm:$0xff] }
 0x3ba   :  { %vm1718_vm13 = vcmp.lt.s32.totalorder %v1717_v63, 2  ;;  %v1206_v5 = vsel %vm1195_vm12, nan, %v1205_v0  ;;  %v1413_v34 = vsel %vm1406_vm8, %v1409_v42, %v1412_v33  ;;  %vm1927_vm10 = vcmp.eq.s32.totalorder %v1925_v31, 0  ;;  %v7853_v45 = vpop.eup %4692  ;;  %v8673_v23 = vld [vmem:[#allocation60_spill] sm:$0xff]  ;;  %v8675_v0 = vld [vmem:[#allocation70_spill] sm:$0xff] }
 0x3bb   :  { %v1725_v25 = vsel %vm1718_vm13, %v1721_v40, %v1724_v39  ;;  %v1414_v44 = vsel %vm1403_vm6, nan, %v1413_v34  ;;  %v1929_v1 = vsel %vm1927_vm10, %v8661_v57, %v1928_v12  ;;  %v1931_v26 = vxor.u32 2147483648, %v8661_v57  ;;  %v8676_v39 = vld [vmem:[#allocation79_spill] sm:$0xff] }
 0x3bc   :  { %v1605_v62 = vsub.s32 4, %v8662_v30  ;;  %v3603_v27 = vpack.c.bf16 %v1414_v44, %v1206_v5  ;;  %vm1715_vm9 = vweird.f32 %v8663_v52  ;;  %vm1923_vm3 = vweird.f32 %v8664_v10  ;;  %v8679_v57 = vld [vmem:[#allocation67_spill] sm:$0xff] }
 0x3bd   :  { %vm1930_vm1 = vcmp.eq.s32.totalorder %v1925_v31, 2  ;;  %vm1926_vm7 = vcmp.lt.s32.totalorder %v1925_v31, 2  ;;  %vm8666_vm12 = vcmp.lt.s32.totalorder %v8665_v15, 0  ;;  %v1813_v53 = vsub.s32 4, %v8667_v11 }
 0x3be   :  { %v1932_v19 = vsel %vm1930_vm1, %v1931_v26, %v8660_v2  ;;  %v1606_v36 = vsel %vm8666_vm12, %v1605_v62, %v8662_v30  ;;  %3761 = vmatmul.mubr.bf16.gmra.mxu1 %v3603_v27  ;;  %v1726_v63 = vsel %vm1715_vm9, nan, %v1725_v25  ;;  %v1616_v60 = vxor.u32 2147483648, %v8669_v61  ;;  %v8671_v2 = vld [vmem:[#allocation36_spill] sm:$0xff] }
 0x3bf   :  { %v1933_v49 = vsel %vm1926_vm7, %v1929_v1, %v1932_v19  ;;  %v1608_v21 = vsel %vm6127_vm14, 0, %v1606_v36  ;;  %v1619_v31 = vxor.u32 2147483648, %v8670_v59  ;;  %vm8672_vm11 = vcmp.lt.s32.totalorder %v8671_v2, 0  ;;  %v8677_v25 = vld [vmem:[#allocation76_spill] sm:$0xff] }
 0x3c0   :  { %v1934_v35 = vsel %vm1923_vm3, nan, %v1933_v49  ;;  %v1612_v28 = vadd.s32 3, %v1608_v21  ;;  %v1814_v12 = vsel %vm8672_vm11, %v1813_v53, %v8667_v11  ;;  %vm8674_vm4 = vnez %v8673_v23  ;;  %v8680_v26 = vld [vmem:[#allocation64_spill] sm:$0xff] }
 0x3c1   :  { %v3606_v51 = vpack.c.bf16 %v1934_v35, %v1726_v63  ;;  %v1816_v40 = vsel %vm8674_vm4, 0, %v1814_v12  ;;  %v2133_v42 = vand.u32 3, %v8675_v0  ;;  %v2136_v33 = vxor.u32 2147483648, %v8676_v39  ;;  %v8681_v27 = vld [vmem:[#allocation80_spill] sm:$0xff]  ;;  %v8686_v0 = vld [vmem:[#allocation62_spill] sm:$0xff] }
 0x3c2   :  { %vm1611_vm14 = vweird.f32 %v8665_v15  ;;  %v1613_v5 = vand.u32 3, %v1612_v28  ;;  %v1820_v34 = vadd.s32 3, %v1816_v40  ;;  %v2139_v44 = vxor.u32 2147483648, %v8677_v25  ;;  %v8683_v28 = vld [vmem:[#allocation87_spill] sm:$0xff] }
 0x3c3   :  { %vm8678_vm5 = vcmask 130048   ;;  %v1824_v1 = vxor.u32 2147483648, %v8679_v57  ;;  %v1827_v30 = vxor.u32 2147483648, %v8680_v26  ;;  %vm2135_vm0 = vcmp.eq.s32.totalorder %v2133_v42, 0 }
 0x3c4   :  { %4349 = vmatprep.mubr.msk.bf16.mxu1 %vm8678_vm5, %v3606_v51  ;;  %vm2138_vm15 = vcmp.eq.s32.totalorder %v2133_v42, 2  ;;  %vm1615_vm6 = vcmp.eq.s32.totalorder %v1613_v5, 0  ;;  %vm1618_vm8 = vcmp.eq.s32.totalorder %v1613_v5, 2  ;;  %v1821_v62 = vand.u32 3, %v1820_v34  ;;  %v8688_v34 = vld [vmem:[#allocation43_spill] sm:$0xff] }
 0x3c5   :  { %v2341_v52 = vand.u32 3, %v8681_v27  ;;  %vm1614_vm13 = vcmp.lt.s32.totalorder %v1613_v5, 2  ;;  %v1617_v10 = vsel %vm1615_vm6, %v8670_v59, %v1616_v60  ;;  %v1620_v19 = vsel %vm1618_vm8, %v1619_v31, %v8669_v61  ;;  %v8682_v60 = vld [vmem:[#allocation50_spill] sm:$0xff]  ;;  %v8684_v31 = vld [vmem:[#allocation85_spill] sm:$0xff] }
 0x3c6   :  { %v2137_v36 = vsel %vm2135_vm0, %v8677_v25, %v2136_v33  ;;  %v1621_v11 = vsel %vm1614_vm13, %v1617_v10, %v1620_v19  ;;  %vm1823_vm10 = vcmp.eq.s32.totalorder %v1821_v62, 0  ;;  %vm1826_vm9 = vcmp.eq.s32.totalorder %v1821_v62, 2  ;;  %v8687_v33 = vld [vmem:[#allocation58_spill] sm:$0xff] }
 0x3c7   :  { %v2140_v53 = vsel %vm2138_vm15, %v2139_v44, %v8676_v39  ;;  %vm1819_vm3 = vweird.f32 %v8671_v2  ;;  %vm1822_vm1 = vcmp.lt.s32.totalorder %v1821_v62, 2  ;;  %v1825_v63 = vsel %vm1823_vm10, %v8680_v26, %v1824_v1  ;;  %v8685_v2 = vld [vmem:[#allocation57_spill] sm:$0xff]  ;;  %v8692_v26 = vld [vmem:[#allocation51_spill] sm:$0xff]  ;;  %v8695_v19 = vld [vmem:[#allocation74_spill] sm:$0xff] }
 0x3c8   :  { %v1828_v49 = vsel %vm1826_vm9, %v1827_v30, %v8679_v57  ;;  %v1622_v43 = vsel %vm1611_vm14, nan, %v1621_v11  ;;  %vm2131_vm7 = vweird.f32 %v8682_v60  ;;  %vm2134_vm12 = vcmp.lt.s32.totalorder %v2133_v42, 2  ;;  %v8690_v57 = vld [vmem:[#allocation66_spill] sm:$0xff]  ;;  %v8697_v11 = vld [vmem:[#allocation73_spill] sm:$0xff] }
 0x3c9   :  { %v1829_v21 = vsel %vm1822_vm1, %v1825_v63, %v1828_v49  ;;  %v2141_v35 = vsel %vm2134_vm12, %v2137_v36, %v2140_v53  ;;  %v2344_v59 = vxor.u32 2147483648, %v8683_v28  ;;  %v2347_v12 = vxor.u32 2147483648, %v8684_v31  ;;  %v8698_v49 = vld [vmem:[#allocation92_spill] sm:$0xff] }
 0x3ca   :  { %v1830_v61 = vsel %vm1819_vm3, nan, %v1829_v21  ;;  %vm2343_vm11 = vcmp.eq.s32.totalorder %v2341_v52, 0  ;;  %vm2346_vm4 = vcmp.eq.s32.totalorder %v2341_v52, 2  ;;  %v2021_v23 = vsub.s32 4, %v8685_v2  ;;  %v8699_v21 = vld [vmem:[#allocation94_spill] sm:$0xff] }
 0x3cb   :  { %v3605_v51 = vpack.c.bf16 %v1830_v61, %v1622_v43  ;;  %vm2342_vm5 = vcmp.lt.s32.totalorder %v2341_v52, 2  ;;  %v2345_v40 = vsel %vm2343_vm11, %v8684_v31, %v2344_v59  ;;  %v2348_v15 = vsel %vm2346_vm4, %v2347_v12, %v8683_v28  ;;  %v8694_v52 = vld [vmem:[#allocation75_spill] sm:$0xff]  ;;  %v8703_v12 = vld [vmem:[#allocation93_spill] sm:$0xff] }
 0x3cc   :  { %v2229_v39 = vsub.s32 4, %v8686_v0  ;;  %v2142_v42 = vsel %vm2131_vm7, nan, %v2141_v35  ;;  %vm2339_vm14 = vweird.f32 %v8687_v33  ;;  %v2349_v5 = vsel %vm2342_vm5, %v2345_v40, %v2348_v15  ;;  %v8701_v35 = vld [vmem:[#allocation84_spill] sm:$0xff]  ;;  %v8702_v59 = vld [vmem:[#allocation83_spill] sm:$0xff] }
 0x3cd   :  { %3769 = vmatmul.mubr.bf16.gmra.mxu1 %v3605_v51  ;;  %vm8689_vm0 = vcmp.lt.s32.totalorder %v8688_v34, 0  ;;  %v2350_v44 = vsel %vm2339_vm14, nan, %v2349_v5  ;;  %vm8691_vm15 = vnez %v8690_v57  ;;  %vm2027_vm6 = vweird.f32 %v8688_v34 }
 0x3ce   :  { %v2022_v25 = vsel %vm8689_vm0, %v2021_v23, %v8685_v2  ;;  %vm8693_vm8 = vcmp.lt.s32.totalorder %v8692_v26, 0  ;;  %v3608_v62 = vpack.c.bf16 %v2350_v44, %v2142_v42  ;;  %v2032_v10 = vxor.u32 2147483648, %v8694_v52 }
 0x3cf   :  { %v2024_v1 = vsel %vm8691_vm15, 0, %v2022_v25  ;;  %v2230_v30 = vsel %vm8693_vm8, %v2229_v39, %v8686_v0  ;;  %vm8696_vm13 = vnez %v8695_v19  ;;  %v2035_v53 = vxor.u32 2147483648, %v8697_v11  ;;  %v8705_v19 = vld [vmem:[#allocation65_spill] sm:$0xff] }
 0x3d0   :  { %v2028_v27 = vadd.s32 3, %v2024_v1  ;;  %v2232_v36 = vsel %vm8696_vm13, 0, %v2230_v30  ;;  %v2549_v43 = vand.u32 3, %v8698_v49  ;;  %v2552_v60 = vxor.u32 2147483648, %v8699_v21 }
 0x3d1   :  { %v2236_v63 = vadd.s32 3, %v2232_v36  ;;  %vm8700_vm10 = vcmask 130048   ;;  %v2240_v28 = vxor.u32 2147483648, %v8701_v35  ;;  %v2243_v31 = vxor.u32 2147483648, %v8702_v59  ;;  %v8707_v36 = vld [vmem:[#allocation61_spill] sm:$0xff] }
 0x3d2   :  { %4350 = vmatprep.mubr.msk.bf16.mxu1 %vm8700_vm10, %v3608_v62  ;;  %v2029_v61 = vand.u32 3, %v2028_v27  ;;  %v2555_v51 = vxor.u32 2147483648, %v8703_v12  ;;  %vm2551_vm9 = vcmp.eq.s32.totalorder %v2549_v43, 0  ;;  %v2757_v23 = vand.u32 3, %v7223_v32  ;;  %v8704_v27 = vld [vmem:[#allocation71_spill] sm:$0xff] }
 0x3d3   :  { %v2237_v2 = vand.u32 3, %v2236_v63  ;;  %v2760_v40 = vxor.u32 2147483648, %v7308_v8  ;;  %vm2554_vm12 = vcmp.eq.s32.totalorder %v2549_v43, 2  ;;  %v2553_v39 = vsel %vm2551_vm9, %v8703_v12, %v2552_v60  ;;  %v8712_v60 = vld [vmem:[#allocation90_spill] sm:$0xff] }
 0x3d4   :  { %vm2030_vm3 = vcmp.lt.s32.totalorder %v2029_v61, 2  ;;  %vm2031_vm1 = vcmp.eq.s32.totalorder %v2029_v61, 0  ;;  %vm2034_vm7 = vcmp.eq.s32.totalorder %v2029_v61, 2  ;;  %v2556_v5 = vsel %vm2554_vm12, %v2555_v51, %v8699_v21 }
 0x3d5   :  { %v2033_v15 = vsel %vm2031_vm1, %v8697_v11, %v2032_v10  ;;  %v2036_v0 = vsel %vm2034_vm7, %v2035_v53, %v8694_v52  ;;  %vm2239_vm11 = vcmp.eq.s32.totalorder %v2237_v2, 0  ;;  %vm2242_vm4 = vcmp.eq.s32.totalorder %v2237_v2, 2  ;;  %v8709_v53 = vld [vmem:[#allocation82_spill] sm:$0xff] }
 0x3d6   :  { %v2037_v42 = vsel %vm2030_vm3, %v2033_v15, %v2036_v0  ;;  %v2241_v33 = vsel %vm2239_vm11, %v8702_v59, %v2240_v28  ;;  %vm2235_vm5 = vweird.f32 %v8692_v26  ;;  %vm2238_vm14 = vcmp.lt.s32.totalorder %v2237_v2, 2  ;;  %v8706_v26 = vld [vmem:[#allocation77_spill] sm:$0xff]  ;;  %v8716_v2 = vld [vmem:[#allocation91_spill] sm:$0xff] }
 0x3d7   :  { %v2244_v32 = vsel %vm2242_vm4, %v2243_v31, %v8701_v35  ;;  %vm2550_vm0 = vcmp.lt.s32.totalorder %v2549_v43, 2  ;;  %v2038_v25 = vsel %vm2027_vm6, nan, %v2037_v42  ;;  %vm2759_vm15 = vcmp.eq.s32.totalorder %v2757_v23, 0  ;;  %v8710_v43 = vld [vmem:[#allocation86_spill] sm:$0xff]  ;;  %v8713_v59 = vld [vmem:[#allocation89_spill] sm:$0xff] }
 0x3d8   :  { %v2245_v44 = vsel %vm2238_vm14, %v2241_v33, %v2244_v32  ;;  %v2557_v57 = vsel %vm2550_vm0, %v2553_v39, %v2556_v5  ;;  %v2761_v30 = vsel %vm2759_vm15, %v7291_v20, %v2760_v40  ;;  %v2763_v62 = vxor.u32 2147483648, %v7291_v20  ;;  %v8719_v33 = vld [vmem:[#allocation98_spill] sm:$0xff]  ;;  %v8720_v32 = vld [vmem:[#allocation95_spill] sm:$0xff] }
 0x3d9   :  { %v2246_v1 = vsel %vm2235_vm5, nan, %v2245_v44  ;;  %v2437_v52 = vsub.s32 4, %v8704_v27  ;;  %vm2547_vm8 = vweird.f32 %v8705_v19  ;;  %vm2755_vm13 = vweird.f32 %v8706_v26 }
 0x3da   :  { %v3607_v10 = vpack.c.bf16 %v2246_v1, %v2038_v25  ;;  %vm2762_vm10 = vcmp.eq.s32.totalorder %v2757_v23, 2  ;;  %vm2758_vm9 = vcmp.lt.s32.totalorder %v2757_v23, 2  ;;  %vm8708_vm6 = vcmp.lt.s32.totalorder %v8707_v36, 0 }
 0x3db   :  { %v2764_v34 = vsel %vm2762_vm10, %v2763_v62, %v7308_v8  ;;  %v2438_v11 = vsel %vm8708_vm6, %v2437_v52, %v8704_v27  ;;  %v2645_v63 = vsub.s32 4, %v8709_v53  ;;  %v2558_v49 = vsel %vm2547_vm8, nan, %v2557_v57  ;;  %v8714_v8 = vld [vmem:[#allocation69_spill] sm:$0xff] }
 0x3dc   :  { %3777 = vmatmul.mubr.bf16.gmra.mxu1 %v3607_v10  ;;  %v2765_v20 = vsel %vm2758_vm9, %v2761_v30, %v2764_v34  ;;  %vm8711_vm3 = vnez %v8710_v43  ;;  %v2448_v61 = vxor.u32 2147483648, %v8712_v60  ;;  %v2451_v31 = vxor.u32 2147483648, %v8713_v59  ;;  %v8723_v43 = vld [vmem:[#allocation81_spill] sm:$0xff] }
 0x3dd   :  { %v2440_v21 = vsel %vm8711_vm3, 0, %v2438_v11  ;;  %v2766_v35 = vsel %vm2755_vm13, nan, %v2765_v20  ;;  %vm8715_vm1 = vcmp.lt.s32.totalorder %v8714_v8, 0  ;;  %vm8717_vm7 = vnez %v8716_v2  ;;  %v8731_v2 = vld [vmem:[#allocation100_spill] sm:$0xff] }
 0x3de   :  { %v2444_v28 = vadd.s32 3, %v2440_v21  ;;  %v2646_v12 = vsel %vm8715_vm1, %v2645_v63, %v8709_v53  ;;  %v3610_v51 = vpack.c.bf16 %v2766_v35, %v2558_v49  ;;  %v2965_v40 = vand.u32 3, %v7460_v37  ;;  %v8722_v49 = vld [vmem:[#allocation97_spill] sm:$0xff] }
 0x3df   :  { %v2648_v23 = vsel %vm8717_vm7, 0, %v2646_v12  ;;  %v2968_v15 = vxor.u32 2147483648, %v7343_v6  ;;  %4694 = vsinq.f32 %v7801_v9  ;;  %v2971_v42 = vxor.u32 2147483648, %v7337_v3  ;;  %v8729_v12 = vld [vmem:[#allocation101_spill] sm:$0xff] }
 0x3e0   :  { %v2445_v0 = vand.u32 3, %v2444_v28  ;;  %v2652_v39 = vadd.s32 3, %v2648_v23  ;;  %vm8718_vm12 = vcmask 130048   ;;  %v2656_v5 = vxor.u32 2147483648, %v8719_v33 }
 0x3e1   :  { %4351 = vmatprep.mubr.msk.bf16.mxu1 %vm8718_vm12, %v3610_v51  ;;  %v2659_v25 = vxor.u32 2147483648, %v8720_v32  ;;  %vm2967_vm11 = vcmp.eq.s32.totalorder %v2965_v40, 0  ;;  %vm2970_vm4 = vcmp.eq.s32.totalorder %v2965_v40, 2  ;;  %v3173_v37 = vand.u32 3, %v7473_v13 }
 0x3e2   :  { %vm2447_vm5 = vcmp.eq.s32.totalorder %v2445_v0, 0  ;;  %vm2450_vm14 = vcmp.eq.s32.totalorder %v2445_v0, 2  ;;  %v2653_v44 = vand.u32 3, %v2652_v39  ;;  %vm2446_vm0 = vcmp.lt.s32.totalorder %v2445_v0, 2 }
 0x3e3   :  { %v2449_v9 = vsel %vm2447_vm5, %v8713_v59, %v2448_v61  ;;  %v2452_v57 = vsel %vm2450_vm14, %v2451_v31, %v8712_v60  ;;  %v2969_v1 = vsel %vm2967_vm11, %v7337_v3, %v2968_v15  ;;  %v2972_v62 = vsel %vm2970_vm4, %v2971_v42, %v7343_v6  ;;  %v8721_v6 = vld [vmem:[#allocation88_spill] sm:$0xff]  ;;  %v8724_v60 = vld [vmem:[#allocation78_spill] sm:$0xff] }
 0x3e4   :  { %v2453_v30 = vsel %vm2446_vm0, %v2449_v9, %v2452_v57  ;;  %vm2655_vm15 = vcmp.eq.s32.totalorder %v2653_v44, 0  ;;  %vm2658_vm8 = vcmp.eq.s32.totalorder %v2653_v44, 2  ;;  %vm2443_vm13 = vweird.f32 %v8707_v36  ;;  %v8726_v59 = vld [vmem:[#allocation96_spill] sm:$0xff] }
 0x3e5   :  { %vm2654_vm10 = vcmp.lt.s32.totalorder %v2653_v44, 2  ;;  %v2657_v27 = vsel %vm2655_vm15, %v8720_v32, %v2656_v5  ;;  %v2660_v52 = vsel %vm2658_vm8, %v2659_v25, %v8719_v33  ;;  %v2454_v13 = vsel %vm2443_vm13, nan, %v2453_v30  ;;  %v8734_v33 = vld [vmem:[#allocation104_spill] sm:$0xff]  ;;  %v8735_v32 = vld [vmem:[#allocation103_spill] sm:$0xff] }
 0x3e6   :  { %vm2651_vm9 = vweird.f32 %v8714_v8  ;;  %v2661_v10 = vsel %vm2654_vm10, %v2657_v27, %v2660_v52  ;;  %vm2966_vm6 = vcmp.lt.s32.totalorder %v2965_v40, 2  ;;  %v3176_v3 = vxor.u32 2147483648, %v7533_v41  ;;  %v8732_v40 = vld [vmem:[#allocation99_spill] sm:$0xff] }
 0x3e7   :  { %v2662_v19 = vsel %vm2651_vm9, nan, %v2661_v10  ;;  %v2973_v26 = vsel %vm2966_vm6, %v2969_v1, %v2972_v62  ;;  %v3179_v34 = vxor.u32 2147483648, %v7523_v56  ;;  %vm3175_vm3 = vcmp.eq.s32.totalorder %v3173_v37, 0 }
 0x3e8   :  { %v3609_v11 = vpack.c.bf16 %v2662_v19, %v2454_v13  ;;  %vm3178_vm1 = vcmp.eq.s32.totalorder %v3173_v37, 2  ;;  %v2853_v36 = vsub.s32 4, %v8721_v6  ;;  %vm3174_vm7 = vcmp.lt.s32.totalorder %v3173_v37, 2 }
 0x3e9   :  { %v3177_v53 = vsel %vm3175_vm3, %v7523_v56, %v3176_v3  ;;  %v3180_v63 = vsel %vm3178_vm1, %v3179_v34, %v7533_v41  ;;  %v3061_v20 = vsub.s32 4, %v8722_v49  ;;  %vm2963_vm12 = vweird.f32 %v8723_v43 }
 0x3ea   :  { %3785 = vmatmul.mubr.bf16.gmra.mxu1 %v3609_v11  ;;  %vm3171_vm11 = vweird.f32 %v6969_v55  ;;  %v3181_v21 = vsel %vm3174_vm7, %v3177_v53, %v3180_v63  ;;  %vm8725_vm4 = vcmp.lt.s32.totalorder %v8724_v60, 0  ;;  %v2974_v35 = vsel %vm2963_vm12, nan, %v2973_v26  ;;  %v8736_v11 = vld [vmem:[#allocation102_spill] sm:$0xff] }
 0x3eb   :  { %v2854_v61 = vsel %vm8725_vm4, %v2853_v36, %v8721_v6  ;;  %v3182_v28 = vsel %vm3171_vm11, nan, %v3181_v21  ;;  %vm8727_vm5 = vnez %v8726_v59  ;;  %vm8728_vm14 = vcmp.lt.s32.totalorder %v6777_v16, 0 }
 0x3ec   :  { %v2856_v31 = vsel %vm8727_vm5, 0, %v2854_v61  ;;  %v3062_v56 = vsel %vm8728_vm14, %v3061_v20, %v8722_v49  ;;  %v3612_v41 = vpack.c.bf16 %v3182_v28, %v2974_v35  ;;  %vm2859_vm0 = vweird.f32 %v8724_v60  ;;  %v4695_v51 = vpop.eup %4694 }
 0x3ed   :  { %v2860_v8 = vadd.s32 3, %v2856_v31  ;;  %vm8730_vm15 = vnez %v8729_v12  ;;  %v2864_v23 = vxor.u32 2147483648, %v8731_v2  ;;  %v2867_v15 = vxor.u32 2147483648, %v8732_v40 }
 0x3ee   :  { %v3064_v55 = vsel %vm8730_vm15, 0, %v3062_v56  ;;  %v3381_v39 = vand.u32 3, %v7607_v22  ;;  %vm8733_vm8 = vcmask 130048   ;;  %vm3067_vm13 = vweird.f32 %v6777_v16 }
 0x3ef   :  { %v3068_v0 = vadd.s32 3, %v3064_v55  ;;  %4352 = vmatprep.mubr.msk.bf16.mxu1 %vm8733_vm8, %v3612_v41  ;;  %v2861_v42 = vand.u32 3, %v2860_v8  ;;  %v3072_v5 = vxor.u32 2147483648, %v8734_v33  ;;  %v3075_v25 = vxor.u32 2147483648, %v8735_v32 }
 0x3f0   :  { %v3384_v37 = vxor.u32 2147483648, %v7734_v38  ;;  %v3387_v9 = vxor.u32 2147483648, %v7729_v48  ;;  %v3589_v57 = vand.u32 3, %v7774_v46  ;;  %vm3383_vm6 = vcmp.eq.s32.totalorder %v3381_v39, 0 }
 0x3f1   :  { %v3069_v44 = vand.u32 3, %v3068_v0  ;;  %vm2863_vm10 = vcmp.eq.s32.totalorder %v2861_v42, 0  ;;  %vm2866_vm9 = vcmp.eq.s32.totalorder %v2861_v42, 2  ;;  %v3592_v22 = vxor.u32 2147483648, %v4695_v51 }
 0x3f2   :  { %vm2862_vm3 = vcmp.lt.s32.totalorder %v2861_v42, 2  ;;  %v2865_v1 = vsel %vm2863_vm10, %v8732_v40, %v2864_v23  ;;  %v2868_v30 = vsel %vm2866_vm9, %v2867_v15, %v8731_v2  ;;  %vm3386_vm12 = vcmp.eq.s32.totalorder %v3381_v39, 2 }
 0x3f3   :  { %vm3071_vm1 = vcmp.eq.s32.totalorder %v3069_v44, 0  ;;  %v2869_v62 = vsel %vm2862_vm3, %v2865_v1, %v2868_v30  ;;  %vm3074_vm7 = vcmp.eq.s32.totalorder %v3069_v44, 2  ;;  %vm3070_vm11 = vcmp.lt.s32.totalorder %v3069_v44, 2 }
 0x3f4   :  { %v3073_v27 = vsel %vm3071_vm1, %v8735_v32, %v3072_v5  ;;  %v3076_v52 = vsel %vm3074_vm7, %v3075_v25, %v8734_v33  ;;  %v3385_v46 = vsel %vm3383_vm6, %v7729_v48, %v3384_v37  ;;  %v3388_v13 = vsel %vm3386_vm12, %v3387_v9, %v7734_v38  ;;  %v4566_v48 = vld [vmem:[%s8149_s4 + $0x8] sm:$0xff]  }
 0x3f5   :  { %v2870_v10 = vsel %vm2859_vm0, nan, %v2869_v62  ;;  %v3077_v19 = vsel %vm3070_vm11, %v3073_v27, %v3076_v52  ;;  %vm3382_vm4 = vcmp.lt.s32.totalorder %v3381_v39, 2  ;;  %vm3591_vm5 = vcmp.eq.s32.totalorder %v3589_v57, 0  ;;  %4399 = vmatprep.subr.bf16.mxu0 %v4566_v48 }
 0x3f6   :  { %v3078_v26 = vsel %vm3067_vm13, nan, %v3077_v19  ;;  %v3593_v3 = vsel %vm3591_vm5, %v7853_v45, %v3592_v22  ;;  %v3595_v34 = vxor.u32 2147483648, %v7853_v45  ;;  %v3269_v6 = vsub.s32 4, %v8736_v11  ;;  %4400 = vmatpush3.bf16.msra.mxu0 %v4566_v48 }
 0x3f7   :  { %v3611_v36 = vpack.c.bf16 %v3078_v26, %v2870_v10  ;;  %v3389_v53 = vsel %vm3382_vm4, %v3385_v46, %v3388_v13  ;;  %vm3594_vm14 = vcmp.eq.s32.totalorder %v3589_v57, 2  ;;  %vm3590_vm0 = vcmp.lt.s32.totalorder %v3589_v57, 2 }
 0x3f8   :  { %v3596_v38 = vsel %vm3594_vm14, %v3595_v34, %v4695_v51  ;;  %vm8737_vm15 = vcmp.lt.s32.totalorder %v7080_v17, 0  ;;  %v3477_v63 = vsub.s32 4, %v7602_v18  ;;  %vm3379_vm8 = vweird.f32 %v7226_v7 }
 0x3f9   :  { %v3270_v16 = vsel %vm8737_vm15, %v3269_v6, %v8736_v11  ;;  %3793 = vmatmul.mubr.bf16.gmra.mxu1 %v3611_v36  ;;  %vm3587_vm13 = vweird.f32 %v7384_v4  ;;  %v3597_v45 = vsel %vm3590_vm0, %v3593_v3, %v3596_v38  ;;  %vm8738_vm10 = vnez %v8585_v54 }
 0x3fa   :  { %v3272_v49 = vsel %vm8738_vm10, 0, %v3270_v16  ;;  %v3390_v20 = vsel %vm3379_vm8, nan, %v3389_v53  ;;  %v3598_v43 = vsel %vm3587_vm13, nan, %v3597_v45  ;;  %vm8739_vm9 = vcmp.lt.s32.totalorder %v7381_v14, 0 }
 0x3fb   :  { %v3276_v21 = vadd.s32 3, %v3272_v49  ;;  %v3478_v60 = vsel %vm8739_vm9, %v3477_v63, %v7602_v18  ;;  %v3614_v61 = vpack.c.bf16 %v3598_v43, %v3390_v20  ;;  %v3280_v35 = vxor.u32 2147483648, %v7720_v29  ;;  %v4567_v18 = vld [vmem:[%s8149_s4] sm:$0xff]  }
 0x3fc   :  { %v3283_v7 = vxor.u32 2147483648, %v7661_v50  ;;  %v3480_v4 = vsel %vm7724_vm2, 0, %v3478_v60  ;;  %vm8740_vm6 = vcmask 130048   ;;  %v3488_v59 = vxor.u32 2147483648, %v7824_v58  ;;  %4401 = vmatprep.subr.bf16.mxu0 %v4567_v18 }
 0x3fd   :  { %v3277_v28 = vand.u32 3, %v3276_v21  ;;  %v3484_v54 = vadd.s32 3, %v3480_v4  ;;  %4353 = vmatprep.mubr.msk.bf16.mxu1 %vm8740_vm6, %v3614_v61  ;;  %v3491_v31 = vxor.u32 2147483648, %v7816_v24  ;;  %4402 = vmatpush3.bf16.msra.mxu0 %v4567_v18  ;;  %vm3275_vm4 = vweird.f32 %v7080_v17 }
 0x3fe   :  { %vm3483_vm5 = vweird.f32 %v7381_v14  ;;  %vm3865_vm14 = vcmask 523264   ;;  %vm4170_vm0 = vcmask 7168  }
 0x3ff   :  { %vm3279_vm3 = vcmp.eq.s32.totalorder %v3277_v28, 0  ;;  %vm3282_vm1 = vcmp.eq.s32.totalorder %v3277_v28, 2  ;;  %v3485_v56 = vand.u32 3, %v3484_v54  ;;  %vm3278_vm7 = vcmp.lt.s32.totalorder %v3277_v28, 2 }
 0x400   :  { %v3281_v41 = vsel %vm3279_vm3, %v7661_v50, %v3280_v35  ;;  %v3284_v47 = vsel %vm3282_vm1, %v3283_v7, %v7720_v29 }
 0x401   :  { %v3285_v8 = vsel %vm3278_vm7, %v3281_v41, %v3284_v47  ;;  %vm3487_vm2 = vcmp.eq.s32.totalorder %v3485_v56, 0  ;;  %vm3490_vm12 = vcmp.eq.s32.totalorder %v3485_v56, 2  ;;  %vm3486_vm11 = vcmp.lt.s32.totalorder %v3485_v56, 2 }
 0x402   :  { %v3489_v12 = vsel %vm3487_vm2, %v7816_v24, %v3488_v59  ;;  %v3492_v55 = vsel %vm3490_vm12, %v3491_v31, %v7824_v58  ;;  %v3286_v2 = vsel %vm3275_vm4, nan, %v3285_v8  ;;  %v8047_v8 = vld [vmem:[%s8150_s5] ss:$0 sm:$0xff] }
 0x403   :  { %v3493_v51 = vsel %vm3486_vm11, %v3489_v12, %v3492_v55 }
 0x404   :  { %v3494_v23 = vsel %vm3483_vm5, nan, %v3493_v51 }
 0x405   :  { %v3613_v50 = vpack.c.bf16 %v3494_v23, %v3286_v2 }
 0x407   :  { %3801 = vmatmul.mubr.bf16.gmra.mxu1 %v3613_v50 }
 0x45c   :  { %v3746_v29 = vpop.f32.mrf.mxu1 }
 0x45d   :  { %v3809_v0 = vmax.f32 %v3746_v29, 0.0 }
 0x45e   :  { %v3748_v40 = vpop.f32.mrf.mxu1 }
 0x460   :  { %v3749_v15 = vpop.f32.mrf.mxu1 }
 0x461   :  { %v3810_v39 = vmax.f32 %v3749_v15, 0.0 }
 0x462   :  { %v3751_v42 = vpop.f32.mrf.mxu1 }
 0x463   :  { %v3825_v33 = vpack.c.bf16 %v3810_v39, %v3809_v0 }
 0x465   :  { %4403 = vmatprep.mubr.msk.bf16.mxu0 %vm3865_vm14, %v3825_v33 }
 0x471   :  { %v3754_v24 = vpop.f32.mrf.mxu1 }
 0x472   :  { %v3811_v5 = vmax.f32 %v3754_v24, 0.0 }
 0x473   :  { %v3756_v58 = vpop.f32.mrf.mxu1 }
 0x475   :  { %v3757_v17 = vpop.f32.mrf.mxu1 }
 0x476   :  { %v3812_v14 = vmax.f32 %v3757_v17, 0.0 }
 0x477   :  { %v3759_v32 = vpop.f32.mrf.mxu1 }
 0x478   :  { %v3826_v25 = vpack.c.bf16 %v3812_v14, %v3811_v5 }
 0x47a   :  { %4404 = vmatmul.mubr.msk.bf16.vlgmr.msra.gmra.mxu0 %vm3865_vm14, %v3826_v25 }
 0x47e   :  { %v3762_v44 = vpop.f32.mrf.mxu1 }
 0x47f   :  { %v3813_v57 = vmax.f32 %v3762_v44, 0.0 }
 0x480   :  { %v3764_v37 = vpop.f32.mrf.mxu1 }
 0x482   :  { %v3765_v9 = vpop.f32.mrf.mxu1 }
 0x483   :  { %v3814_v22 = vmax.f32 %v3765_v9, 0.0 }
 0x484   :  { %v3767_v1 = vpop.f32.mrf.mxu1 }
 0x485   :  { %v3827_v30 = vpack.c.bf16 %v3814_v22, %v3813_v57 }
 0x487   :  { %4407 = vmatprep.mubr.msk.bf16.mxu0 %vm3865_vm14, %v3827_v30 }
 0x48d   :  { %v3770_v62 = vpop.f32.mrf.mxu1 }
 0x48e   :  { %v3815_v46 = vmax.f32 %v3770_v62, 0.0 }
 0x48f   :  { %v3772_v27 = vpop.f32.mrf.mxu1 }
 0x491   :  { %v3773_v52 = vpop.f32.mrf.mxu1 }
 0x492   :  { %v3816_v13 = vmax.f32 %v3773_v52, 0.0 }
 0x493   :  { %v3775_v10 = vpop.f32.mrf.mxu1 }
 0x494   :  { %v3828_v19 = vpack.c.bf16 %v3816_v13, %v3815_v46 }
 0x496   :  { %4408 = vmatmul.mubr.msk.bf16.gmra.mxu0 %vm3865_vm14, %v3828_v19 }
 0x49c   :  { %v3778_v26 = vpop.f32.mrf.mxu1 }
 0x49d   :  { %v3817_v11 = vmax.f32 %v3778_v26, 0.0 }
 0x49e   :  { %v3780_v3 = vpop.f32.mrf.mxu1 }
 0x4a0   :  { %v3781_v34 = vpop.f32.mrf.mxu1 }
 0x4a1   :  { %v3818_v6 = vmax.f32 %v3781_v34, 0.0 }
 0x4a2   :  { %v3783_v36 = vpop.f32.mrf.mxu1 }
 0x4a3   :  { %v3829_v53 = vpack.c.bf16 %v3818_v6, %v3817_v11 }
 0x4a5   :  { %4411 = vmatprep.mubr.msk.bf16.mxu0 %vm3865_vm14, %v3829_v53 }
 0x4aa   :  { %v3786_v48 = vpop.f32.mrf.mxu1 }
 0x4ab   :  { %v3819_v63 = vmax.f32 %v3786_v48, 0.0 }
 0x4ac   :  { %v3788_v38 = vpop.f32.mrf.mxu1 }
 0x4ae   :  { %v3789_v16 = vpop.f32.mrf.mxu1 }
 0x4af   :  { %v3820_v45 = vmax.f32 %v3789_v16, 0.0 }
 0x4b0   :  { %v3791_v49 = vpop.f32.mrf.mxu1 }
 0x4b1   :  { %v3830_v20 = vpack.c.bf16 %v3820_v45, %v3819_v63 }
 0x4b3   :  { %4412 = vmatmul.mubr.msk.bf16.gmra.mxu0 %vm3865_vm14, %v3830_v20 }
 0x4b9   :  { %v3794_v43 = vpop.f32.mrf.mxu1 }
 0x4ba   :  { %v3821_v61 = vmax.f32 %v3794_v43, 0.0 }
 0x4bb   :  { %v3796_v21 = vpop.f32.mrf.mxu1 }
 0x4bd   :  { %v3797_v60 = vpop.f32.mrf.mxu1 }
 0x4be   :  { %v3822_v35 = vmax.f32 %v3797_v60, 0.0 }
 0x4bf   :  { %v3799_v7 = vpop.f32.mrf.mxu1 }
 0x4c0   :  { %v3831_v4 = vpack.c.bf16 %v3822_v35, %v3821_v61 }
 0x4c2   :  { %4415 = vmatprep.mubr.msk.bf16.mxu0 %vm3865_vm14, %v3831_v4 }
 0x4c7   :  { %v3802_v28 = vpop.f32.mrf.mxu1 }
 0x4c8   :  { %v3823_v31 = vmax.f32 %v3802_v28, 0.0 }
 0x4c9   :  { %v3804_v54 = vpop.f32.mrf.mxu1 }
 0x4cb   :  { %v3805_v59 = vpop.f32.mrf.mxu1 }
 0x4cc   :  { %v3824_v18 = vmax.f32 %v3805_v59, 0.0 }
 0x4cd   :  { %v3807_v56 = vpop.f32.mrf.mxu1 }
 0x4ce   :  { %v3832_v41 = vpack.c.bf16 %v3824_v18, %v3823_v31 }
 0x4d0   :  { %4416 = vmatmul.mubr.msk.bf16.gmra.mxu0 %vm3865_vm14, %v3832_v41 }
 0x53a   :  { %v4405_v47 = vpop.f32.mrf.mxu0 }
 0x53b   :  { %v3989_v12 = vmax.f32 %v4405_v47, 0.0 }
 0x53c   :  { %v3924_v55 = vpop.f32.mrf.mxu0 }
 0x53d   :  { %v3987_v51 = vmax.f32 %v3924_v55, 0.0  ;;  %v4012_v2 = vmul.f32 %v8047_v8, %v3989_v12 }
 0x53e   :  { %v4406_v23 = vpop.f32.mrf.mxu0 }
 0x53f   :  { %v3990_v50 = vmax.f32 %v4406_v23, 0.0  ;;  %v4032_v29 = vsel %vm3865_vm14, %v4012_v2, 0.0  ;;  %v4010_v40 = vmul.f32 %v8047_v8, %v3987_v51 }
 0x540   :  { %4033 = vadd.xlane.f32.xlu1 %v4032_v29  ;;  %v3927_v15 = vpop.f32.mrf.mxu0 }
 0x541   :  { %v3988_v0 = vmax.f32 %v3927_v15, 0.0  ;;  %v4026_v39 = vsel %vm3865_vm14, %v4010_v40, 0.0  ;;  %v4013_v42 = vmul.f32 %v8047_v8, %v3990_v50 }
 0x542   :  { %4027 = vadd.xlane.f32.xlu0 %v4026_v39 }
 0x543   :  { %v4035_v33 = vsel %vm3865_vm14, %v4013_v42, 0.0  ;;  %v4011_v24 = vmul.f32 %v8047_v8, %v3988_v0 }
 0x544   :  { %4036 = vadd.xlane.f32.xlu1 %v4035_v33 }
 0x545   :  { %v4029_v58 = vsel %vm3865_vm14, %v4011_v24, 0.0 }
 0x546   :  { %4030 = vadd.xlane.f32.xlu0 %v4029_v58 }
 0x556   :  { %v4409_v17 = vpop.f32.mrf.mxu0 }
 0x557   :  { %v3993_v5 = vmax.f32 %v4409_v17, 0.0 }
 0x558   :  { %v3940_v14 = vpop.f32.mrf.mxu0 }
 0x559   :  { %v3991_v32 = vmax.f32 %v3940_v14, 0.0  ;;  %v4016_v25 = vmul.f32 %v8047_v8, %v3993_v5 }
 0x55a   :  { %v4410_v44 = vpop.f32.mrf.mxu0 }
 0x55b   :  { %v3994_v37 = vmax.f32 %v4410_v44, 0.0  ;;  %v4044_v9 = vsel %vm3865_vm14, %v4016_v25, 0.0  ;;  %v4014_v57 = vmul.f32 %v8047_v8, %v3991_v32 }
 0x55c   :  { %4045 = vadd.xlane.f32.xlu0 %v4044_v9  ;;  %v3943_v22 = vpop.f32.mrf.mxu0 }
 0x55d   :  { %v3992_v1 = vmax.f32 %v3943_v22, 0.0  ;;  %v4017_v30 = vmul.f32 %v8047_v8, %v3994_v37  ;;  %v4038_v62 = vsel %vm3865_vm14, %v4014_v57, 0.0 }
 0x55f   :  { %v4047_v27 = vsel %vm3865_vm14, %v4017_v30, 0.0  ;;  %v4015_v52 = vmul.f32 %v8047_v8, %v3992_v1 }
 0x560   :  { %4039 = vadd.xlane.f32.xlu0 %v4038_v62  ;;  %4048 = vadd.xlane.f32.xlu1 %v4047_v27 }
 0x561   :  { %v4041_v46 = vsel %vm3865_vm14, %v4015_v52, 0.0 }
 0x564   :  { %4042 = vadd.xlane.f32.xlu1 %v4041_v46 }
 0x573   :  { %v4413_v13 = vpop.f32.mrf.mxu0 }
 0x574   :  { %v3997_v10 = vmax.f32 %v4413_v13, 0.0 }
 0x575   :  { %v3956_v19 = vpop.f32.mrf.mxu0 }
 0x576   :  { %v3995_v26 = vmax.f32 %v3956_v19, 0.0  ;;  %v4020_v3 = vmul.f32 %v8047_v8, %v3997_v10 }
 0x577   :  { %v4414_v34 = vpop.f32.mrf.mxu0 }
 0x578   :  { %v3998_v11 = vmax.f32 %v4414_v34, 0.0  ;;  %v4056_v6 = vsel %vm3865_vm14, %v4020_v3, 0.0  ;;  %v4018_v36 = vmul.f32 %v8047_v8, %v3995_v26 }
 0x579   :  { %4057 = vadd.xlane.f32.xlu0 %v4056_v6  ;;  %v3959_v53 = vpop.f32.mrf.mxu0 }
 0x57a   :  { %v3996_v48 = vmax.f32 %v3959_v53, 0.0  ;;  %v4021_v38 = vmul.f32 %v8047_v8, %v3998_v11  ;;  %v4050_v16 = vsel %vm3865_vm14, %v4018_v36, 0.0 }
 0x57c   :  { %v4059_v63 = vsel %vm3865_vm14, %v4021_v38, 0.0  ;;  %v4019_v45 = vmul.f32 %v8047_v8, %v3996_v48 }
 0x57d   :  { %4051 = vadd.xlane.f32.xlu0 %v4050_v16  ;;  %4060 = vadd.xlane.f32.xlu1 %v4059_v63 }
 0x57e   :  { %v4053_v49 = vsel %vm3865_vm14, %v4019_v45, 0.0 }
 0x581   :  { %4054 = vadd.xlane.f32.xlu1 %v4053_v49 }
 0x590   :  { %v4417_v20 = vpop.f32.mrf.mxu0 }
 0x591   :  { %v4001_v21 = vmax.f32 %v4417_v20, 0.0 }
 0x592   :  { %v3972_v43 = vpop.f32.mrf.mxu0 }
 0x593   :  { %v3999_v60 = vmax.f32 %v3972_v43, 0.0  ;;  %v4024_v59 = vmul.f32 %v8047_v8, %v4001_v21 }
 0x594   :  { %v4418_v61 = vpop.f32.mrf.mxu0 }
 0x595   :  { %v4022_v35 = vmul.f32 %v8047_v8, %v3999_v60  ;;  %v4002_v4 = vmax.f32 %v4418_v61, 0.0  ;;  %v4068_v18 = vsel %vm3865_vm14, %v4024_v59, 0.0 }
 0x596   :  { %v3975_v7 = vpop.f32.mrf.mxu0 }
 0x597   :  { %v4000_v28 = vmax.f32 %v3975_v7, 0.0  ;;  %v4062_v54 = vsel %vm3865_vm14, %v4022_v35, 0.0  ;;  %v4025_v41 = vmul.f32 %v8047_v8, %v4002_v4 }
 0x598   :  { %4063 = vadd.xlane.f32.xlu0 %v4062_v54 }
 0x599   :  { %v4023_v31 = vmul.f32 %v8047_v8, %v4000_v28  ;;  %v4071_v47 = vsel %vm3865_vm14, %v4025_v41, 0.0 }
 0x59b   :  { %v4065_v56 = vsel %vm3865_vm14, %v4023_v31, 0.0 }
 0x59c   :  { %4069 = vadd.xlane.f32.xlu0 %v4068_v18  ;;  %4066 = vadd.xlane.f32.xlu1 %v4065_v56 }
 0x5a0   :  { %4072 = vadd.xlane.f32.xlu1 %v4071_v47 }
 0x5c9   :  { %v4034_v12 = vpop.xlane.xlu1 %4033 }
 0x5ca   :  { %v4369_v55 = vmul.f32 -1.442695, %v4034_v12 }
 0x5cb   :  { %v4028_v51 = vpop.xlane.xlu0 %4027 }
 0x5cc   :  { %4696 = vpow2.f32 %v4369_v55  ;;  %v4367_v2 = vmul.f32 -1.442695, %v4028_v51 }
 0x5cd   :  { %v4037_v23 = vpop.xlane.xlu1 %4036 }
 0x5ce   :  { %4698 = vpow2.f32 %v4367_v2  ;;  %v4370_v50 = vmul.f32 -1.442695, %v4037_v23 }
 0x5cf   :  { %v4031_v29 = vpop.xlane.xlu0 %4030 }
 0x5d0   :  { %4700 = vpow2.f32 %v4370_v50  ;;  %v4368_v40 = vmul.f32 -1.442695, %v4031_v29 }
 0x5d2   :  { %4702 = vpow2.f32 %v4368_v40 }
 0x5d9   :  { %v4697_v15 = vpop.eup %4696 }
 0x5da   :  { %v4124_v0 = vadd.f32 1.0, %v4697_v15 }
 0x5db   :  { %v4699_v8 = vpop.eup %4698 }
 0x5dc   :  { %4704 = vrcp.f32 %v4124_v0  ;;  %v4122_v39 = vadd.f32 1.0, %v4699_v8 }
 0x5dd   :  { %v4701_v42 = vpop.eup %4700 }
 0x5de   :  { %4706 = vrcp.f32 %v4122_v39  ;;  %v4125_v33 = vadd.f32 1.0, %v4701_v42 }
 0x5df   :  { %v4703_v24 = vpop.eup %4702 }
 0x5e0   :  { %4708 = vrcp.f32 %v4125_v33  ;;  %v4123_v58 = vadd.f32 1.0, %v4703_v24 }
 0x5e2   :  { %4710 = vrcp.f32 %v4123_v58 }
 0x5e5   :  { %v4046_v17 = vpop.xlane.xlu0 %4045 }
 0x5e6   :  { %v4373_v5 = vmul.f32 -1.442695, %v4046_v17 }
 0x5e8   :  { %4712 = vpow2.f32 %v4373_v5 }
 0x5e9   :  { %v4040_v14 = vpop.xlane.xlu0 %4039  ;;  %v4049_v32 = vpop.xlane.xlu1 %4048 }
 0x5ea   :  { %v4371_v25 = vmul.f32 -1.442695, %v4040_v14  ;;  %v4374_v44 = vmul.f32 -1.442695, %v4049_v32  ;;  %v4705_v37 = vpop.eup %4704 }
 0x5eb   :  { %4173 = vst.msk [vmem:[%s8151_s6 + $0x10] sm:$0xff] %vm4170_vm0, %v4705_v37  ;;  %v4707_v9 = vpop.eup %4706 }
 0x5ec   :  { %4714 = vpow2.f32 %v4371_v25  ;;  %4171 = vst.msk [vmem:[%s8151_s6] sm:$0xff] %vm4170_vm0, %v4707_v9 }
 0x5ed   :  { %4716 = vpow2.f32 %v4374_v44  ;;  %v4043_v57 = vpop.xlane.xlu1 %4042  ;;  %v4709_v1 = vpop.eup %4708 }
 0x5ee   :  { %v4372_v22 = vmul.f32 -1.442695, %v4043_v57  ;;  %4174 = vst.msk [vmem:[%s8151_s6 + $0x18] sm:$0xff] %vm4170_vm0, %v4709_v1 }
 0x5ef   :  { %v4711_v30 = vpop.eup %4710 }
 0x5f0   :  { %4718 = vpow2.f32 %v4372_v22  ;;  %4172 = vst.msk [vmem:[%s8151_s6 + $0x8] sm:$0xff] %vm4170_vm0, %v4711_v30 }
 0x5f5   :  { %v4713_v62 = vpop.eup %4712 }
 0x5f6   :  { %v4128_v27 = vadd.f32 1.0, %v4713_v62 }
 0x5f8   :  { %4720 = vrcp.f32 %v4128_v27 }
 0x5f9   :  { %v4715_v52 = vpop.eup %4714 }
 0x5fa   :  { %v4717_v46 = vpop.eup %4716  ;;  %v4126_v13 = vadd.f32 1.0, %v4715_v52 }
 0x5fb   :  { %v4129_v10 = vadd.f32 1.0, %v4717_v46 }
 0x5fc   :  { %4722 = vrcp.f32 %v4126_v13 }
 0x5fd   :  { %v4719_v19 = vpop.eup %4718  ;;  %4724 = vrcp.f32 %v4129_v10 }
 0x5fe   :  { %v4127_v26 = vadd.f32 1.0, %v4719_v19 }
 0x600   :  { %4726 = vrcp.f32 %v4127_v26 }
 0x602   :  { %v4058_v3 = vpop.xlane.xlu0 %4057 }
 0x603   :  { %v4377_v34 = vmul.f32 -1.442695, %v4058_v3 }
 0x605   :  { %4728 = vpow2.f32 %v4377_v34  ;;  %v4721_v36 = vpop.eup %4720 }
 0x606   :  { %v4052_v11 = vpop.xlane.xlu0 %4051  ;;  %v4061_v6 = vpop.xlane.xlu1 %4060  ;;  %4177 = vst.msk [vmem:[%s8151_s6 + $0x30] sm:$0xff] %vm4170_vm0, %v4721_v36 }
 0x607   :  { %v4375_v53 = vmul.f32 -1.442695, %v4052_v11  ;;  %v4378_v48 = vmul.f32 -1.442695, %v4061_v6 }
 0x609   :  { %4730 = vpow2.f32 %v4375_v53  ;;  %v4723_v16 = vpop.eup %4722 }
 0x60a   :  { %4732 = vpow2.f32 %v4378_v48  ;;  %v4055_v38 = vpop.xlane.xlu1 %4054  ;;  %v4725_v45 = vpop.eup %4724  ;;  %4175 = vst.msk [vmem:[%s8151_s6 + $0x20] sm:$0xff] %vm4170_vm0, %v4723_v16 }
 0x60b   :  { %v4376_v63 = vmul.f32 -1.442695, %v4055_v38  ;;  %4178 = vst.msk [vmem:[%s8151_s6 + $0x38] sm:$0xff] %vm4170_vm0, %v4725_v45 }
 0x60d   :  { %4734 = vpow2.f32 %v4376_v63  ;;  %v4727_v49 = vpop.eup %4726 }
 0x60e   :  { %4176 = vst.msk [vmem:[%s8151_s6 + $0x28] sm:$0xff] %vm4170_vm0, %v4727_v49 }
 0x612   :  { %v4729_v20 = vpop.eup %4728 }
 0x613   :  { %v4132_v43 = vadd.f32 1.0, %v4729_v20 }
 0x615   :  { %4736 = vrcp.f32 %v4132_v43 }
 0x616   :  { %v4731_v21 = vpop.eup %4730 }
 0x617   :  { %v4733_v60 = vpop.eup %4732  ;;  %v4130_v61 = vadd.f32 1.0, %v4731_v21 }
 0x618   :  { %v4133_v35 = vadd.f32 1.0, %v4733_v60 }
 0x619   :  { %4738 = vrcp.f32 %v4130_v61 }
 0x61a   :  { %v4735_v7 = vpop.eup %4734  ;;  %4740 = vrcp.f32 %v4133_v35 }
 0x61b   :  { %v4131_v4 = vadd.f32 1.0, %v4735_v7 }
 0x61d   :  { %4742 = vrcp.f32 %v4131_v4 }
 0x621   :  { %v4064_v28 = vpop.xlane.xlu0 %4063 }
 0x622   :  { %v4379_v54 = vmul.f32 -1.442695, %v4064_v28  ;;  %v4737_v59 = vpop.eup %4736 }
 0x623   :  { %4181 = vst.msk [vmem:[%s8151_s6 + $0x50] sm:$0xff] %vm4170_vm0, %v4737_v59 }
 0x624   :  { %4744 = vpow2.f32 %v4379_v54 }
 0x625   :  { %v4070_v31 = vpop.xlane.xlu0 %4069  ;;  %v4067_v18 = vpop.xlane.xlu1 %4066 }
 0x626   :  { %v4381_v56 = vmul.f32 -1.442695, %v4070_v31  ;;  %v4380_v41 = vmul.f32 -1.442695, %v4067_v18  ;;  %v4739_v47 = vpop.eup %4738 }
 0x627   :  { %v4741_v12 = vpop.eup %4740  ;;  %4179 = vst.msk [vmem:[%s8151_s6 + $0x40] sm:$0xff] %vm4170_vm0, %v4739_v47 }
 0x628   :  { %4746 = vpow2.f32 %v4381_v56  ;;  %4182 = vst.msk [vmem:[%s8151_s6 + $0x58] sm:$0xff] %vm4170_vm0, %v4741_v12 }
 0x629   :  { %4748 = vpow2.f32 %v4380_v41  ;;  %v4073_v55 = vpop.xlane.xlu1 %4072 }
 0x62a   :  { %v4382_v51 = vmul.f32 -1.442695, %v4073_v55  ;;  %v4743_v2 = vpop.eup %4742 }
 0x62b   :  { %4180 = vst.msk [vmem:[%s8151_s6 + $0x48] sm:$0xff] %vm4170_vm0, %v4743_v2 }
 0x62c   :  { %4750 = vpow2.f32 %v4382_v51 }
 0x631   :  { %v4745_v23 = vpop.eup %4744 }
 0x632   :  { %v4134_v50 = vadd.f32 1.0, %v4745_v23 }
 0x634   :  { %4752 = vrcp.f32 %v4134_v50 }
 0x635   :  { %v4747_v29 = vpop.eup %4746 }
 0x636   :  { %v4749_v40 = vpop.eup %4748  ;;  %v4136_v15 = vadd.f32 1.0, %v4747_v29 }
 0x637   :  { %v4135_v0 = vadd.f32 1.0, %v4749_v40 }
 0x638   :  { %4754 = vrcp.f32 %v4136_v15 }
 0x639   :  { %v4751_v8 = vpop.eup %4750  ;;  %4756 = vrcp.f32 %v4135_v0 }
 0x63a   :  { %v4137_v39 = vadd.f32 1.0, %v4751_v8 }
 0x63c   :  { %4758 = vrcp.f32 %v4137_v39 }
 0x641   :  { %v4753_v42 = vpop.eup %4752 }
 0x642   :  { %4183 = vst.msk [vmem:[%s8151_s6 + $0x60] sm:$0xff] %vm4170_vm0, %v4753_v42 }
 0x645   :  { %v4755_v33 = vpop.eup %4754 }
 0x646   :  { %v4757_v24 = vpop.eup %4756  ;;  %4185 = vst.msk [vmem:[%s8151_s6 + $0x70] sm:$0xff] %vm4170_vm0, %v4755_v33 }
 0x647   :  { %4184 = vst.msk [vmem:[%s8151_s6 + $0x68] sm:$0xff] %vm4170_vm0, %v4757_v24 }
 0x649   :  { %v4759_v58 = vpop.eup %4758 }
 0x64a   :  { %4186 = vst.msk [vmem:[%s8151_s6 + $0x78] sm:$0xff] %vm4170_vm0, %v4759_v58 }

</bundles_post_ra>
